<compile_context>
chip_gen: v5e
topology: v5e:2x2
jax: 0.10.0
libtpu: 0.0.40
codegen_flags: <defaults>
</compile_context>

<pallas_src>
import functools

import jax
import jax.numpy as jnp
import numpy as np
from jax.experimental import pallas as pl
from jax.experimental.pallas import tpu as pltpu

CHANNEL_SIZES = [1, 37, 74, 110, 147, 183, 220, 256, 171, 86, 2]
N_LAYERS = len(CHANNEL_SIZES) - 1
OUT_C = CHANNEL_SIZES[-1]
LANE = 128
HALO = N_LAYERS          # 10 convs, kernel 3 / pad 1 -> +-10 receptive field
TARGET_ROWS = 1024       # matmul M per grid step
MAX_WROWS = 1024         # per-batch-element window rows before L tiling kicks in


def _round_up(x, m):
    return (x + m - 1) // m * m


def _cdiv(a, b):
    return -(-a // b)


def _layer_plan():
    """Static per-layer kind: 'vpu' (Cin==1, no MXU), 'packed' (3*Cin<=128:
    one K=128 dot with taps packed along lanes), or 'taps' (three dots)."""
    kinds, cins = ["vpu"], [1]
    for cin in CHANNEL_SIZES[1:-1]:
        kinds.append("packed" if 3 * cin <= LANE else "taps")
        cins.append(cin)
    return tuple(kinds), tuple(cins)


def _pick_vmem_limit():
    """Per-generation VMEM budget: ~3/4 of physical (96 MiB on v5e/v6e's
    128 MiB, 48 MiB on v7x's 64 MiB per core), conservative fallback."""
    phys = None
    try:
        phys = getattr(pltpu.get_tpu_info(), "vmem_capacity_bytes", None)
    except Exception:
        phys = None
    if not phys:
        phys = 64 * 1024 * 1024
    return int(min(96 * 1024 * 1024, max(32 * 1024 * 1024, (phys * 3) // 4)))


def _fused_kernel(*refs, rows, wpad, l_tile, halo, l_real,
                  layer_kinds, layer_cins, n_layers):
    # refs = [x, w0..w9, b0..b9, out]
    x_ref = refs[0]
    w_refs = refs[1:1 + n_layers]
    b_refs = refs[1 + n_layers:1 + 2 * n_layers]
    o_ref = refs[1 + 2 * n_layers]

    f32, bf16 = jnp.float32, jnp.bfloat16

    # Row-position masks (built once, shared by all layers). Rows pack b_tile
    # windows of wpad positions each: [batch0: 0..wpad-1, batch1: ..., ...].
    pos = jax.lax.broadcasted_iota(jnp.int32, (rows, 1), 0) % wpad
    prev_mask = (pos != 0).astype(f32)            # zero the wrap of h[l-1]
    next_mask = (pos != wpad - 1).astype(f32)     # zero the wrap of h[l+1]
    if halo == 0 and wpad == l_real:
        valid_mask = None                         # every row is a real position
    else:
        # global sequence position of each window row (L-tiled / padded case)
        g = pos + (pl.program_id(1) * l_tile - halo)
        valid_mask = jnp.logical_and(g >= 0, g < l_real).astype(f32)

    def shifted(h):
        hp = pltpu.roll(h, 1, axis=0) * prev_mask          # h[l-1]
        hn = pltpu.roll(h, rows - 1, axis=0) * next_mask   # h[l+1]
        return hp, hn

    def relu_mask(a):
        a = jnp.maximum(a, 0.0)
        return a if valid_mask is None else a * valid_mask

    # ---- layer 0 (Cin == 1): VPU broadcast-multiply, no MXU ----------------
    h = jnp.broadcast_to(x_ref[0, 0], (rows, LANE))        # in-kernel lane bcast
    hp, hn = shifted(h)
    w0 = w_refs[0][...]                                    # (3, 128) f32 tap rows
    acc = b_refs[0][...] + hp * w0[0:1, :] + h * w0[1:2, :] + hn * w0[2:3, :]
    h = relu_mask(acc)

    # ---- layers 1..9: MXU matmuls, bf16 operands / f32 accumulation --------
    for i in range(1, n_layers):
        hp, hn = shifted(h)
        if layer_kinds[i] == "packed":
            # 3*Cin <= 128: pack the three taps into one 128-lane group using
            # two XLU lane-rolls (padded lanes of h are exactly zero), so this
            # layer is a single K=128 dot instead of three.
            c = layer_cins[i]
            x_in = hp + pltpu.roll(h, c, axis=1) + pltpu.roll(hn, 2 * c, axis=1)
            acc = jnp.dot(x_in.astype(bf16), w_refs[i][...],
                          preferred_element_type=f32)
        else:
            # Three accumulating dots -> no (rows, 3*Cin) im2col concat copy.
            acc = jnp.dot(hp.astype(bf16), w_refs[i][0], preferred_element_type=f32)
            acc += jnp.dot(h.astype(bf16), w_refs[i][1], preferred_element_type=f32)
            acc += jnp.dot(hn.astype(bf16), w_refs[i][2], preferred_element_type=f32)
        acc = acc + b_refs[i][...]
        h = relu_mask(acc) if i < n_layers - 1 else acc
        # Dropout after convs 3,5,7 -> identity in inference mode.

    # Only the 2 real output channels are written back (64x less HBM traffic
    # than storing the padded 128 lanes).
    o_ref[0, 0] = h[:, :OUT_C]


def prepare_params(params):
    """One-time repack of torch-layout (Cout, Cin, 3) conv params into the
    padded, pre-transposed layout the kernel expects (bf16 for MXU layers)."""
    kinds, _ = _layer_plan()
    ws, bs = [], []
    for i, (w, b) in enumerate(params):
        w = jnp.asarray(w, jnp.float32)
        b = jnp.asarray(b, jnp.float32)
        cout, cin, _k = w.shape
        cout_p = _round_up(cout, LANE)
        b_row = jnp.zeros((1, cout_p), jnp.float32).at[0, :cout].set(b)
        if kinds[i] == "vpu":                         # layer 0: Cin == 1
            wr = jnp.zeros((3, LANE), jnp.float32)
            wr = wr.at[:, :cout].set(jnp.transpose(w[:, 0, :], (1, 0)))
        elif kinds[i] == "packed":                    # 3*Cin <= 128 -> K = 128
            wr = jnp.zeros((LANE, cout_p), jnp.float32)
            for k in range(3):
                wr = wr.at[k * cin:(k + 1) * cin, :cout].set(
                    jnp.transpose(w[:, :, k], (1, 0)))
            wr = wr.astype(jnp.bfloat16)
        else:                                         # per-tap (Cin_pad, Cout_pad)
            cin_p = _round_up(cin, LANE)
            wr = jnp.zeros((3, cin_p, cout_p), jnp.float32)
            for k in range(3):
                wr = wr.at[k, :cin, :cout].set(jnp.transpose(w[:, :, k], (1, 0)))
            wr = wr.astype(jnp.bfloat16)
        ws.append(wr)
        bs.append(b_row)
    return ws, bs


def _choose_tiling(N, L):
    """Pick (b_tile, num_b, l_tile, num_l, halo, wpad)."""
    l_pad = _round_up(L, 8)
    if l_pad <= MAX_WROWS:
        num_l, l_tile, halo = 1, l_pad, 0
    else:                                   # long sequences: L-tile with halo
        halo = HALO
        l_tile = MAX_WROWS - _round_up(2 * HALO, 8)
        num_l = _cdiv(L, l_tile)
    wpad = _round_up(l_tile + 2 * halo, 8)
    b_tile = max(1, min(N, TARGET_ROWS // wpad))
    num_b = _cdiv(N, b_tile)
    # Guarantee >= 2 grid steps (v7x megacore sharding + DMA/compute overlap).
    if num_b * num_l < 2:
        if N >= 2:
            b_tile = (N + 1) // 2
            num_b = _cdiv(N, b_tile)
        elif num_l == 1 and l_pad >= 32:    # single batch: split L with halo
            halo = HALO
            num_l = 2
            l_tile = _round_up(_cdiv(L, 2), 8)
            wpad = _round_up(l_tile + 2 * halo, 8)
    return b_tile, num_b, l_tile, num_l, halo, wpad


def prob_out_deconv_net(x_ncl, prepped):
    """Inference forward pass. x_ncl: (N, 1, L) PyTorch NCL layout -> (N, 2, L)."""
    ws, bs = prepped
    n_layers = len(ws)
    kinds, cins = _layer_plan()
    N, cin, L = x_ncl.shape
    assert cin == 1 and n_layers == N_LAYERS

    b_tile, num_b, l_tile, num_l, halo, wpad = _choose_tiling(N, L)
    rows = b_tile * wpad
    n_pad = num_b * b_tile

    # ---- input windows (num_b, num_l, rows, 1); lane broadcast is in-kernel -
    x = x_ncl[:, 0, :].astype(jnp.float32)                        # (N, L)
    x = jnp.pad(x, ((0, n_pad - N), (0, 0)))
    if num_l == 1:
        xw = jnp.pad(x, ((0, 0), (0, wpad - L)))[:, None, :]      # (n_pad, 1, wpad)
    else:
        right = max(0, (num_l - 1) * l_tile + wpad - halo - L)
        xp = jnp.pad(x, ((0, 0), (halo, right)))
        xw = jnp.stack([xp[:, t * l_tile:t * l_tile + wpad] for t in range(num_l)],
                       axis=1)                                    # (n_pad, num_l, wpad)
    xw = xw.reshape(num_b, b_tile, num_l, wpad)
    xw = jnp.transpose(xw, (0, 2, 1, 3)).reshape(num_b, num_l, rows, 1)

    kernel = functools.partial(
        _fused_kernel, rows=rows, wpad=wpad, l_tile=l_tile, halo=halo,
        l_real=L, layer_kinds=kinds, layer_cins=cins, n_layers=n_layers)

    in_specs = [pl.BlockSpec((1, 1, rows, 1), lambda bt, lt: (bt, lt, 0, 0))]
    for w in ws:
        in_specs.append(pl.BlockSpec(w.shape, lambda bt, lt, _n=w.ndim: (0,) * _n))
    for b in bs:
        in_specs.append(pl.BlockSpec(b.shape, lambda bt, lt: (0, 0)))

    # Cost hint so XLA overlaps the surrounding pad/reshape with the call.
    total_rows = num_b * num_l * rows
    flops = 2 * total_rows * 3 * LANE                  # layer 0 (VPU)
    for kind, w in zip(kinds, ws):
        if kind == "packed":
            flops += 2 * total_rows * w.shape[0] * w.shape[1]
        elif kind == "taps":
            flops += 2 * total_rows * 3 * w.shape[1] * w.shape[2]
    bytes_accessed = (xw.size * 4
                      + sum(int(np.prod(w.shape)) * w.dtype.itemsize for w in ws)
                      + sum(int(np.prod(b.shape)) * 4 for b in bs)
                      + num_b * num_l * rows * OUT_C * 4)
    cost = pl.CostEstimate(flops=int(flops), transcendentals=0,
                           bytes_accessed=int(bytes_accessed))

    out = pl.pallas_call(
        kernel,
        out_shape=jax.ShapeDtypeStruct((num_b, num_l, rows, OUT_C), jnp.float32),
        grid=(num_b, num_l),
        in_specs=in_specs,
        out_specs=pl.BlockSpec((1, 1, rows, OUT_C), lambda bt, lt: (bt, lt, 0, 0)),
        compiler_params=pltpu.CompilerParams(
            dimension_semantics=("parallel", "parallel"),
            vmem_limit_bytes=_pick_vmem_limit()),
        cost_estimate=cost,
    )(xw, *ws, *bs)

    # ---- unpack: keep only the un-haloed center of each window -------------
    out = out.reshape(num_b, num_l, b_tile, wpad, OUT_C)
    out = jnp.transpose(out, (0, 2, 1, 3, 4)).reshape(n_pad, num_l, wpad, OUT_C)
    out = out[:, :, halo:halo + l_tile, :].reshape(n_pad, num_l * l_tile, OUT_C)
    out = out[:N, :L, :]
    return jnp.transpose(out, (0, 2, 1))                          # (N, 2, L)


def init_params(key):
    """Deterministic params mimicking PyTorch Conv1d default init."""
    params = []
    for i in range(len(CHANNEL_SIZES) - 1):
        in_c, out_c = CHANNEL_SIZES[i], CHANNEL_SIZES[i + 1]
        key, kw, kb = jax.random.split(key, 3)
        bound = 1.0 / np.sqrt(in_c * 3)
        w = jax.random.uniform(kw, (out_c, in_c, 3), jnp.float32, -bound, bound)
        b = jax.random.uniform(kb, (out_c,), jnp.float32, -bound, bound)
        params.append((w, b))
    return params


def _reference(x_ncl, params, *, match_bf16=False):
    """Pure-JAX reference with lax.conv.  match_bf16=True mimics the kernel's
    numerics exactly (bf16-rounded weights/activations at MXU layers, f32
    accumulation) so a tight tolerance catches structural bugs."""
    h = x_ncl.astype(jnp.float32)
    n = len(params)
    for i, (w, b) in enumerate(params):
        w = jnp.asarray(w, jnp.float32)
        if match_bf16 and i > 0:
            w = w.astype(jnp.bfloat16).astype(jnp.float32)
            h = h.astype(jnp.bfloat16).astype(jnp.float32)
        h = jax.lax.conv_general_dilated(
            h, w, window_strides=(1,), padding=((1, 1),),
            dimension_numbers=("NCH", "OIH", "NCH"))
        h = h + jnp.asarray(b, jnp.float32)[None, :, None]
        if i < n - 1:
            h = jnp.maximum(h, 0.0)
    return h


if __name__ == "__main__":
    key = jax.random.PRNGKey(0)
    key, kx1, kx2 = jax.random.split(key, 3)
    params = init_params(key)
    prepped = prepare_params(params)        # one-time weight repack

    fwd = jax.jit(prob_out_deconv_net)

    # Primary small config: batch=2, channels=1, seq=16 (2 grid steps).
    x1 = jax.random.normal(kx1, (2, 1, 16), jnp.float32)
    out1 = jax.block_until_ready(fwd(x1, prepped))
    assert out1.shape == (2, 2, 16), out1.shape
    np.testing.assert_allclose(np.asarray(out1),
                               np.asarray(_reference(x1, params, match_bf16=True)),
                               rtol=2e-3, atol=1e-4)
    np.testing.assert_allclose(np.asarray(out1),
                               np.asarray(_reference(x1, params)),
                               rtol=5e-2, atol=5e-3)

    # Secondary config: exercises the L-tiled recompute-halo path (batch=1).
    x2 = jax.random.normal(kx2, (1, 1, 300), jnp.float32)
    out2 = jax.block_until_ready(fwd(x2, prepped))
    assert out2.shape == (1, 2, 300), out2.shape
    np.testing.assert_allclose(np.asarray(out2),
                               np.asarray(_reference(x2, params, match_bf16=True)),
                               rtol=2e-3, atol=1e-4)
    np.testing.assert_allclose(np.asarray(out2),
                               np.asarray(_reference(x2, params)),
                               rtol=5e-2, atol=5e-3)

    print("KERNEL_OK")
</pallas_src>

<mosaic_0001>
module attributes {stable_mosaic.version = 11 : i64} {
  func.func @_fused_kernel(%arg0: i32, %arg1: i32, %arg2: memref<1x1x16x1xf32, #tpu.memory_space<vmem>>, %arg3: memref<3x128xf32, #tpu.memory_space<vmem>>, %arg4: memref<128x128xbf16, #tpu.memory_space<vmem>>, %arg5: memref<3x128x128xbf16, #tpu.memory_space<vmem>>, %arg6: memref<3x128x256xbf16, #tpu.memory_space<vmem>>, %arg7: memref<3x256x256xbf16, #tpu.memory_space<vmem>>, %arg8: memref<3x256x256xbf16, #tpu.memory_space<vmem>>, %arg9: memref<3x256x256xbf16, #tpu.memory_space<vmem>>, %arg10: memref<3x256x256xbf16, #tpu.memory_space<vmem>>, %arg11: memref<3x256x128xbf16, #tpu.memory_space<vmem>>, %arg12: memref<3x128x128xbf16, #tpu.memory_space<vmem>>, %arg13: memref<1x128xf32, #tpu.memory_space<vmem>>, %arg14: memref<1x128xf32, #tpu.memory_space<vmem>>, %arg15: memref<1x128xf32, #tpu.memory_space<vmem>>, %arg16: memref<1x256xf32, #tpu.memory_space<vmem>>, %arg17: memref<1x256xf32, #tpu.memory_space<vmem>>, %arg18: memref<1x256xf32, #tpu.memory_space<vmem>>, %arg19: memref<1x256xf32, #tpu.memory_space<vmem>>, %arg20: memref<1x256xf32, #tpu.memory_space<vmem>>, %arg21: memref<1x128xf32, #tpu.memory_space<vmem>>, %arg22: memref<1x128xf32, #tpu.memory_space<vmem>>, %arg23: memref<1x1x16x2xf32, #tpu.memory_space<vmem>>) attributes {dimension_semantics = [#tpu.dimension_semantics<parallel>, #tpu.dimension_semantics<parallel>], iteration_bounds = array<i64: 2, 1>, scalar_prefetch = 0 : i64, scratch_operands = 0 : i64, tpu.core_type = #tpu.core_type<tc>, window_params = [{transform_indices = @transform_0, window_bounds = array<i64: 1, 1, 16, 1>}, {pipeline_mode = #tpu.pipeline_mode<synchronous>, transform_indices = @transform_1, window_bounds = array<i64: 3, 128>}, {pipeline_mode = #tpu.pipeline_mode<synchronous>, transform_indices = @transform_2, window_bounds = array<i64: 128, 128>}, {pipeline_mode = #tpu.pipeline_mode<synchronous>, transform_indices = @transform_3, window_bounds = array<i64: 3, 128, 128>}, {pipeline_mode = #tpu.pipeline_mode<synchronous>, transform_indices = @transform_4, window_bounds = array<i64: 3, 128, 256>}, {pipeline_mode = #tpu.pipeline_mode<synchronous>, transform_indices = @transform_5, window_bounds = array<i64: 3, 256, 256>}, {pipeline_mode = #tpu.pipeline_mode<synchronous>, transform_indices = @transform_6, window_bounds = array<i64: 3, 256, 256>}, {pipeline_mode = #tpu.pipeline_mode<synchronous>, transform_indices = @transform_7, window_bounds = array<i64: 3, 256, 256>}, {pipeline_mode = #tpu.pipeline_mode<synchronous>, transform_indices = @transform_8, window_bounds = array<i64: 3, 256, 256>}, {pipeline_mode = #tpu.pipeline_mode<synchronous>, transform_indices = @transform_9, window_bounds = array<i64: 3, 256, 128>}, {pipeline_mode = #tpu.pipeline_mode<synchronous>, transform_indices = @transform_10, window_bounds = array<i64: 3, 128, 128>}, {pipeline_mode = #tpu.pipeline_mode<synchronous>, transform_indices = @transform_11, window_bounds = array<i64: 1, 128>}, {pipeline_mode = #tpu.pipeline_mode<synchronous>, transform_indices = @transform_12, window_bounds = array<i64: 1, 128>}, {pipeline_mode = #tpu.pipeline_mode<synchronous>, transform_indices = @transform_13, window_bounds = array<i64: 1, 128>}, {pipeline_mode = #tpu.pipeline_mode<synchronous>, transform_indices = @transform_14, window_bounds = array<i64: 1, 256>}, {pipeline_mode = #tpu.pipeline_mode<synchronous>, transform_indices = @transform_15, window_bounds = array<i64: 1, 256>}, {pipeline_mode = #tpu.pipeline_mode<synchronous>, transform_indices = @transform_16, window_bounds = array<i64: 1, 256>}, {pipeline_mode = #tpu.pipeline_mode<synchronous>, transform_indices = @transform_17, window_bounds = array<i64: 1, 256>}, {pipeline_mode = #tpu.pipeline_mode<synchronous>, transform_indices = @transform_18, window_bounds = array<i64: 1, 256>}, {pipeline_mode = #tpu.pipeline_mode<synchronous>, transform_indices = @transform_19, window_bounds = array<i64: 1, 128>}, {pipeline_mode = #tpu.pipeline_mode<synchronous>, transform_indices = @transform_20, window_bounds = array<i64: 1, 128>}, {transform_indices = @transform_21, window_bounds = array<i64: 1, 1, 16, 2>}]} {
    %0 = tpu.iota {dimensions = array<i32: 0>} : vector<16x1xi32>
    %c16_i32 = arith.constant 16 : i32
    %c0_i32 = arith.constant 0 : i32
    %1 = arith.cmpi eq, %c16_i32, %c0_i32 : i32
    %c1_i32 = arith.constant 1 : i32
    %2 = arith.select %1, %c1_i32, %c16_i32 : i32
    %3 = vector.broadcast %2 : i32 to vector<16x1xi32>
    %4 = arith.remsi %0, %3 : vector<16x1xi32>
    %c0_i32_0 = arith.constant 0 : i32
    %5 = vector.broadcast %c0_i32_0 : i32 to vector<16x1xi32>
    %6 = arith.cmpi ne, %4, %5 : vector<16x1xi32>
    %c0_i32_1 = arith.constant 0 : i32
    %7 = vector.broadcast %c0_i32_1 : i32 to vector<16x1xi32>
    %8 = arith.cmpi slt, %4, %7 : vector<16x1xi32>
    %c0_i32_2 = arith.constant 0 : i32
    %9 = arith.cmpi slt, %2, %c0_i32_2 : i32
    %10 = vector.broadcast %9 : i1 to vector<16x1xi1>
    %11 = vector.broadcast %10 : vector<16x1xi1> to vector<16x1xi1>
    %12 = arith.xori %8, %11 : vector<16x1xi1>
    %13 = arith.andi %12, %6 : vector<16x1xi1>
    %14 = vector.broadcast %2 : i32 to vector<16x1xi32>
    %15 = arith.addi %4, %14 : vector<16x1xi32>
    %16 = arith.select %13, %15, %4 : vector<16x1xi1>, vector<16x1xi32>
    %c0_i32_3 = arith.constant 0 : i32
    %17 = vector.broadcast %c0_i32_3 : i32 to vector<16x1xi32>
    %18 = arith.cmpi ne, %16, %17 : vector<16x1xi32>
    %19 = arith.extui %18 : vector<16x1xi1> to vector<16x1xi32>
    %20 = arith.sitofp %19 : vector<16x1xi32> to vector<16x1xf32>
    %c15_i32 = arith.constant 15 : i32
    %21 = vector.broadcast %c15_i32 : i32 to vector<16x1xi32>
    %22 = arith.cmpi ne, %16, %21 : vector<16x1xi32>
    %23 = arith.extui %22 : vector<16x1xi1> to vector<16x1xi32>
    %24 = arith.sitofp %23 : vector<16x1xi32> to vector<16x1xf32>
    %c0 = arith.constant 0 : index
    %c0_4 = arith.constant 0 : index
    %c0_5 = arith.constant 0 : index
    %c0_6 = arith.constant 0 : index
    %25 = vector.load %arg2[%c0, %c0_4, %c0_5, %c0_6] : memref<1x1x16x1xf32, #tpu.memory_space<vmem>>, vector<1x1x16x1xf32>
    %26 = vector.shape_cast %25 : vector<1x1x16x1xf32> to vector<16x1xf32>
    %27 = vector.shape_cast %26 : vector<16x1xf32> to vector<16x1xf32>
    %28 = vector.broadcast %27 : vector<16x1xf32> to vector<16x128xf32>
    %c1_i32_7 = arith.constant 1 : i32
    %29 = tpu.dynamic_rotate %28 by %c1_i32_7 dim 0 : vector<16x128xf32>, i32 -> vector<16x128xf32>
    %30 = vector.broadcast %20 : vector<16x1xf32> to vector<16x128xf32>
    %31 = arith.mulf %29, %30 : vector<16x128xf32>
    %c15_i32_8 = arith.constant 15 : i32
    %32 = tpu.dynamic_rotate %28 by %c15_i32_8 dim 0 : vector<16x128xf32>, i32 -> vector<16x128xf32>
    %33 = vector.broadcast %24 : vector<16x1xf32> to vector<16x128xf32>
    %34 = arith.mulf %32, %33 : vector<16x128xf32>
    %c0_9 = arith.constant 0 : index
    %c0_10 = arith.constant 0 : index
    %35 = vector.load %arg3[%c0_9, %c0_10] : memref<3x128xf32, #tpu.memory_space<vmem>>, vector<3x128xf32>
    %c0_11 = arith.constant 0 : index
    %c0_12 = arith.constant 0 : index
    %36 = vector.load %arg13[%c0_11, %c0_12] : memref<1x128xf32, #tpu.memory_space<vmem>>, vector<1x128xf32>
    %37 = vector.extract_strided_slice %35 {offsets = [0, 0], sizes = [1, 128], strides = [1, 1]} : vector<3x128xf32> to vector<1x128xf32>
    %38 = vector.broadcast %37 : vector<1x128xf32> to vector<16x128xf32>
    %39 = arith.mulf %31, %38 : vector<16x128xf32>
    %40 = vector.broadcast %36 : vector<1x128xf32> to vector<16x128xf32>
    %41 = arith.addf %40, %39 : vector<16x128xf32>
    %42 = vector.extract_strided_slice %35 {offsets = [1, 0], sizes = [1, 128], strides = [1, 1]} : vector<3x128xf32> to vector<1x128xf32>
    %43 = vector.broadcast %42 : vector<1x128xf32> to vector<16x128xf32>
    %44 = arith.mulf %28, %43 : vector<16x128xf32>
    %45 = arith.addf %41, %44 : vector<16x128xf32>
    %46 = vector.extract_strided_slice %35 {offsets = [2, 0], sizes = [1, 128], strides = [1, 1]} : vector<3x128xf32> to vector<1x128xf32>
    %47 = vector.broadcast %46 : vector<1x128xf32> to vector<16x128xf32>
    %48 = arith.mulf %34, %47 : vector<16x128xf32>
    %49 = arith.addf %45, %48 : vector<16x128xf32>
    %cst = arith.constant 0.000000e+00 : f32
    %50 = vector.broadcast %cst : f32 to vector<16x128xf32>
    %51 = arith.maximumf %49, %50 : vector<16x128xf32>
    %c1_i32_13 = arith.constant 1 : i32
    %52 = tpu.dynamic_rotate %51 by %c1_i32_13 dim 0 : vector<16x128xf32>, i32 -> vector<16x128xf32>
    %53 = vector.broadcast %20 : vector<16x1xf32> to vector<16x128xf32>
    %54 = arith.mulf %52, %53 : vector<16x128xf32>
    %c15_i32_14 = arith.constant 15 : i32
    %55 = tpu.dynamic_rotate %51 by %c15_i32_14 dim 0 : vector<16x128xf32>, i32 -> vector<16x128xf32>
    %56 = vector.broadcast %24 : vector<16x1xf32> to vector<16x128xf32>
    %57 = arith.mulf %55, %56 : vector<16x128xf32>
    %c37_i32 = arith.constant 37 : i32
    %58 = tpu.dynamic_rotate %51 by %c37_i32 dim 1 : vector<16x128xf32>, i32 -> vector<16x128xf32>
    %59 = arith.addf %54, %58 : vector<16x128xf32>
    %c74_i32 = arith.constant 74 : i32
    %60 = tpu.dynamic_rotate %57 by %c74_i32 dim 1 : vector<16x128xf32>, i32 -> vector<16x128xf32>
    %61 = arith.addf %59, %60 : vector<16x128xf32>
    %62 = arith.truncf %61 : vector<16x128xf32> to vector<16x128xbf16>
    %c0_15 = arith.constant 0 : index
    %c0_16 = arith.constant 0 : index
    %63 = vector.load %arg4[%c0_15, %c0_16] : memref<128x128xbf16, #tpu.memory_space<vmem>>, vector<128x128xbf16>
    %cst_17 = arith.constant dense<0.000000e+00> : vector<16x128xf32>
    %64 = tpu.matmul %62, %63, %cst_17 {dimension_numbers = #tpu.dot_dimension_numbers<[1], [0], [0], [1], [0, 0, 1, 1], [], []>} : vector<16x128xbf16>, vector<128x128xbf16>, vector<16x128xf32> -> vector<16x128xf32>
    %c0_18 = arith.constant 0 : index
    %c0_19 = arith.constant 0 : index
    %65 = vector.load %arg14[%c0_18, %c0_19] : memref<1x128xf32, #tpu.memory_space<vmem>>, vector<1x128xf32>
    %66 = vector.broadcast %65 : vector<1x128xf32> to vector<16x128xf32>
    %67 = arith.addf %64, %66 : vector<16x128xf32>
    %cst_20 = arith.constant 0.000000e+00 : f32
    %68 = vector.broadcast %cst_20 : f32 to vector<16x128xf32>
    %69 = arith.maximumf %67, %68 : vector<16x128xf32>
    %c1_i32_21 = arith.constant 1 : i32
    %70 = tpu.dynamic_rotate %69 by %c1_i32_21 dim 0 : vector<16x128xf32>, i32 -> vector<16x128xf32>
    %71 = vector.broadcast %20 : vector<16x1xf32> to vector<16x128xf32>
    %72 = arith.mulf %70, %71 : vector<16x128xf32>
    %c15_i32_22 = arith.constant 15 : i32
    %73 = tpu.dynamic_rotate %69 by %c15_i32_22 dim 0 : vector<16x128xf32>, i32 -> vector<16x128xf32>
    %74 = vector.broadcast %24 : vector<16x1xf32> to vector<16x128xf32>
    %75 = arith.mulf %73, %74 : vector<16x128xf32>
    %76 = arith.truncf %72 : vector<16x128xf32> to vector<16x128xbf16>
    %c0_23 = arith.constant 0 : index
    %c0_24 = arith.constant 0 : index
    %c0_25 = arith.constant 0 : index
    %77 = vector.load %arg5[%c0_23, %c0_24, %c0_25] : memref<3x128x128xbf16, #tpu.memory_space<vmem>>, vector<1x128x128xbf16>
    %78 = vector.shape_cast %77 : vector<1x128x128xbf16> to vector<128x128xbf16>
    %cst_26 = arith.constant dense<0.000000e+00> : vector<16x128xf32>
    %79 = tpu.matmul %76, %78, %cst_26 {dimension_numbers = #tpu.dot_dimension_numbers<[1], [0], [0], [1], [0, 0, 1, 1], [], []>} : vector<16x128xbf16>, vector<128x128xbf16>, vector<16x128xf32> -> vector<16x128xf32>
    %80 = arith.truncf %69 : vector<16x128xf32> to vector<16x128xbf16>
    %c1 = arith.constant 1 : index
    %c0_27 = arith.constant 0 : index
    %c0_28 = arith.constant 0 : index
    %81 = vector.load %arg5[%c1, %c0_27, %c0_28] : memref<3x128x128xbf16, #tpu.memory_space<vmem>>, vector<1x128x128xbf16>
    %82 = vector.shape_cast %81 : vector<1x128x128xbf16> to vector<128x128xbf16>
    %cst_29 = arith.constant dense<0.000000e+00> : vector<16x128xf32>
    %83 = tpu.matmul %80, %82, %cst_29 {dimension_numbers = #tpu.dot_dimension_numbers<[1], [0], [0], [1], [0, 0, 1, 1], [], []>} : vector<16x128xbf16>, vector<128x128xbf16>, vector<16x128xf32> -> vector<16x128xf32>
    %84 = arith.addf %79, %83 : vector<16x128xf32>
    %85 = arith.truncf %75 : vector<16x128xf32> to vector<16x128xbf16>
    %c2 = arith.constant 2 : index
    %c0_30 = arith.constant 0 : index
    %c0_31 = arith.constant 0 : index
    %86 = vector.load %arg5[%c2, %c0_30, %c0_31] : memref<3x128x128xbf16, #tpu.memory_space<vmem>>, vector<1x128x128xbf16>
    %87 = vector.shape_cast %86 : vector<1x128x128xbf16> to vector<128x128xbf16>
    %cst_32 = arith.constant dense<0.000000e+00> : vector<16x128xf32>
    %88 = tpu.matmul %85, %87, %cst_32 {dimension_numbers = #tpu.dot_dimension_numbers<[1], [0], [0], [1], [0, 0, 1, 1], [], []>} : vector<16x128xbf16>, vector<128x128xbf16>, vector<16x128xf32> -> vector<16x128xf32>
    %89 = arith.addf %84, %88 : vector<16x128xf32>
    %c0_33 = arith.constant 0 : index
    %c0_34 = arith.constant 0 : index
    %90 = vector.load %arg15[%c0_33, %c0_34] : memref<1x128xf32, #tpu.memory_space<vmem>>, vector<1x128xf32>
    %91 = vector.broadcast %90 : vector<1x128xf32> to vector<16x128xf32>
    %92 = arith.addf %89, %91 : vector<16x128xf32>
    %cst_35 = arith.constant 0.000000e+00 : f32
    %93 = vector.broadcast %cst_35 : f32 to vector<16x128xf32>
    %94 = arith.maximumf %92, %93 : vector<16x128xf32>
    %c1_i32_36 = arith.constant 1 : i32
    %95 = tpu.dynamic_rotate %94 by %c1_i32_36 dim 0 : vector<16x128xf32>, i32 -> vector<16x128xf32>
    %96 = vector.broadcast %20 : vector<16x1xf32> to vector<16x128xf32>
    %97 = arith.mulf %95, %96 : vector<16x128xf32>
    %c15_i32_37 = arith.constant 15 : i32
    %98 = tpu.dynamic_rotate %94 by %c15_i32_37 dim 0 : vector<16x128xf32>, i32 -> vector<16x128xf32>
    %99 = vector.broadcast %24 : vector<16x1xf32> to vector<16x128xf32>
    %100 = arith.mulf %98, %99 : vector<16x128xf32>
    %101 = arith.truncf %97 : vector<16x128xf32> to vector<16x128xbf16>
    %c0_38 = arith.constant 0 : index
    %c0_39 = arith.constant 0 : index
    %c0_40 = arith.constant 0 : index
    %102 = vector.load %arg6[%c0_38, %c0_39, %c0_40] : memref<3x128x256xbf16, #tpu.memory_space<vmem>>, vector<1x128x256xbf16>
    %103 = vector.shape_cast %102 : vector<1x128x256xbf16> to vector<128x256xbf16>
    %cst_41 = arith.constant dense<0.000000e+00> : vector<16x256xf32>
    %104 = tpu.matmul %101, %103, %cst_41 {dimension_numbers = #tpu.dot_dimension_numbers<[1], [0], [0], [1], [0, 0, 1, 1], [], []>} : vector<16x128xbf16>, vector<128x256xbf16>, vector<16x256xf32> -> vector<16x256xf32>
    %105 = arith.truncf %94 : vector<16x128xf32> to vector<16x128xbf16>
    %c1_42 = arith.constant 1 : index
    %c0_43 = arith.constant 0 : index
    %c0_44 = arith.constant 0 : index
    %106 = vector.load %arg6[%c1_42, %c0_43, %c0_44] : memref<3x128x256xbf16, #tpu.memory_space<vmem>>, vector<1x128x256xbf16>
    %107 = vector.shape_cast %106 : vector<1x128x256xbf16> to vector<128x256xbf16>
    %cst_45 = arith.constant dense<0.000000e+00> : vector<16x256xf32>
    %108 = tpu.matmul %105, %107, %cst_45 {dimension_numbers = #tpu.dot_dimension_numbers<[1], [0], [0], [1], [0, 0, 1, 1], [], []>} : vector<16x128xbf16>, vector<128x256xbf16>, vector<16x256xf32> -> vector<16x256xf32>
    %109 = arith.addf %104, %108 : vector<16x256xf32>
    %110 = arith.truncf %100 : vector<16x128xf32> to vector<16x128xbf16>
    %c2_46 = arith.constant 2 : index
    %c0_47 = arith.constant 0 : index
    %c0_48 = arith.constant 0 : index
    %111 = vector.load %arg6[%c2_46, %c0_47, %c0_48] : memref<3x128x256xbf16, #tpu.memory_space<vmem>>, vector<1x128x256xbf16>
    %112 = vector.shape_cast %111 : vector<1x128x256xbf16> to vector<128x256xbf16>
    %cst_49 = arith.constant dense<0.000000e+00> : vector<16x256xf32>
    %113 = tpu.matmul %110, %112, %cst_49 {dimension_numbers = #tpu.dot_dimension_numbers<[1], [0], [0], [1], [0, 0, 1, 1], [], []>} : vector<16x128xbf16>, vector<128x256xbf16>, vector<16x256xf32> -> vector<16x256xf32>
    %114 = arith.addf %109, %113 : vector<16x256xf32>
    %c0_50 = arith.constant 0 : index
    %c0_51 = arith.constant 0 : index
    %115 = vector.load %arg16[%c0_50, %c0_51] : memref<1x256xf32, #tpu.memory_space<vmem>>, vector<1x256xf32>
    %116 = vector.broadcast %115 : vector<1x256xf32> to vector<16x256xf32>
    %117 = arith.addf %114, %116 : vector<16x256xf32>
    %cst_52 = arith.constant 0.000000e+00 : f32
    %118 = vector.broadcast %cst_52 : f32 to vector<16x256xf32>
    %119 = arith.maximumf %117, %118 : vector<16x256xf32>
    %c1_i32_53 = arith.constant 1 : i32
    %120 = tpu.dynamic_rotate %119 by %c1_i32_53 dim 0 : vector<16x256xf32>, i32 -> vector<16x256xf32>
    %121 = vector.broadcast %20 : vector<16x1xf32> to vector<16x256xf32>
    %122 = arith.mulf %120, %121 : vector<16x256xf32>
    %c15_i32_54 = arith.constant 15 : i32
    %123 = tpu.dynamic_rotate %119 by %c15_i32_54 dim 0 : vector<16x256xf32>, i32 -> vector<16x256xf32>
    %124 = vector.broadcast %24 : vector<16x1xf32> to vector<16x256xf32>
    %125 = arith.mulf %123, %124 : vector<16x256xf32>
    %126 = arith.truncf %122 : vector<16x256xf32> to vector<16x256xbf16>
    %c0_55 = arith.constant 0 : index
    %c0_56 = arith.constant 0 : index
    %c0_57 = arith.constant 0 : index
    %127 = vector.load %arg7[%c0_55, %c0_56, %c0_57] : memref<3x256x256xbf16, #tpu.memory_space<vmem>>, vector<1x256x256xbf16>
    %128 = vector.shape_cast %127 : vector<1x256x256xbf16> to vector<256x256xbf16>
    %cst_58 = arith.constant dense<0.000000e+00> : vector<16x256xf32>
    %129 = tpu.matmul %126, %128, %cst_58 {dimension_numbers = #tpu.dot_dimension_numbers<[1], [0], [0], [1], [0, 0, 1, 1], [], []>} : vector<16x256xbf16>, vector<256x256xbf16>, vector<16x256xf32> -> vector<16x256xf32>
    %130 = arith.truncf %119 : vector<16x256xf32> to vector<16x256xbf16>
    %c1_59 = arith.constant 1 : index
    %c0_60 = arith.constant 0 : index
    %c0_61 = arith.constant 0 : index
    %131 = vector.load %arg7[%c1_59, %c0_60, %c0_61] : memref<3x256x256xbf16, #tpu.memory_space<vmem>>, vector<1x256x256xbf16>
    %132 = vector.shape_cast %131 : vector<1x256x256xbf16> to vector<256x256xbf16>
    %cst_62 = arith.constant dense<0.000000e+00> : vector<16x256xf32>
    %133 = tpu.matmul %130, %132, %cst_62 {dimension_numbers = #tpu.dot_dimension_numbers<[1], [0], [0], [1], [0, 0, 1, 1], [], []>} : vector<16x256xbf16>, vector<256x256xbf16>, vector<16x256xf32> -> vector<16x256xf32>
    %134 = arith.addf %129, %133 : vector<16x256xf32>
    %135 = arith.truncf %125 : vector<16x256xf32> to vector<16x256xbf16>
    %c2_63 = arith.constant 2 : index
    %c0_64 = arith.constant 0 : index
    %c0_65 = arith.constant 0 : index
    %136 = vector.load %arg7[%c2_63, %c0_64, %c0_65] : memref<3x256x256xbf16, #tpu.memory_space<vmem>>, vector<1x256x256xbf16>
    %137 = vector.shape_cast %136 : vector<1x256x256xbf16> to vector<256x256xbf16>
    %cst_66 = arith.constant dense<0.000000e+00> : vector<16x256xf32>
    %138 = tpu.matmul %135, %137, %cst_66 {dimension_numbers = #tpu.dot_dimension_numbers<[1], [0], [0], [1], [0, 0, 1, 1], [], []>} : vector<16x256xbf16>, vector<256x256xbf16>, vector<16x256xf32> -> vector<16x256xf32>
    %139 = arith.addf %134, %138 : vector<16x256xf32>
    %c0_67 = arith.constant 0 : index
    %c0_68 = arith.constant 0 : index
    %140 = vector.load %arg17[%c0_67, %c0_68] : memref<1x256xf32, #tpu.memory_space<vmem>>, vector<1x256xf32>
    %141 = vector.broadcast %140 : vector<1x256xf32> to vector<16x256xf32>
    %142 = arith.addf %139, %141 : vector<16x256xf32>
    %cst_69 = arith.constant 0.000000e+00 : f32
    %143 = vector.broadcast %cst_69 : f32 to vector<16x256xf32>
    %144 = arith.maximumf %142, %143 : vector<16x256xf32>
    %c1_i32_70 = arith.constant 1 : i32
    %145 = tpu.dynamic_rotate %144 by %c1_i32_70 dim 0 : vector<16x256xf32>, i32 -> vector<16x256xf32>
    %146 = vector.broadcast %20 : vector<16x1xf32> to vector<16x256xf32>
    %147 = arith.mulf %145, %146 : vector<16x256xf32>
    %c15_i32_71 = arith.constant 15 : i32
    %148 = tpu.dynamic_rotate %144 by %c15_i32_71 dim 0 : vector<16x256xf32>, i32 -> vector<16x256xf32>
    %149 = vector.broadcast %24 : vector<16x1xf32> to vector<16x256xf32>
    %150 = arith.mulf %148, %149 : vector<16x256xf32>
    %151 = arith.truncf %147 : vector<16x256xf32> to vector<16x256xbf16>
    %c0_72 = arith.constant 0 : index
    %c0_73 = arith.constant 0 : index
    %c0_74 = arith.constant 0 : index
    %152 = vector.load %arg8[%c0_72, %c0_73, %c0_74] : memref<3x256x256xbf16, #tpu.memory_space<vmem>>, vector<1x256x256xbf16>
    %153 = vector.shape_cast %152 : vector<1x256x256xbf16> to vector<256x256xbf16>
    %cst_75 = arith.constant dense<0.000000e+00> : vector<16x256xf32>
    %154 = tpu.matmul %151, %153, %cst_75 {dimension_numbers = #tpu.dot_dimension_numbers<[1], [0], [0], [1], [0, 0, 1, 1], [], []>} : vector<16x256xbf16>, vector<256x256xbf16>, vector<16x256xf32> -> vector<16x256xf32>
    %155 = arith.truncf %144 : vector<16x256xf32> to vector<16x256xbf16>
    %c1_76 = arith.constant 1 : index
    %c0_77 = arith.constant 0 : index
    %c0_78 = arith.constant 0 : index
    %156 = vector.load %arg8[%c1_76, %c0_77, %c0_78] : memref<3x256x256xbf16, #tpu.memory_space<vmem>>, vector<1x256x256xbf16>
    %157 = vector.shape_cast %156 : vector<1x256x256xbf16> to vector<256x256xbf16>
    %cst_79 = arith.constant dense<0.000000e+00> : vector<16x256xf32>
    %158 = tpu.matmul %155, %157, %cst_79 {dimension_numbers = #tpu.dot_dimension_numbers<[1], [0], [0], [1], [0, 0, 1, 1], [], []>} : vector<16x256xbf16>, vector<256x256xbf16>, vector<16x256xf32> -> vector<16x256xf32>
    %159 = arith.addf %154, %158 : vector<16x256xf32>
    %160 = arith.truncf %150 : vector<16x256xf32> to vector<16x256xbf16>
    %c2_80 = arith.constant 2 : index
    %c0_81 = arith.constant 0 : index
    %c0_82 = arith.constant 0 : index
    %161 = vector.load %arg8[%c2_80, %c0_81, %c0_82] : memref<3x256x256xbf16, #tpu.memory_space<vmem>>, vector<1x256x256xbf16>
    %162 = vector.shape_cast %161 : vector<1x256x256xbf16> to vector<256x256xbf16>
    %cst_83 = arith.constant dense<0.000000e+00> : vector<16x256xf32>
    %163 = tpu.matmul %160, %162, %cst_83 {dimension_numbers = #tpu.dot_dimension_numbers<[1], [0], [0], [1], [0, 0, 1, 1], [], []>} : vector<16x256xbf16>, vector<256x256xbf16>, vector<16x256xf32> -> vector<16x256xf32>
    %164 = arith.addf %159, %163 : vector<16x256xf32>
    %c0_84 = arith.constant 0 : index
    %c0_85 = arith.constant 0 : index
    %165 = vector.load %arg18[%c0_84, %c0_85] : memref<1x256xf32, #tpu.memory_space<vmem>>, vector<1x256xf32>
    %166 = vector.broadcast %165 : vector<1x256xf32> to vector<16x256xf32>
    %167 = arith.addf %164, %166 : vector<16x256xf32>
    %cst_86 = arith.constant 0.000000e+00 : f32
    %168 = vector.broadcast %cst_86 : f32 to vector<16x256xf32>
    %169 = arith.maximumf %167, %168 : vector<16x256xf32>
    %c1_i32_87 = arith.constant 1 : i32
    %170 = tpu.dynamic_rotate %169 by %c1_i32_87 dim 0 : vector<16x256xf32>, i32 -> vector<16x256xf32>
    %171 = vector.broadcast %20 : vector<16x1xf32> to vector<16x256xf32>
    %172 = arith.mulf %170, %171 : vector<16x256xf32>
    %c15_i32_88 = arith.constant 15 : i32
    %173 = tpu.dynamic_rotate %169 by %c15_i32_88 dim 0 : vector<16x256xf32>, i32 -> vector<16x256xf32>
    %174 = vector.broadcast %24 : vector<16x1xf32> to vector<16x256xf32>
    %175 = arith.mulf %173, %174 : vector<16x256xf32>
    %176 = arith.truncf %172 : vector<16x256xf32> to vector<16x256xbf16>
    %c0_89 = arith.constant 0 : index
    %c0_90 = arith.constant 0 : index
    %c0_91 = arith.constant 0 : index
    %177 = vector.load %arg9[%c0_89, %c0_90, %c0_91] : memref<3x256x256xbf16, #tpu.memory_space<vmem>>, vector<1x256x256xbf16>
    %178 = vector.shape_cast %177 : vector<1x256x256xbf16> to vector<256x256xbf16>
    %cst_92 = arith.constant dense<0.000000e+00> : vector<16x256xf32>
    %179 = tpu.matmul %176, %178, %cst_92 {dimension_numbers = #tpu.dot_dimension_numbers<[1], [0], [0], [1], [0, 0, 1, 1], [], []>} : vector<16x256xbf16>, vector<256x256xbf16>, vector<16x256xf32> -> vector<16x256xf32>
    %180 = arith.truncf %169 : vector<16x256xf32> to vector<16x256xbf16>
    %c1_93 = arith.constant 1 : index
    %c0_94 = arith.constant 0 : index
    %c0_95 = arith.constant 0 : index
    %181 = vector.load %arg9[%c1_93, %c0_94, %c0_95] : memref<3x256x256xbf16, #tpu.memory_space<vmem>>, vector<1x256x256xbf16>
    %182 = vector.shape_cast %181 : vector<1x256x256xbf16> to vector<256x256xbf16>
    %cst_96 = arith.constant dense<0.000000e+00> : vector<16x256xf32>
    %183 = tpu.matmul %180, %182, %cst_96 {dimension_numbers = #tpu.dot_dimension_numbers<[1], [0], [0], [1], [0, 0, 1, 1], [], []>} : vector<16x256xbf16>, vector<256x256xbf16>, vector<16x256xf32> -> vector<16x256xf32>
    %184 = arith.addf %179, %183 : vector<16x256xf32>
    %185 = arith.truncf %175 : vector<16x256xf32> to vector<16x256xbf16>
    %c2_97 = arith.constant 2 : index
    %c0_98 = arith.constant 0 : index
    %c0_99 = arith.constant 0 : index
    %186 = vector.load %arg9[%c2_97, %c0_98, %c0_99] : memref<3x256x256xbf16, #tpu.memory_space<vmem>>, vector<1x256x256xbf16>
    %187 = vector.shape_cast %186 : vector<1x256x256xbf16> to vector<256x256xbf16>
    %cst_100 = arith.constant dense<0.000000e+00> : vector<16x256xf32>
    %188 = tpu.matmul %185, %187, %cst_100 {dimension_numbers = #tpu.dot_dimension_numbers<[1], [0], [0], [1], [0, 0, 1, 1], [], []>} : vector<16x256xbf16>, vector<256x256xbf16>, vector<16x256xf32> -> vector<16x256xf32>
    %189 = arith.addf %184, %188 : vector<16x256xf32>
    %c0_101 = arith.constant 0 : index
    %c0_102 = arith.constant 0 : index
    %190 = vector.load %arg19[%c0_101, %c0_102] : memref<1x256xf32, #tpu.memory_space<vmem>>, vector<1x256xf32>
    %191 = vector.broadcast %190 : vector<1x256xf32> to vector<16x256xf32>
    %192 = arith.addf %189, %191 : vector<16x256xf32>
    %cst_103 = arith.constant 0.000000e+00 : f32
    %193 = vector.broadcast %cst_103 : f32 to vector<16x256xf32>
    %194 = arith.maximumf %192, %193 : vector<16x256xf32>
    %c1_i32_104 = arith.constant 1 : i32
    %195 = tpu.dynamic_rotate %194 by %c1_i32_104 dim 0 : vector<16x256xf32>, i32 -> vector<16x256xf32>
    %196 = vector.broadcast %20 : vector<16x1xf32> to vector<16x256xf32>
    %197 = arith.mulf %195, %196 : vector<16x256xf32>
    %c15_i32_105 = arith.constant 15 : i32
    %198 = tpu.dynamic_rotate %194 by %c15_i32_105 dim 0 : vector<16x256xf32>, i32 -> vector<16x256xf32>
    %199 = vector.broadcast %24 : vector<16x1xf32> to vector<16x256xf32>
    %200 = arith.mulf %198, %199 : vector<16x256xf32>
    %201 = arith.truncf %197 : vector<16x256xf32> to vector<16x256xbf16>
    %c0_106 = arith.constant 0 : index
    %c0_107 = arith.constant 0 : index
    %c0_108 = arith.constant 0 : index
    %202 = vector.load %arg10[%c0_106, %c0_107, %c0_108] : memref<3x256x256xbf16, #tpu.memory_space<vmem>>, vector<1x256x256xbf16>
    %203 = vector.shape_cast %202 : vector<1x256x256xbf16> to vector<256x256xbf16>
    %cst_109 = arith.constant dense<0.000000e+00> : vector<16x256xf32>
    %204 = tpu.matmul %201, %203, %cst_109 {dimension_numbers = #tpu.dot_dimension_numbers<[1], [0], [0], [1], [0, 0, 1, 1], [], []>} : vector<16x256xbf16>, vector<256x256xbf16>, vector<16x256xf32> -> vector<16x256xf32>
    %205 = arith.truncf %194 : vector<16x256xf32> to vector<16x256xbf16>
    %c1_110 = arith.constant 1 : index
    %c0_111 = arith.constant 0 : index
    %c0_112 = arith.constant 0 : index
    %206 = vector.load %arg10[%c1_110, %c0_111, %c0_112] : memref<3x256x256xbf16, #tpu.memory_space<vmem>>, vector<1x256x256xbf16>
    %207 = vector.shape_cast %206 : vector<1x256x256xbf16> to vector<256x256xbf16>
    %cst_113 = arith.constant dense<0.000000e+00> : vector<16x256xf32>
    %208 = tpu.matmul %205, %207, %cst_113 {dimension_numbers = #tpu.dot_dimension_numbers<[1], [0], [0], [1], [0, 0, 1, 1], [], []>} : vector<16x256xbf16>, vector<256x256xbf16>, vector<16x256xf32> -> vector<16x256xf32>
    %209 = arith.addf %204, %208 : vector<16x256xf32>
    %210 = arith.truncf %200 : vector<16x256xf32> to vector<16x256xbf16>
    %c2_114 = arith.constant 2 : index
    %c0_115 = arith.constant 0 : index
    %c0_116 = arith.constant 0 : index
    %211 = vector.load %arg10[%c2_114, %c0_115, %c0_116] : memref<3x256x256xbf16, #tpu.memory_space<vmem>>, vector<1x256x256xbf16>
    %212 = vector.shape_cast %211 : vector<1x256x256xbf16> to vector<256x256xbf16>
    %cst_117 = arith.constant dense<0.000000e+00> : vector<16x256xf32>
    %213 = tpu.matmul %210, %212, %cst_117 {dimension_numbers = #tpu.dot_dimension_numbers<[1], [0], [0], [1], [0, 0, 1, 1], [], []>} : vector<16x256xbf16>, vector<256x256xbf16>, vector<16x256xf32> -> vector<16x256xf32>
    %214 = arith.addf %209, %213 : vector<16x256xf32>
    %c0_118 = arith.constant 0 : index
    %c0_119 = arith.constant 0 : index
    %215 = vector.load %arg20[%c0_118, %c0_119] : memref<1x256xf32, #tpu.memory_space<vmem>>, vector<1x256xf32>
    %216 = vector.broadcast %215 : vector<1x256xf32> to vector<16x256xf32>
    %217 = arith.addf %214, %216 : vector<16x256xf32>
    %cst_120 = arith.constant 0.000000e+00 : f32
    %218 = vector.broadcast %cst_120 : f32 to vector<16x256xf32>
    %219 = arith.maximumf %217, %218 : vector<16x256xf32>
    %c1_i32_121 = arith.constant 1 : i32
    %220 = tpu.dynamic_rotate %219 by %c1_i32_121 dim 0 : vector<16x256xf32>, i32 -> vector<16x256xf32>
    %221 = vector.broadcast %20 : vector<16x1xf32> to vector<16x256xf32>
    %222 = arith.mulf %220, %221 : vector<16x256xf32>
    %c15_i32_122 = arith.constant 15 : i32
    %223 = tpu.dynamic_rotate %219 by %c15_i32_122 dim 0 : vector<16x256xf32>, i32 -> vector<16x256xf32>
    %224 = vector.broadcast %24 : vector<16x1xf32> to vector<16x256xf32>
    %225 = arith.mulf %223, %224 : vector<16x256xf32>
    %226 = arith.truncf %222 : vector<16x256xf32> to vector<16x256xbf16>
    %c0_123 = arith.constant 0 : index
    %c0_124 = arith.constant 0 : index
    %c0_125 = arith.constant 0 : index
    %227 = vector.load %arg11[%c0_123, %c0_124, %c0_125] : memref<3x256x128xbf16, #tpu.memory_space<vmem>>, vector<1x256x128xbf16>
    %228 = vector.shape_cast %227 : vector<1x256x128xbf16> to vector<256x128xbf16>
    %cst_126 = arith.constant dense<0.000000e+00> : vector<16x128xf32>
    %229 = tpu.matmul %226, %228, %cst_126 {dimension_numbers = #tpu.dot_dimension_numbers<[1], [0], [0], [1], [0, 0, 1, 1], [], []>} : vector<16x256xbf16>, vector<256x128xbf16>, vector<16x128xf32> -> vector<16x128xf32>
    %230 = arith.truncf %219 : vector<16x256xf32> to vector<16x256xbf16>
    %c1_127 = arith.constant 1 : index
    %c0_128 = arith.constant 0 : index
    %c0_129 = arith.constant 0 : index
    %231 = vector.load %arg11[%c1_127, %c0_128, %c0_129] : memref<3x256x128xbf16, #tpu.memory_space<vmem>>, vector<1x256x128xbf16>
    %232 = vector.shape_cast %231 : vector<1x256x128xbf16> to vector<256x128xbf16>
    %cst_130 = arith.constant dense<0.000000e+00> : vector<16x128xf32>
    %233 = tpu.matmul %230, %232, %cst_130 {dimension_numbers = #tpu.dot_dimension_numbers<[1], [0], [0], [1], [0, 0, 1, 1], [], []>} : vector<16x256xbf16>, vector<256x128xbf16>, vector<16x128xf32> -> vector<16x128xf32>
    %234 = arith.addf %229, %233 : vector<16x128xf32>
    %235 = arith.truncf %225 : vector<16x256xf32> to vector<16x256xbf16>
    %c2_131 = arith.constant 2 : index
    %c0_132 = arith.constant 0 : index
    %c0_133 = arith.constant 0 : index
    %236 = vector.load %arg11[%c2_131, %c0_132, %c0_133] : memref<3x256x128xbf16, #tpu.memory_space<vmem>>, vector<1x256x128xbf16>
    %237 = vector.shape_cast %236 : vector<1x256x128xbf16> to vector<256x128xbf16>
    %cst_134 = arith.constant dense<0.000000e+00> : vector<16x128xf32>
    %238 = tpu.matmul %235, %237, %cst_134 {dimension_numbers = #tpu.dot_dimension_numbers<[1], [0], [0], [1], [0, 0, 1, 1], [], []>} : vector<16x256xbf16>, vector<256x128xbf16>, vector<16x128xf32> -> vector<16x128xf32>
    %239 = arith.addf %234, %238 : vector<16x128xf32>
    %c0_135 = arith.constant 0 : index
    %c0_136 = arith.constant 0 : index
    %240 = vector.load %arg21[%c0_135, %c0_136] : memref<1x128xf32, #tpu.memory_space<vmem>>, vector<1x128xf32>
    %241 = vector.broadcast %240 : vector<1x128xf32> to vector<16x128xf32>
    %242 = arith.addf %239, %241 : vector<16x128xf32>
    %cst_137 = arith.constant 0.000000e+00 : f32
    %243 = vector.broadcast %cst_137 : f32 to vector<16x128xf32>
    %244 = arith.maximumf %242, %243 : vector<16x128xf32>
    %c1_i32_138 = arith.constant 1 : i32
    %245 = tpu.dynamic_rotate %244 by %c1_i32_138 dim 0 : vector<16x128xf32>, i32 -> vector<16x128xf32>
    %246 = vector.broadcast %20 : vector<16x1xf32> to vector<16x128xf32>
    %247 = arith.mulf %245, %246 : vector<16x128xf32>
    %c15_i32_139 = arith.constant 15 : i32
    %248 = tpu.dynamic_rotate %244 by %c15_i32_139 dim 0 : vector<16x128xf32>, i32 -> vector<16x128xf32>
    %249 = vector.broadcast %24 : vector<16x1xf32> to vector<16x128xf32>
    %250 = arith.mulf %248, %249 : vector<16x128xf32>
    %251 = arith.truncf %247 : vector<16x128xf32> to vector<16x128xbf16>
    %c0_140 = arith.constant 0 : index
    %c0_141 = arith.constant 0 : index
    %c0_142 = arith.constant 0 : index
    %252 = vector.load %arg12[%c0_140, %c0_141, %c0_142] : memref<3x128x128xbf16, #tpu.memory_space<vmem>>, vector<1x128x128xbf16>
    %253 = vector.shape_cast %252 : vector<1x128x128xbf16> to vector<128x128xbf16>
    %cst_143 = arith.constant dense<0.000000e+00> : vector<16x128xf32>
    %254 = tpu.matmul %251, %253, %cst_143 {dimension_numbers = #tpu.dot_dimension_numbers<[1], [0], [0], [1], [0, 0, 1, 1], [], []>} : vector<16x128xbf16>, vector<128x128xbf16>, vector<16x128xf32> -> vector<16x128xf32>
    %255 = arith.truncf %244 : vector<16x128xf32> to vector<16x128xbf16>
    %c1_144 = arith.constant 1 : index
    %c0_145 = arith.constant 0 : index
    %c0_146 = arith.constant 0 : index
    %256 = vector.load %arg12[%c1_144, %c0_145, %c0_146] : memref<3x128x128xbf16, #tpu.memory_space<vmem>>, vector<1x128x128xbf16>
    %257 = vector.shape_cast %256 : vector<1x128x128xbf16> to vector<128x128xbf16>
    %cst_147 = arith.constant dense<0.000000e+00> : vector<16x128xf32>
    %258 = tpu.matmul %255, %257, %cst_147 {dimension_numbers = #tpu.dot_dimension_numbers<[1], [0], [0], [1], [0, 0, 1, 1], [], []>} : vector<16x128xbf16>, vector<128x128xbf16>, vector<16x128xf32> -> vector<16x128xf32>
    %259 = arith.addf %254, %258 : vector<16x128xf32>
    %260 = arith.truncf %250 : vector<16x128xf32> to vector<16x128xbf16>
    %c2_148 = arith.constant 2 : index
    %c0_149 = arith.constant 0 : index
    %c0_150 = arith.constant 0 : index
    %261 = vector.load %arg12[%c2_148, %c0_149, %c0_150] : memref<3x128x128xbf16, #tpu.memory_space<vmem>>, vector<1x128x128xbf16>
    %262 = vector.shape_cast %261 : vector<1x128x128xbf16> to vector<128x128xbf16>
    %cst_151 = arith.constant dense<0.000000e+00> : vector<16x128xf32>
    %263 = tpu.matmul %260, %262, %cst_151 {dimension_numbers = #tpu.dot_dimension_numbers<[1], [0], [0], [1], [0, 0, 1, 1], [], []>} : vector<16x128xbf16>, vector<128x128xbf16>, vector<16x128xf32> -> vector<16x128xf32>
    %264 = arith.addf %259, %263 : vector<16x128xf32>
    %c0_152 = arith.constant 0 : index
    %c0_153 = arith.constant 0 : index
    %265 = vector.load %arg22[%c0_152, %c0_153] : memref<1x128xf32, #tpu.memory_space<vmem>>, vector<1x128xf32>
    %266 = vector.broadcast %265 : vector<1x128xf32> to vector<16x128xf32>
    %267 = arith.addf %264, %266 : vector<16x128xf32>
    %268 = vector.extract_strided_slice %267 {offsets = [0, 0], sizes = [16, 2], strides = [1, 1]} : vector<16x128xf32> to vector<16x2xf32>
    %c0_154 = arith.constant 0 : index
    %c0_155 = arith.constant 0 : index
    %c0_156 = arith.constant 0 : index
    %c0_157 = arith.constant 0 : index
    %269 = vector.load %arg23[%c0_154, %c0_155, %c0_156, %c0_157] : memref<1x1x16x2xf32, #tpu.memory_space<vmem>>, vector<1x1x16x2xf32>
    %270 = vector.shape_cast %269 : vector<1x1x16x2xf32> to vector<16x2xf32>
    %271 = vector.shape_cast %268 : vector<16x2xf32> to vector<1x1x16x2xf32>
    tpu.vector_store %arg23[%c0_154, %c0_155, %c0_156, %c0_157], %271 {strides = array<i32>} : memref<1x1x16x2xf32, #tpu.memory_space<vmem>>, vector<1x1x16x2xf32>,
    return
  }
  func.func @transform_0(%arg0: i32, %arg1: i32) -> (i32, i32, i32, i32) {
    %c0_i32 = arith.constant 0 : i32
    %c0_i32_0 = arith.constant 0 : i32
    %c0_i32_1 = arith.constant 0 : i32
    return %arg0, %arg1, %c0_i32, %c0_i32_0 : i32, i32, i32, i32
  }
  func.func @transform_1(%arg0: i32, %arg1: i32) -> (i32, i32) {
    %c0_i32 = arith.constant 0 : i32
    %c0_i32_0 = arith.constant 0 : i32
    %c0_i32_1 = arith.constant 0 : i32
    return %c0_i32, %c0_i32_0 : i32, i32
  }
  func.func @transform_2(%arg0: i32, %arg1: i32) -> (i32, i32) {
    %c0_i32 = arith.constant 0 : i32
    %c0_i32_0 = arith.constant 0 : i32
    %c0_i32_1 = arith.constant 0 : i32
    return %c0_i32, %c0_i32_0 : i32, i32
  }
  func.func @transform_3(%arg0: i32, %arg1: i32) -> (i32, i32, i32) {
    %c0_i32 = arith.constant 0 : i32
    %c0_i32_0 = arith.constant 0 : i32
    %c0_i32_1 = arith.constant 0 : i32
    %c0_i32_2 = arith.constant 0 : i32
    return %c0_i32, %c0_i32_0, %c0_i32_1 : i32, i32, i32
  }
  func.func @transform_4(%arg0: i32, %arg1: i32) -> (i32, i32, i32) {
    %c0_i32 = arith.constant 0 : i32
    %c0_i32_0 = arith.constant 0 : i32
    %c0_i32_1 = arith.constant 0 : i32
    %c0_i32_2 = arith.constant 0 : i32
    return %c0_i32, %c0_i32_0, %c0_i32_1 : i32, i32, i32
  }
  func.func @transform_5(%arg0: i32, %arg1: i32) -> (i32, i32, i32) {
    %c0_i32 = arith.constant 0 : i32
    %c0_i32_0 = arith.constant 0 : i32
    %c0_i32_1 = arith.constant 0 : i32
    %c0_i32_2 = arith.constant 0 : i32
    return %c0_i32, %c0_i32_0, %c0_i32_1 : i32, i32, i32
  }
  func.func @transform_6(%arg0: i32, %arg1: i32) -> (i32, i32, i32) {
    %c0_i32 = arith.constant 0 : i32
    %c0_i32_0 = arith.constant 0 : i32
    %c0_i32_1 = arith.constant 0 : i32
    %c0_i32_2 = arith.constant 0 : i32
    return %c0_i32, %c0_i32_0, %c0_i32_1 : i32, i32, i32
  }
  func.func @transform_7(%arg0: i32, %arg1: i32) -> (i32, i32, i32) {
    %c0_i32 = arith.constant 0 : i32
    %c0_i32_0 = arith.constant 0 : i32
    %c0_i32_1 = arith.constant 0 : i32
    %c0_i32_2 = arith.constant 0 : i32
    return %c0_i32, %c0_i32_0, %c0_i32_1 : i32, i32, i32
  }
  func.func @transform_8(%arg0: i32, %arg1: i32) -> (i32, i32, i32) {
    %c0_i32 = arith.constant 0 : i32
    %c0_i32_0 = arith.constant 0 : i32
    %c0_i32_1 = arith.constant 0 : i32
    %c0_i32_2 = arith.constant 0 : i32
    return %c0_i32, %c0_i32_0, %c0_i32_1 : i32, i32, i32
  }
  func.func @transform_9(%arg0: i32, %arg1: i32) -> (i32, i32, i32) {
    %c0_i32 = arith.constant 0 : i32
    %c0_i32_0 = arith.constant 0 : i32
    %c0_i32_1 = arith.constant 0 : i32
    %c0_i32_2 = arith.constant 0 : i32
    return %c0_i32, %c0_i32_0, %c0_i32_1 : i32, i32, i32
  }
  func.func @transform_10(%arg0: i32, %arg1: i32) -> (i32, i32, i32) {
    %c0_i32 = arith.constant 0 : i32
    %c0_i32_0 = arith.constant 0 : i32
    %c0_i32_1 = arith.constant 0 : i32
    %c0_i32_2 = arith.constant 0 : i32
    return %c0_i32, %c0_i32_0, %c0_i32_1 : i32, i32, i32
  }
  func.func @transform_11(%arg0: i32, %arg1: i32) -> (i32, i32) {
    %c0_i32 = arith.constant 0 : i32
    %c0_i32_0 = arith.constant 0 : i32
    %c0_i32_1 = arith.constant 0 : i32
    return %c0_i32, %c0_i32_0 : i32, i32
  }
  func.func @transform_12(%arg0: i32, %arg1: i32) -> (i32, i32) {
    %c0_i32 = arith.constant 0 : i32
    %c0_i32_0 = arith.constant 0 : i32
    %c0_i32_1 = arith.constant 0 : i32
    return %c0_i32, %c0_i32_0 : i32, i32
  }
  func.func @transform_13(%arg0: i32, %arg1: i32) -> (i32, i32) {
    %c0_i32 = arith.constant 0 : i32
    %c0_i32_0 = arith.constant 0 : i32
    %c0_i32_1 = arith.constant 0 : i32
    return %c0_i32, %c0_i32_0 : i32, i32
  }
  func.func @transform_14(%arg0: i32, %arg1: i32) -> (i32, i32) {
    %c0_i32 = arith.constant 0 : i32
    %c0_i32_0 = arith.constant 0 : i32
    %c0_i32_1 = arith.constant 0 : i32
    return %c0_i32, %c0_i32_0 : i32, i32
  }
  func.func @transform_15(%arg0: i32, %arg1: i32) -> (i32, i32) {
    %c0_i32 = arith.constant 0 : i32
    %c0_i32_0 = arith.constant 0 : i32
    %c0_i32_1 = arith.constant 0 : i32
    return %c0_i32, %c0_i32_0 : i32, i32
  }
  func.func @transform_16(%arg0: i32, %arg1: i32) -> (i32, i32) {
    %c0_i32 = arith.constant 0 : i32
    %c0_i32_0 = arith.constant 0 : i32
    %c0_i32_1 = arith.constant 0 : i32
    return %c0_i32, %c0_i32_0 : i32, i32
  }
  func.func @transform_17(%arg0: i32, %arg1: i32) -> (i32, i32) {
    %c0_i32 = arith.constant 0 : i32
    %c0_i32_0 = arith.constant 0 : i32
    %c0_i32_1 = arith.constant 0 : i32
    return %c0_i32, %c0_i32_0 : i32, i32
  }
  func.func @transform_18(%arg0: i32, %arg1: i32) -> (i32, i32) {
    %c0_i32 = arith.constant 0 : i32
    %c0_i32_0 = arith.constant 0 : i32
    %c0_i32_1 = arith.constant 0 : i32
    return %c0_i32, %c0_i32_0 : i32, i32
  }
  func.func @transform_19(%arg0: i32, %arg1: i32) -> (i32, i32) {
    %c0_i32 = arith.constant 0 : i32
    %c0_i32_0 = arith.constant 0 : i32
    %c0_i32_1 = arith.constant 0 : i32
    return %c0_i32, %c0_i32_0 : i32, i32
  }
  func.func @transform_20(%arg0: i32, %arg1: i32) -> (i32, i32) {
    %c0_i32 = arith.constant 0 : i32
    %c0_i32_0 = arith.constant 0 : i32
    %c0_i32_1 = arith.constant 0 : i32
    return %c0_i32, %c0_i32_0 : i32, i32
  }
  func.func @transform_21(%arg0: i32, %arg1: i32) -> (i32, i32, i32, i32) {
    %c0_i32 = arith.constant 0 : i32
    %c0_i32_0 = arith.constant 0 : i32
    %c0_i32_1 = arith.constant 0 : i32
    return %arg0, %arg1, %c0_i32, %c0_i32_0 : i32, i32, i32, i32
  }
}

</mosaic_0001>

<bundles_post_ra>
// kernel: prob_out_deconv_net.1
= control target key start
LH: loop header
LB: loop body
LE: loop exit
PB: predicated region body
PF: predicated region fallthrough
CT: control target
= control target key end

     0   :  { %s9655_s0 = inlined_call_operand.vmem [shape: f32[2,1,16,1], index: 0, kind: input, shape index: {}]   ;;  %s9656_s1 = inlined_call_operand.vmem [shape: f32[3,128], index: 1, kind: input, shape index: {}]   ;;  %s9657_s2 = inlined_call_operand.hbm [shape: bf16[128,128], index: 2, kind: input, shape index: {}]   ;;  %s9658_s3 = inlined_call_operand.hbm [shape: bf16[3,128,128], index: 3, kind: input, shape index: {}]   ;;  %s9659_s4 = inlined_call_operand.hbm [shape: bf16[3,128,256], index: 4, kind: input, shape index: {}]   ;;  %s9660_s5 = inlined_call_operand.hbm [shape: bf16[3,256,256], index: 5, kind: input, shape index: {}]   ;;  %s9661_s6 = inlined_call_operand.hbm [shape: bf16[3,256,256], index: 6, kind: input, shape index: {}]   ;;  %s9662_s7 = inlined_call_operand.hbm [shape: bf16[3,256,256], index: 7, kind: input, shape index: {}]   ;;  %s9663_s8 = inlined_call_operand.hbm [shape: bf16[3,256,256], index: 8, kind: input, shape index: {}]   ;;  %s9664_s9 = inlined_call_operand.hbm [shape: bf16[3,256,128], index: 9, kind: input, shape index: {}]   ;;  %s9665_s10 = inlined_call_operand.hbm [shape: bf16[3,128,128], index: 10, kind: input, shape index: {}]   ;;  %s9666_s11 = inlined_call_operand.vmem [shape: f32[1,128], index: 11, kind: input, shape index: {}]   ;;  %s9667_s12 = inlined_call_operand.vmem [shape: f32[1,128], index: 12, kind: input, shape index: {}]   ;;  %s9668_s13 = inlined_call_operand.vmem [shape: f32[1,128], index: 13, kind: input, shape index: {}]   ;;  %s9669_s14 = inlined_call_operand.vmem [shape: f32[1,256], index: 14, kind: input, shape index: {}]   ;;  %s9670_s15 = inlined_call_operand.vmem [shape: f32[1,256], index: 15, kind: input, shape index: {}]   ;;  %s9671_s16 = inlined_call_operand.vmem [shape: f32[1,256], index: 16, kind: input, shape index: {}]   ;;  %s9672_s17 = inlined_call_operand.vmem [shape: f32[1,256], index: 17, kind: input, shape index: {}]   ;;  %s9673_s18 = inlined_call_operand.vmem [shape: f32[1,256], index: 18, kind: input, shape index: {}]   ;;  %s9674_s19 = inlined_call_operand.vmem [shape: f32[1,128], index: 19, kind: input, shape index: {}]   ;;  %s9675_s20 = inlined_call_operand.vmem [shape: f32[1,128], index: 20, kind: input, shape index: {}]   ;;  %s9676_s21 = inlined_call_operand.vmem [shape: f32[2,1,16,2], index: 21, kind: output, shape index: {}]  }
   0x1   :  { %9682 = sst [smem:[#allocation22_spill]] %s9655_s0 }
   0x2   :  { %9683 = sst [smem:[#allocation23_spill]] %s9656_s1 }
   0x3   :  { %9684 = sst [smem:[#allocation24_spill]] %s9657_s2 }
   0x4   :  { %9685 = sst [smem:[#allocation25_spill]] %s9658_s3 }
   0x5   :  { %9686 = sst [smem:[#allocation26_spill]] %s9659_s4 }
   0x6   :  { %9687 = sst [smem:[#allocation27_spill]] %s9660_s5 }
   0x7   :  { %9688 = sst [smem:[#allocation28_spill]] %s9662_s7 }
   0x8   :  { %9689 = sst [smem:[#allocation29_spill]] %s9664_s9 }
   0x9   :  { %9690 = sst [smem:[#allocation30_spill]] %s9672_s17 }
   0xa   :  { %9691 = sst [smem:[#allocation31_spill]] %s9673_s18 }
   0xb   :  { %9692 = sst [smem:[#allocation32_spill]] %s9674_s19 }
   0xc   :  { %9693 = sst [smem:[#allocation33_spill]] %s9675_s20 }
   0xd   :  { %9694 = sst [smem:[#allocation34_spill]] %s9676_s21 }
   0xe   :  { %26 = vsyncpa [#allocation3], 0 }
   0xf   :  { %27 = vsyncpa [#allocation5], 0 }
  0x10   :  { %28 = vsyncpa [#allocation8], 0 }
  0x11   :  { %29 = vsyncpa [#allocation11], 0 }
  0x12   :  { %30 = vsyncpa [#allocation14], 0  ;;  %s9118_s2 = smov 0   ;;  %s9120_s25 = smov 0  }
  0x13   :  { %s9122_s26 = smov 0  }
  0x14 LB: > { %9695 = sst [smem:[#allocation21_spill]] %s8989_s26  ;;  %s5835_s27 = sadd.s32 4294967295, %s8989_s26   ;;  %s8989_s26 = sphi %s9122_s26, %s36_s26   ;;  %s8985_s25 = sphi %s9120_s25, %s9716_s25   ;;  %s8981_s2 = sphi %s9118_s2, %s9715_s2  }
  0x15   : > { %p5837_p0 = scmp.ge.s32.totalorder %s8989_s26, 1  ;;  %p529_p1 = scmp.lt.s32.totalorder %s8989_s26, 3 }
  0x16   : > { %p9136_p2 = scmp.eq.s32.totalorder %s5835_s27, 0  ;;  %s9697_s0 = sld [smem:[#allocation25_spill]] }
  0x17   : > { %p9143_p3 = pnand %p5837_p0, %p529_p1  ;;  %s8991_s5 = smov [#allocation4]  }
  0x18   : > { %s559_s22 = sshll.u32 %s8991_s5, 4  ;;  %s9700_s27 = sld [smem:[#allocation27_spill]]  ;;  %s560_s22 = int_to_ptr.vmem [resolvable:$true] %s559_s22 }
  0x19   : > { %p8584_p4 = pneg %p9143_p3  ;;  %s8992_s29 = smov [#allocation7]  }
  0x1a   : > { %s8993_s26 = smov 64   ;;  %s8994_s21 = smov 4  }
  0x1b   : > { %p9151_p5 = pnand %p9136_p2, %p8584_p4  ;;  %s9701_s7 = sld [smem:[#allocation28_spill]] }
  0x1c   : > { %s557_s4 = sshll.u32 %s9697_s0, 4  ;;  %s587_s0 = sshll.u32 %s8992_s29, 4  ;;  %s558_s4 = int_to_ptr.hbm [resolvable:$true] %s557_s4  ;;  %s588_s0 = int_to_ptr.vmem [resolvable:$true] %s587_s0 }
  0x1d   : > { %8590 = dma.hbm_to_vmem [thread:$0]  (!%p9151_p5), %s558_s4, 3072, %s560_s22, [#allocation5], %s8993_s26, %s8993_s26, %s8994_s21  }
  0x1e   : > { %s585_s28 = sshll.u32 %s9700_s27, 4  ;;  %s9678_s24 = smov 128   ;;  %s586_s28 = int_to_ptr.hbm [resolvable:$true] %s585_s28 }
  0x1f   : > { %s9680_s27 = smov 8   ;;  %s8997_s29 = smov [#allocation10]  }
  0x20   : > { %8596 = dma.hbm_to_vmem [thread:$0]  (!%p9151_p5), %s586_s28, 12288, %s588_s0, [#allocation8], %s9678_s24, %s9678_s24, %s9680_s27  }
  0x21   : > { %s613_s1 = sshll.u32 %s9701_s7, 4  ;;  %s615_s19 = sshll.u32 %s8997_s29, 4  ;;  %s614_s1 = int_to_ptr.hbm [resolvable:$true] %s613_s1  ;;  %s616_s19 = int_to_ptr.vmem [resolvable:$true] %s615_s19 }
  0x22   : > { %s9702_s9 = sld [smem:[#allocation29_spill]]  ;;  %s8998_s20 = smov [#allocation13]  }
  0x23   : > { %8602 = dma.hbm_to_vmem [thread:$0]  (!%p9151_p5), %s614_s1, 12288, %s616_s19, [#allocation11], %s9678_s24, %s9678_s24, %s9680_s27  }
  0x24   : > { %s643_s22 = sshll.u32 %s8998_s20, 4  ;;  %s48_s28 = sadd.s32 1, %s8985_s25  ;;  %s644_s22 = int_to_ptr.vmem [resolvable:$true] %s643_s22 }
  0x25   : > { %p50_p6 = scmp.ge.s32.totalorder %s48_s28, 2  ;;  %s9703_s0 = sld [smem:[#allocation24_spill]] }
  0x26   : > { %s8999_s29 = smov [#allocation2]   ;;  %s9704_s24 = sld [smem:[#allocation26_spill]] }
  0x27   : > { %s9718_s28 = smov (%p50_p6, %s48_s28), 0  ;;  %s545_s19 = sshll.u32 %s8999_s29, 4  ;;  %s546_s19 = int_to_ptr.vmem [resolvable:$true] %s545_s19 }
  0x28   : > { %s641_s4 = sshll.u32 %s9702_s9, 4  ;;  %s599_s17 = sshll.u32 %s9661_s6, 4  ;;  %s642_s4 = int_to_ptr.hbm [resolvable:$true] %s641_s4  ;;  %s600_s17 = int_to_ptr.hbm [resolvable:$true] %s599_s17 }
  0x29   : > { %8608 = dma.hbm_to_vmem [thread:$0]  (!%p9151_p5), %s642_s4, 6144, %s644_s22, [#allocation14], %s8993_s26, %s8993_s26, %s8994_s21  }
  0x2a   : > { %s9000_s18 = smov [#allocation6]   ;;  %s9705_s29 = smov 8  }
  0x2b   : > { %s543_s5 = sshll.u32 %s9703_s0, 4  ;;  %s573_s0 = sshll.u32 %s9000_s18, 4  ;;  %s544_s5 = int_to_ptr.hbm [resolvable:$true] %s543_s5  ;;  %s574_s0 = int_to_ptr.vmem [resolvable:$true] %s573_s0 }
  0x2c   : > { %s571_s27 = sshll.u32 %s9704_s24, 4  ;;  %s9706_s1 = smov 128   ;;  %s572_s27 = int_to_ptr.hbm [resolvable:$true] %s571_s27 }
  0x2d   : > { %8587 = dma.hbm_to_vmem [thread:$0]  (!%p9151_p5), %s544_s5, 1024, %s546_s19, [#allocation3], %s8993_s26, %s8993_s26, %s8994_s21  }
  0x2e   : > { %8593 = dma.hbm_to_vmem [thread:$0]  (!%p9151_p5), %s572_s27, 6144, %s574_s0, [#allocation5], %s9706_s1, %s9706_s1, %s9705_s29  }
  0x2f   : > { %s9001_s24 = smov [#allocation9]   ;;  %s627_s5 = sshll.u32 %s9663_s8, 4  ;;  %s628_s5 = int_to_ptr.hbm [resolvable:$true] %s627_s5 }
  0x30   : > { %s601_s20 = sshll.u32 %s9001_s24, 4  ;;  %s655_s22 = sshll.u32 %s9665_s10, 4  ;;  %s602_s20 = int_to_ptr.vmem [resolvable:$true] %s601_s20  ;;  %s656_s22 = int_to_ptr.hbm [resolvable:$true] %s655_s22 }
  0x31   : > { %8599 = dma.hbm_to_vmem [thread:$0]  (!%p9151_p5), %s600_s17, 12288, %s602_s20, [#allocation8], %s9706_s1, %s9706_s1, %s9705_s29  }
  0x32   : > { %s9002_s18 = smov [#allocation12]   ;;  %s9003_s7 = smov [#allocation15]  }
  0x33   : > { %s629_s27 = sshll.u32 %s9002_s18, 4  ;;  %s657_s9 = sshll.u32 %s9003_s7, 4  ;;  %s630_s27 = int_to_ptr.vmem [resolvable:$true] %s629_s27  ;;  %s658_s9 = int_to_ptr.vmem [resolvable:$true] %s657_s9 }
  0x34   : > { %8605 = dma.hbm_to_vmem [thread:$0]  (!%p9151_p5), %s628_s5, 12288, %s630_s27, [#allocation11], %s9706_s1, %s9706_s1, %s9705_s29  }
  0x35   : > { %8611 = dma.hbm_to_vmem [thread:$0]  (!%p9151_p5), %s656_s22, 3072, %s658_s9, [#allocation14], %s8993_s26, %s8993_s26, %s8994_s21  }
  0x36   : > { %715 = sbr.rel (%p9143_p3) target bundleno = 1843 (0x733), region = 104 }
  0x3b   : > { %8960 = dma.done.wait (%p9136_p2), [#allocation3], 1024  }
  0x3c   : > { %8962 = vsyncadd (%p9136_p2), [#allocation3], 4294966272 }
  0x3d   : > { %8964 = dma.done.wait (%p9136_p2), [#allocation5], 9216  }
  0x3e   : > { %8966 = vsyncadd (%p9136_p2), [#allocation5], 4294958080 }
  0x3f   : > { %8968 = dma.done.wait (%p9136_p2), [#allocation8], 24576  }
  0x40   : > { %8970 = vsyncadd (%p9136_p2), [#allocation8], 4294942720 }
  0x41   : > { %8972 = dma.done.wait (%p9136_p2), [#allocation11], 24576  }
  0x42   : > { %8974 = vsyncadd (%p9136_p2), [#allocation11], 4294942720 }
  0x43   : > { %8976 = dma.done.wait (%p9136_p2), [#allocation14], 9216  }
  0x44   : > { %8978 = vsyncadd (%p9136_p2), [#allocation14], 4294958080  ;;  %p824_p7 = scmp.lt.s32.totalorder %s8981_s2, 1  ;;  %v9004_v0 = vmov 0   ;;  %s9707_s23 = sld [smem:[#allocation22_spill]]  ;;  %v842_v3 = vlaneseq  ;;  %v9005_v11 = vmov 0.0  }
  0x45   : > { %8671 = vset.pattern.permute.xlu0 %v9004_v0  ;;  %s9708_s29 = sld [smem:[#allocation23_spill]]  ;;  %v8672_v19 = vld [vmem:[%s9666_s11] ss:$0 sm:$0xff]  ;;  %s9006_s20 = smov 37   ;;  %v8019_v51 = vld [vmem:[#allocation2 + $0x38] sm:$0xff]  ;;  %v8018_v52 = vld [vmem:[#allocation2 + $0x30] sm:$0xff] }
  0x46   : > { %s9720_s2 = smov (!%p824_p7, %s8981_s2), 1  ;;  %v9259_v4 = vshrl.u32 %v842_v3, 7  ;;  %s9007_s5 = smov 74   ;;  %1022 = vmatpush.bf16.msra.mxu0 %v8019_v51  ;;  %v8017_v53 = vld [vmem:[#allocation2 + $0x28] sm:$0xff]  ;;  %v8016_v54 = vld [vmem:[#allocation2 + $0x20] sm:$0xff]  ;;  %v8015_v55 = vld [vmem:[#allocation2 + $0x18] sm:$0xff] }
  0x47   : > { %s8010_s21 = sshll.u32 %s9720_s2, 4  ;;  %v8014_v56 = vld [vmem:[#allocation2 + $0x10] sm:$0xff]  ;;  %v8013_v57 = vld [vmem:[#allocation2 + $0x8] sm:$0xff]  ;;  %v8012_v58 = vld [vmem:[#allocation2] sm:$0xff]  ;;  %s9709_s0 = sld [smem:[#allocation30_spill]]  ;;  %vm5651_vm4 = vcmask 15360  }
  0x48   : > { %v844_v5 = vadd.s32 8, %v9259_v4  ;;  %v849_v7 = vand.u32 15, %v9259_v4  ;;  %vm895_vm2 = vcmp.lt.s32.totalorder %v9259_v4, 1  ;;  %vm902_vm3 = vcmp.lt.s32.totalorder %v9259_v4, 7  ;;  %v8035_v59 = vld [vmem:[#allocation4 + $0x78] sm:$0xff]  ;;  %v8034_v62 = vld [vmem:[#allocation4 + $0x70] sm:$0xff] }
  0x49   : > { %v8027_v60 = vld [vmem:[#allocation4 + $0x38] sm:$0xff]  ;;  %1133 = vmatpush.bf16.msra.mxu1 %v8035_v59  ;;  %v8026_v63 = vld [vmem:[#allocation4 + $0x30] sm:$0xff]  ;;  %v8041_v3 = vld [vmem:[#allocation4 + $0xa8] sm:$0xff]  ;;  %s9710_s24 = sld [smem:[#allocation31_spill]] }
  0x4a   : > { %s832_s17 = scalar_lea.vmem %s9707_s23, %s8010_s21  ;;  %v856_v8 = vand.u32 15, %v844_v5  ;;  %vm869_vm0 = vcmp.ne.s32.totalorder %v849_v7, 0  ;;  %1023 = vmatpush.bf16.msra.mxu0 %v8018_v52  ;;  %v8043_v61 = vld [vmem:[#allocation4 + $0xb8] sm:$0xff]  ;;  %1195 = vmatpush.bf16.msra.mxu2 %v8027_v60  ;;  %v8042_v0 = vld [vmem:[#allocation4 + $0xb0] sm:$0xff]  ;;  %v8032_v5 = vld [vmem:[#allocation4 + $0x60] sm:$0xff]  ;;  %s9711_s19 = sld [smem:[#allocation32_spill]] }
  0x4b   : > { %v881_v1 = vld [vmem:[%s832_s17] sm:$0xff]  ;;  %v882_v2 = vld [vmem:[%s832_s17 + $0x8] sm:$0xff]  ;;  %v9266_v12 = vsel %vm869_vm0, 1.0, %v9005_v11  ;;  %1275 = vmatpush.bf16.msra.mxu3 %v8043_v61  ;;  %s9712_s18 = sld [smem:[#allocation33_spill]] }
  0x4c   : > { %885 = vperm.xlu0 %8671, %v881_v1   ;;  %vm876_vm1 = vcmp.ne.s32.totalorder %v856_v8, 15  ;;  %v907_v9 = vld [vmem:[%s9708_s29] sm:$0x7]  ;;  %v8033_v1 = vld [vmem:[#allocation4 + $0x68] sm:$0xff]  ;;  %v8068_v52 = vld [vmem:[#allocation6 + $0xc4] sm:$0xf] }
  0x4d   : > { %v909_v10 = vperm.slane %v907_v9, 0  ;;  %v9268_v13 = vsel %vm876_vm1, 1.0, %v9005_v11  ;;  %v917_v23 = vperm.slane %v907_v9, 1  ;;  %v922_v27 = vperm.slane %v907_v9, 2  ;;  %1134 = vmatpush.bf16.msra.mxu1 %v8034_v62  ;;  %v8069_v51 = vld [vmem:[#allocation6 + $0xc4] sm:$0xf0] }
  0x4e   : > { %1024 = vmatpush.bf16.msra.mxu0 %v8017_v53  ;;  %1196 = vmatpush.bf16.msra.mxu2 %v8026_v63  ;;  %v6028_v53 = vld [vmem:[#allocation6 + $0xc8] sm:$0xf0]  ;;  %s9713_s9 = sld [smem:[#allocation34_spill]] }
  0x4f   : > { %1276 = vmatpush.bf16.msra.mxu3 %v8042_v0 }
  0x51   : > { %1135 = vmatpush.bf16.msra.mxu1 %v8033_v1 }
  0x52   : > { %1025 = vmatpush.bf16.msra.mxu0 %v8016_v54 }
  0x53   : > { %1277 = vmatpush.bf16.msra.mxu3 %v8041_v3 }
  0x54   : > { %890 = vperm.xlu0 %8671, %v882_v2   ;;  %v8025_v2 = vld [vmem:[#allocation4 + $0x28] sm:$0xff]  ;;  %s841_s26 = scalar_lea.vmem %s9713_s9, %s8010_s21 }
  0x55   : > { %1197 = vmatpush.bf16.msra.mxu2 %v8025_v2  ;;  %1136 = vmatpush.bf16.msra.mxu1 %v8032_v5 }
  0x56   : > { %1026 = vmatpush.bf16.msra.mxu0 %v8015_v55  ;;  %v8673_v55 = vld [vmem:[%s9667_s12] ss:$0 sm:$0xff] }
  0x5a   : > { %1027 = vmatpush.bf16.msra.mxu0 %v8014_v56 }
  0x5e   : > { %1028 = vmatpush.bf16.msra.mxu0 %v8013_v57  ;;  %v6031_v57 = vor.u32 %v8068_v52, %v6028_v53  ;;  %v8061_v52 = vld [vmem:[#allocation6 + $0x84] sm:$0xf0]  ;;  %v8060_v53 = vld [vmem:[#allocation6 + $0x84] sm:$0xf] }
  0x62   : > { %1029 = vmatpush.bf16.msra.mxu0 %v8012_v58 }
  0xbe   : > { %v886_v6 = vpop.permute.xlu0 %885 }
  0xbf   : > { %v893_v15 = vrot.slane %v886_v6, 7  ;;  %v900_v16 = vrot.slane %v886_v6, 1  ;;  %v918_v32 = vmul.f32 %v917_v23, %v886_v6 }
  0xc6   : > { %v891_v14 = vpop.permute.xlu0 %890 }
  0xc7   : > { %v894_v17 = vrot.slane %v891_v14, 7  ;;  %v901_v18 = vrot.slane %v891_v14, 1  ;;  %v919_v30 = vmul.f32 %v917_v23, %v891_v14  ;;  %v8039_v23 = vld [vmem:[#allocation4 + $0x98] sm:$0xff] }
  0xc9   : > { %v896_v20 = vsel %vm895_vm2, %v893_v15, %v894_v17  ;;  %v897_v21 = vsel %vm895_vm2, %v894_v17, %v893_v15  ;;  %v904_v22 = vsel %vm902_vm3, %v901_v18, %v900_v16  ;;  %v903_v31 = vsel %vm902_vm3, %v900_v16, %v901_v18  ;;  %v8031_v18 = vld [vmem:[#allocation4 + $0x58] sm:$0xff] }
  0xca   : > { %v898_v24 = vmul.f32 %v9266_v12, %v897_v21  ;;  %v906_v25 = vmul.f32 %v9268_v13, %v904_v22  ;;  %v911_v26 = vmul.f32 %v909_v10, %v896_v20  ;;  %v923_v38 = vmul.f32 %v922_v27, %v903_v31  ;;  %v8040_v20 = vld [vmem:[#allocation4 + $0xa0] sm:$0xff]  ;;  %1137 = vmatpush.bf16.msra.mxu1 %v8031_v18  ;;  %v8030_v21 = vld [vmem:[#allocation4 + $0x50] sm:$0xff]  ;;  %v8023_v22 = vld [vmem:[#allocation4 + $0x18] sm:$0xff] }
  0xcb   : > { %1278 = vmatpush.bf16.msra.mxu3 %v8040_v20  ;;  %v8036_v31 = vld [vmem:[#allocation4 + $0x80] sm:$0xff]  ;;  %v6114_v20 = vld [vmem:[#allocation6 + $0x70] sm:$0xf] }
  0xcc   : > { %v910_v28 = vmul.f32 %v909_v10, %v898_v24  ;;  %v916_v29 = vadd.f32 %v8672_v19, %v911_v26  ;;  %v924_v34 = vmul.f32 %v922_v27, %v906_v25  ;;  %v8029_v24 = vld [vmem:[#allocation4 + $0x48] sm:$0xff]  ;;  %v8022_v25 = vld [vmem:[#allocation4 + $0x10] sm:$0xff]  ;;  %v8028_v27 = vld [vmem:[#allocation4 + $0x40] sm:$0xff] }
  0xcd   : > { %v8038_v26 = vld [vmem:[#allocation4 + $0x90] sm:$0xff] }
  0xce   : > { %v921_v33 = vadd.f32 %v919_v30, %v916_v29  ;;  %v915_v35 = vadd.f32 %v8672_v19, %v910_v28  ;;  %v8024_v19 = vld [vmem:[#allocation4 + $0x20] sm:$0xff]  ;;  %1138 = vmatpush.bf16.msra.mxu1 %v8030_v21  ;;  %v8021_v28 = vld [vmem:[#allocation4 + $0x8] sm:$0xff]  ;;  %v8059_v21 = vld [vmem:[#allocation6 + $0x74] sm:$0xf0] }
  0xcf   : > { %1198 = vmatpush.bf16.msra.mxu2 %v8024_v19  ;;  %1279 = vmatpush.bf16.msra.mxu3 %v8039_v23  ;;  %v8037_v29 = vld [vmem:[#allocation4 + $0x88] sm:$0xff]  ;;  %v8020_v30 = vld [vmem:[#allocation4] sm:$0xff]  ;;  %v6020_v19 = vld [vmem:[#allocation6 + $0xb8] sm:$0xf0]  ;;  %v6115_v23 = vor.u32 %v8059_v21, %v6114_v20 }
  0xd0   : > { %v926_v36 = vadd.f32 %v924_v34, %v921_v33  ;;  %v920_v37 = vadd.f32 %v918_v32, %v915_v35  ;;  %v6050_v32 = vld [vmem:[#allocation6 + $0xf0] sm:$0xf]  ;;  %v8075_v33 = vld [vmem:[#allocation6 + $0xf4] sm:$0xf0]  ;;  %v8074_v34 = vld [vmem:[#allocation6 + $0xf4] sm:$0xf] }
  0xd1   : > { %v6051_v35 = vor.u32 %v8075_v33, %v6050_v32  ;;  %v6106_v33 = vld [vmem:[#allocation6 + $0x60] sm:$0xf]  ;;  %v6162_v20 = vld [vmem:[#allocation6 + $0x150] sm:$0xf]  ;;  %v8087_v21 = vld [vmem:[#allocation6 + $0x154] sm:$0xf0] }
  0xd2   : > { %v928_v39 = vmax.f32 %v926_v36, 0.0  ;;  %v925_v40 = vadd.f32 %v923_v38, %v920_v37  ;;  %1139 = vmatpush.bf16.msra.mxu1 %v8029_v24  ;;  %v6052_v36 = vld [vmem:[#allocation6 + $0xf8] sm:$0xf0]  ;;  %v6042_v37 = vld [vmem:[#allocation6 + $0xe0] sm:$0xf] }
  0xd3   : > { %1199 = vmatpush.bf16.msra.mxu2 %v8023_v22  ;;  %1280 = vmatpush.bf16.msra.mxu3 %v8038_v26  ;;  %v8073_v38 = vld [vmem:[#allocation6 + $0xe4] sm:$0xf0]  ;;  %v8058_v24 = vld [vmem:[#allocation6 + $0x74] sm:$0xf]  ;;  %v6010_v26 = vld [vmem:[#allocation6 + $0xa0] sm:$0xf] }
  0xd4   : > { %v927_v41 = vmax.f32 %v925_v40, 0.0  ;;  %v936_v43 = vrot.slane %v928_v39, 1  ;;  %v930_v45 = vrot.slane %v928_v39, 7  ;;  %v8072_v40 = vld [vmem:[#allocation6 + $0xe4] sm:$0xf]  ;;  %1426 = vmatpush.bf16.msrb.mxu0 %v6051_v35 }
  0xd5   : > { %v8056_v35 = vld [vmem:[#allocation6 + $0x64] sm:$0xf] }
  0xd6   : > { %941 = vrot.lane.b32.xlu1 %v927_v41, %s9006_s20  ;;  %v935_v42 = vrot.slane %v927_v41, 1  ;;  %v929_v44 = vrot.slane %v927_v41, 7  ;;  %1140 = vmatpush.bf16.msra.mxu1 %v8028_v27  ;;  %v6044_v41 = vld [vmem:[#allocation6 + $0xe8] sm:$0xf0] }
  0xd7   : > { %1200 = vmatpush.bf16.msra.mxu2 %v8022_v25  ;;  %1281 = vmatpush.bf16.msra.mxu3 %v8037_v29  ;;  %v6116_v25 = vld [vmem:[#allocation6 + $0x78] sm:$0xf0]  ;;  %v8064_v29 = vld [vmem:[#allocation6 + $0xa4] sm:$0xf] }
  0xd8   : > { %v937_v46 = vsel %vm902_vm3, %v935_v42, %v936_v43  ;;  %v932_v47 = vsel %vm895_vm2, %v930_v45, %v929_v44  ;;  %v931_v48 = vsel %vm895_vm2, %v929_v44, %v930_v45  ;;  %v938_v49 = vsel %vm902_vm3, %v936_v43, %v935_v42  ;;  %v6034_v44 = vld [vmem:[#allocation6 + $0xd0] sm:$0xf]  ;;  %v8071_v45 = vld [vmem:[#allocation6 + $0xd4] sm:$0xf0] }
  0xd9   : > { %947 = vrot.lane.b32.xlu2 %v937_v46, %s9007_s5  ;;  %v940_v50 = vmul.f32 %v9268_v13, %v938_v49  ;;  %v933_v8 = vmul.f32 %v9266_v12, %v932_v47  ;;  %v6043_v42 = vor.u32 %v8073_v38, %v6042_v37  ;;  %v6047_v43 = vor.u32 %v8072_v40, %v6044_v41  ;;  %v8070_v46 = vld [vmem:[#allocation6 + $0xd4] sm:$0xf]  ;;  %v6036_v47 = vld [vmem:[#allocation6 + $0xd8] sm:$0xf0]  ;;  %v6108_v37 = vld [vmem:[#allocation6 + $0x68] sm:$0xf0] }
  0xda   : > { %v6039_v49 = vor.u32 %v8070_v46, %v6036_v47  ;;  %v6119_v27 = vor.u32 %v8058_v24, %v6116_v25  ;;  %v6111_v38 = vor.u32 %v8056_v35, %v6108_v37  ;;  %v8063_v40 = vld [vmem:[#allocation6 + $0x94] sm:$0xf0]  ;;  %v8062_v41 = vld [vmem:[#allocation6 + $0x94] sm:$0xf]  ;;  %v6164_v24 = vld [vmem:[#allocation6 + $0x158] sm:$0xf0] }
  0xdb   : > { %1201 = vmatpush.bf16.msra.mxu2 %v8021_v28  ;;  %1282 = vmatpush.bf16.msra.mxu3 %v8036_v31  ;;  %v8065_v28 = vld [vmem:[#allocation6 + $0xa4] sm:$0xf0]  ;;  %v8055_v46 = vld [vmem:[#allocation6 + $0x54] sm:$0xf0]  ;;  %v8054_v47 = vld [vmem:[#allocation6 + $0x54] sm:$0xf] }
  0xdc   : > { %1427 = vmatpush.bf16.msrb.mxu0 %v6043_v42  ;;  %v6011_v31 = vor.u32 %v8065_v28, %v6010_v26  ;;  %v6074_v25 = vld [vmem:[#allocation6 + $0x20] sm:$0xf]  ;;  %v8049_v26 = vld [vmem:[#allocation6 + $0x24] sm:$0xf0]  ;;  %v6066_v37 = vld [vmem:[#allocation6 + $0x10] sm:$0xf] }
  0xdd   : > { %v6075_v28 = vor.u32 %v8049_v26, %v6074_v25  ;;  %v6234_v25 = vld [vmem:[#allocation7 + $0x160] sm:$0xf]  ;;  %v8137_v26 = vld [vmem:[#allocation7 + $0x164] sm:$0xf0] }
  0xde   : > { %943 = vrot.lane.b32.xlu1 %v928_v39, %s9006_s20  ;;  %v6055_v39 = vor.u32 %v8074_v34, %v6052_v36  ;;  %v8057_v34 = vld [vmem:[#allocation6 + $0x64] sm:$0xf0] }
  0xdf   : > { %1202 = vmatpush.bf16.msra.mxu2 %v8020_v30  ;;  %v6012_v30 = vld [vmem:[#allocation6 + $0xa8] sm:$0xf0]  ;;  %1548 = vmatpush.bf16.msrb.mxu3 %v6119_v27  ;;  %v6107_v36 = vor.u32 %v8057_v34, %v6106_v33  ;;  %v8085_v33 = vld [vmem:[#allocation6 + $0x144] sm:$0xf0]  ;;  %v8084_v34 = vld [vmem:[#allocation6 + $0x144] sm:$0xf] }
  0xe0   : > { %1440 = vmatpush.bf16.msrb.mxu1 %v6055_v39  ;;  %v6015_v32 = vor.u32 %v8064_v29, %v6012_v30  ;;  %v6002_v39 = vld [vmem:[#allocation6 + $0x90] sm:$0xf]  ;;  %v8048_v29 = vld [vmem:[#allocation6 + $0x24] sm:$0xf]  ;;  %v6076_v30 = vld [vmem:[#allocation6 + $0x28] sm:$0xf0] }
  0xe1   : > { %949 = vrot.lane.b32.xlu2 %v940_v50, %s9007_s5  ;;  %v6026_v50 = vld [vmem:[#allocation6 + $0xc0] sm:$0xf]  ;;  %v6003_v42 = vor.u32 %v8063_v40, %v6002_v39 }
  0xe2   : > { %v6027_v54 = vor.u32 %v8069_v51, %v6026_v50  ;;  %v5994_v51 = vld [vmem:[#allocation6 + $0x80] sm:$0xf] }
  0xe3   : > { %1534 = vmatpush.bf16.msrb.mxu2 %v6115_v23  ;;  %1549 = vmatpush.bf16.msrb.mxu3 %v6111_v38  ;;  %v6163_v23 = vor.u32 %v8087_v21, %v6162_v20  ;;  %v8047_v38 = vld [vmem:[#allocation6 + $0x14] sm:$0xf0] }
  0xe4   : > { %1441 = vmatpush.bf16.msrb.mxu1 %v6047_v43  ;;  %v6004_v43 = vld [vmem:[#allocation6 + $0x98] sm:$0xf0]  ;;  %v6067_v40 = vor.u32 %v8047_v38, %v6066_v37  ;;  %v8155_v21 = vld [vmem:[#allocation7 + $0x1f4] sm:$0xf0]  ;;  %v6290_v37 = vld [vmem:[#allocation7 + $0x1d0] sm:$0xf] }
  0xe7   : > { %1535 = vmatpush.bf16.msrb.mxu2 %v6107_v36  ;;  %v6156_v36 = vld [vmem:[#allocation6 + $0x148] sm:$0xf0] }
  0xe8   : > { %1442 = vmatpush.bf16.msrb.mxu1 %v6039_v49  ;;  %v6100_v49 = vld [vmem:[#allocation6 + $0x58] sm:$0xf0]  ;;  %v6159_v39 = vor.u32 %v8084_v34, %v6156_v36  ;;  %v8135_v36 = vld [vmem:[#allocation7 + $0x154] sm:$0xf0] }
  0xe9   : > { %v6103_v50 = vor.u32 %v8054_v47, %v6100_v49  ;;  %v6058_v49 = vld [vmem:[#allocation6] sm:$0xf] }
  0xeb   : > { %1550 = vmatpush.bf16.msrb.mxu3 %v6103_v50  ;;  %v8045_v50 = vld [vmem:[#allocation6 + $0x4] sm:$0xf0] }
  0xec   : > { %1443 = vmatpush.bf16.msrb.mxu1 %v6031_v57  ;;  %v8091_v57 = vld [vmem:[#allocation6 + $0x174] sm:$0xf0] }
 0x133   : > { %v948_v6 = vpop.permute.xlu2 %947 }
 0x13b   : > { %v950_v14 = vpop.permute.xlu2 %949 }
 0x148   : > { %v942_v7 = vpop.permute.xlu1 %941 }
 0x149   : > { %v945_v9 = vadd.f32 %v942_v7, %v933_v8 }
 0x14b   : > { %v951_v15 = vadd.f32 %v948_v6, %v945_v9 }
 0x150   : > { %v944_v10 = vpop.permute.xlu1 %943 }
 0x151   : > { %v946_v11 = vadd.f32 %v944_v10, %v931_v48  ;;  %v6035_v48 = vor.u32 %v8071_v45, %v6034_v44  ;;  %v6007_v44 = vor.u32 %v8062_v41, %v6004_v43  ;;  %v6098_v45 = vld [vmem:[#allocation6 + $0x50] sm:$0xf]  ;;  %v8046_v41 = vld [vmem:[#allocation6 + $0x14] sm:$0xf] }
 0x153   : > { %v952_v16 = vadd.f32 %v950_v14, %v946_v11  ;;  %1428 = vmatpush.bf16.msrb.mxu0 %v6035_v48  ;;  %v6099_v48 = vor.u32 %v8055_v46, %v6098_v45  ;;  %v8083_v45 = vld [vmem:[#allocation6 + $0x134] sm:$0xf0]  ;;  %v8082_v46 = vld [vmem:[#allocation6 + $0x134] sm:$0xf] }
 0x155   : > { %v953_v17 = vpack.c.bf16 %v952_v16, %v951_v15  ;;  %v6018_v15 = vld [vmem:[#allocation6 + $0xb0] sm:$0xf]  ;;  %v8067_v16 = vld [vmem:[#allocation6 + $0xb4] sm:$0xf0]  ;;  %1536 = vmatpush.bf16.msrb.mxu2 %v6099_v48  ;;  %v6148_v48 = vld [vmem:[#allocation6 + $0x138] sm:$0xf0] }
 0x156   : > { %v6019_v18 = vor.u32 %v8067_v16, %v6018_v15 }
 0x157   : > { %1030 = vmatmul.bf16.vlgmr.msra.gmra.mxu0 %v953_v17  ;;  %v8066_v17 = vld [vmem:[#allocation6 + $0xb4] sm:$0xf] }
 0x158   : > { %1429 = vmatpush.bf16.msrb.mxu0 %v6027_v54  ;;  %v6023_v22 = vor.u32 %v8066_v17, %v6020_v19  ;;  %v5995_v54 = vor.u32 %v8061_v52, %v5994_v51  ;;  %v8050_v17 = vld [vmem:[#allocation6 + $0x34] sm:$0xf]  ;;  %v6151_v51 = vor.u32 %v8082_v46, %v6148_v48  ;;  %v6059_v52 = vor.u32 %v8045_v50, %v6058_v49  ;;  %v8133_v46 = vld [vmem:[#allocation7 + $0x144] sm:$0xf0]  ;;  %v6308_v50 = vld [vmem:[#allocation7 + $0x1f8] sm:$0xf0] }
 0x159   : > { %v8154_v49 = vld [vmem:[#allocation7 + $0x1f4] sm:$0xf] }
 0x15a   : > { %1444 = vmatpush.bf16.msrb.mxu1 %v6023_v22  ;;  %v8086_v22 = vld [vmem:[#allocation6 + $0x154] sm:$0xf] }
 0x15b   : > { %v6167_v27 = vor.u32 %v8086_v22, %v6164_v24 }
 0x15c   : > { %1430 = vmatpush.bf16.msrb.mxu0 %v6019_v18  ;;  %v6084_v18 = vld [vmem:[#allocation6 + $0x38] sm:$0xf0] }
 0x15d   : > { %v6087_v19 = vor.u32 %v8050_v17, %v6084_v18  ;;  %v6242_v17 = vld [vmem:[#allocation7 + $0x170] sm:$0xf]  ;;  %v8139_v18 = vld [vmem:[#allocation7 + $0x174] sm:$0xf0] }
 0x15e   : > { %1445 = vmatpush.bf16.msrb.mxu1 %v6015_v32  ;;  %v6154_v32 = vld [vmem:[#allocation6 + $0x140] sm:$0xf]  ;;  %v6243_v20 = vor.u32 %v8139_v18, %v6242_v17  ;;  %v6228_v17 = vld [vmem:[#allocation7 + $0x158] sm:$0xf0] }
 0x15f   : > { %v6155_v35 = vor.u32 %v8085_v33, %v6154_v32  ;;  %v6226_v33 = vld [vmem:[#allocation7 + $0x150] sm:$0xf] }
 0x160   : > { %1431 = vmatpush.bf16.msrb.mxu0 %v6011_v31  ;;  %v6079_v31 = vor.u32 %v8048_v29, %v6076_v30  ;;  %v6235_v29 = vor.u32 %v8137_v26, %v6234_v25  ;;  %v8145_v25 = vld [vmem:[#allocation7 + $0x1a4] sm:$0xf0] }
 0x162   : > { %1446 = vmatpush.bf16.msrb.mxu1 %v6007_v44  ;;  %v6146_v44 = vld [vmem:[#allocation6 + $0x130] sm:$0xf] }
 0x163   : > { %v6147_v47 = vor.u32 %v8083_v45, %v6146_v44  ;;  %v8138_v44 = vld [vmem:[#allocation7 + $0x174] sm:$0xf]  ;;  %v6244_v45 = vld [vmem:[#allocation7 + $0x178] sm:$0xf0] }
 0x164   : > { %1432 = vmatpush.bf16.msrb.mxu0 %v6003_v42  ;;  %v6068_v42 = vld [vmem:[#allocation6 + $0x18] sm:$0xf0] }
 0x165   : > { %v6071_v43 = vor.u32 %v8046_v41, %v6068_v42 }
 0x168   : > { %1433 = vmatpush.bf16.msrb.mxu0 %v5995_v54  ;;  %v6060_v54 = vld [vmem:[#allocation6 + $0x8] sm:$0xf0] }
 0x1d4   : > { %v1031_v56 = vpop.f32.mrf.mxu0 }
 0x1d5   : > { %v1032_v58 = vadd.f32 %v8673_v55, %v1031_v56  ;;  %v6178_v56 = vld [vmem:[#allocation6 + $0x170] sm:$0xf] }
 0x1d7   : > { %v1036_v59 = vmax.f32 %v1032_v58, 0.0 }
 0x1d9   : > { %v1038_v63 = vrot.slane %v1036_v59, 7  ;;  %v1044_v0 = vrot.slane %v1036_v59, 1 }
 0x1dc   : > { %v1033_v60 = vpop.f32.mrf.mxu0 }
 0x1dd   : > { %v1034_v61 = vadd.f32 %v8673_v55, %v1033_v60  ;;  %v5996_v55 = vld [vmem:[#allocation6 + $0x88] sm:$0xf0]  ;;  %v8090_v60 = vld [vmem:[#allocation6 + $0x174] sm:$0xf] }
 0x1de   : > { %v5999_v58 = vor.u32 %v8060_v53, %v5996_v55  ;;  %v8044_v53 = vld [vmem:[#allocation6 + $0x4] sm:$0xf] }
 0x1df   : > { %v1037_v62 = vmax.f32 %v1034_v61, 0.0  ;;  %v6180_v61 = vld [vmem:[#allocation6 + $0x178] sm:$0xf0]  ;;  %v6063_v55 = vor.u32 %v8044_v53, %v6060_v54  ;;  %v8149_v53 = vld [vmem:[#allocation7 + $0x1c4] sm:$0xf0] }
 0x1e0   : > { %1447 = vmatpush.bf16.msrb.mxu1 %v5999_v58  ;;  %v8080_v58 = vld [vmem:[#allocation6 + $0x124] sm:$0xf] }
 0x1e1   : > { %v1039_v1 = vrot.slane %v1037_v62, 7  ;;  %v1045_v2 = vrot.slane %v1037_v62, 1  ;;  %v1067_v3 = vpack.c.bf16 %v1037_v62, %v1036_v59  ;;  %v6179_v59 = vor.u32 %v8091_v57, %v6178_v56  ;;  %v6090_v62 = vld [vmem:[#allocation6 + $0x40] sm:$0xf]  ;;  %v8081_v57 = vld [vmem:[#allocation6 + $0x124] sm:$0xf0] }
 0x1e2   : > { %v6138_v56 = vld [vmem:[#allocation6 + $0x120] sm:$0xf] }
 0x1e3   : > { %1141 = vmatmul.bf16.vlgmr.msra.gmra.mxu1 %v1067_v3  ;;  %v1041_v5 = vsel %vm895_vm2, %v1039_v1, %v1038_v63  ;;  %v1047_v6 = vsel %vm902_vm3, %v1045_v2, %v1044_v0  ;;  %v1040_v9 = vsel %vm895_vm2, %v1038_v63, %v1039_v1  ;;  %v1046_v10 = vsel %vm902_vm3, %v1044_v0, %v1045_v2  ;;  %v8053_v0 = vld [vmem:[#allocation6 + $0x44] sm:$0xf0]  ;;  %v8052_v1 = vld [vmem:[#allocation6 + $0x44] sm:$0xf]  ;;  %v6092_v3 = vld [vmem:[#allocation6 + $0x48] sm:$0xf0] }
 0x1e4   : > { %v1042_v7 = vmul.f32 %v9266_v12, %v1041_v5  ;;  %v1049_v8 = vmul.f32 %v9268_v13, %v1047_v6  ;;  %v6183_v63 = vor.u32 %v8090_v60, %v6180_v61  ;;  %1660 = vmatpush.bf16.msra.mxu0 %v6179_v59  ;;  %v6091_v2 = vor.u32 %v8053_v0, %v6090_v62  ;;  %v6170_v6 = vld [vmem:[#allocation6 + $0x160] sm:$0xf]  ;;  %v6140_v60 = vld [vmem:[#allocation6 + $0x128] sm:$0xf0]  ;;  %v6130_v62 = vld [vmem:[#allocation6 + $0x110] sm:$0xf] }
 0x1e5   : > { %v6095_v5 = vor.u32 %v8052_v1, %v6092_v3  ;;  %v6139_v59 = vor.u32 %v8081_v57, %v6138_v56  ;;  %v6143_v61 = vor.u32 %v8080_v58, %v6140_v60  ;;  %v8078_v0 = vld [vmem:[#allocation6 + $0x114] sm:$0xf]  ;;  %v6122_v3 = vld [vmem:[#allocation6 + $0x100] sm:$0xf]  ;;  %v8131_v56 = vld [vmem:[#allocation7 + $0x134] sm:$0xf0]  ;;  %v6247_v57 = vor.u32 %v8138_v44, %v6244_v45 }
 0x1e6   : > { %v1050_v11 = vpack.c.bf16 %v1040_v9, %v1042_v7  ;;  %v1209_v14 = vpack.c.bf16 %v1049_v8, %v1046_v10  ;;  %1674 = vmatpush.bf16.msra.mxu1 %v6183_v63  ;;  %v8089_v7 = vld [vmem:[#allocation6 + $0x164] sm:$0xf0]  ;;  %v8088_v8 = vld [vmem:[#allocation6 + $0x164] sm:$0xf]  ;;  %1537 = vmatpush.bf16.msrb.mxu2 %v6091_v2  ;;  %v6172_v10 = vld [vmem:[#allocation6 + $0x168] sm:$0xf0]  ;;  %v6311_v58 = vor.u32 %v8154_v49, %v6308_v50 }
 0x1e7   : > { %v6171_v9 = vor.u32 %v8089_v7, %v6170_v6  ;;  %1551 = vmatpush.bf16.msrb.mxu3 %v6095_v5  ;;  %v6175_v15 = vor.u32 %v8088_v8, %v6172_v10  ;;  %v8079_v63 = vld [vmem:[#allocation6 + $0x114] sm:$0xf0]  ;;  %v6132_v2 = vld [vmem:[#allocation6 + $0x118] sm:$0xf0]  ;;  %v8077_v5 = vld [vmem:[#allocation6 + $0x104] sm:$0xf0] }
 0x1e8   : > { %1203 = vmatmul.bf16.vlgmr.msra.gmra.mxu2 %v1050_v11  ;;  %1283 = vmatmul.bf16.vlgmr.msra.gmra.mxu3 %v1209_v14  ;;  %v6082_v11 = vld [vmem:[#allocation6 + $0x30] sm:$0xf]  ;;  %v8051_v14 = vld [vmem:[#allocation6 + $0x34] sm:$0xf0]  ;;  %v6131_v1 = vor.u32 %v8079_v63, %v6130_v62  ;;  %v6135_v6 = vor.u32 %v8078_v0, %v6132_v2  ;;  %v8076_v7 = vld [vmem:[#allocation6 + $0x104] sm:$0xf] }
 0x1e9   : > { %v6083_v16 = vor.u32 %v8051_v14, %v6082_v11  ;;  %1661 = vmatpush.bf16.msra.mxu0 %v6171_v9  ;;  %v6124_v8 = vld [vmem:[#allocation6 + $0x108] sm:$0xf0]  ;;  %v6123_v9 = vor.u32 %v8077_v5, %v6122_v3  ;;  %v8136_v62 = vld [vmem:[#allocation7 + $0x164] sm:$0xf]  ;;  %v6274_v5 = vld [vmem:[#allocation7 + $0x1b0] sm:$0xf] }
 0x1ea   : > { %1675 = vmatpush.bf16.msra.mxu1 %v6175_v15  ;;  %v6127_v10 = vor.u32 %v8076_v7, %v6124_v8  ;;  %v6236_v63 = vld [vmem:[#allocation7 + $0x168] sm:$0xf0]  ;;  %v8147_v7 = vld [vmem:[#allocation7 + $0x1b4] sm:$0xf0]  ;;  %v6202_v8 = vld [vmem:[#allocation7 + $0x120] sm:$0xf] }
 0x1eb   : > { %1538 = vmatpush.bf16.msrb.mxu2 %v6083_v16  ;;  %1552 = vmatpush.bf16.msrb.mxu3 %v6087_v19  ;;  %v6306_v19 = vld [vmem:[#allocation7 + $0x1f0] sm:$0xf]  ;;  %v6300_v2 = vld [vmem:[#allocation7 + $0x1e8] sm:$0xf0] }
 0x1ec   : > { %v6307_v24 = vor.u32 %v8155_v21, %v6306_v19  ;;  %v6292_v21 = vld [vmem:[#allocation7 + $0x1d8] sm:$0xf0]  ;;  %v6268_v49 = vld [vmem:[#allocation7 + $0x1a8] sm:$0xf0] }
 0x1ed   : > { %1662 = vmatpush.bf16.msra.mxu0 %v6163_v23  ;;  %v8674_v23 = vld [vmem:[%s9668_s13] ss:$0 sm:$0xff] }
 0x1ee   : > { %1676 = vmatpush.bf16.msra.mxu1 %v6167_v27  ;;  %v6298_v27 = vld [vmem:[#allocation7 + $0x1e0] sm:$0xf] }
 0x1ef   : > { %1539 = vmatpush.bf16.msrb.mxu2 %v6075_v28  ;;  %1553 = vmatpush.bf16.msrb.mxu3 %v6079_v31  ;;  %v8153_v28 = vld [vmem:[#allocation7 + $0x1e4] sm:$0xf0] }
 0x1f0   : > { %v6299_v30 = vor.u32 %v8153_v28, %v6298_v27 }
 0x1f1   : > { %1663 = vmatpush.bf16.msra.mxu0 %v6155_v35 }
 0x1f2   : > { %1677 = vmatpush.bf16.msra.mxu1 %v6159_v39  ;;  %v6227_v39 = vor.u32 %v8135_v36, %v6226_v33  ;;  %v6284_v33 = vld [vmem:[#allocation7 + $0x1c8] sm:$0xf0] }
 0x1f3   : > { %1540 = vmatpush.bf16.msrb.mxu2 %v6067_v40  ;;  %1554 = vmatpush.bf16.msrb.mxu3 %v6071_v43  ;;  %v8151_v40 = vld [vmem:[#allocation7 + $0x1d4] sm:$0xf0]  ;;  %v6218_v43 = vld [vmem:[#allocation7 + $0x140] sm:$0xf] }
 0x1f4   : > { %v6291_v42 = vor.u32 %v8151_v40, %v6290_v37  ;;  %v8146_v40 = vld [vmem:[#allocation7 + $0x1b4] sm:$0xf] }
 0x1f5   : > { %1664 = vmatpush.bf16.msra.mxu0 %v6147_v47 }
 0x1f6   : > { %1678 = vmatpush.bf16.msra.mxu1 %v6151_v51  ;;  %v6219_v51 = vor.u32 %v8133_v46, %v6218_v43  ;;  %v8128_v46 = vld [vmem:[#allocation7 + $0x124] sm:$0xf] }
 0x1f7   : > { %1541 = vmatpush.bf16.msrb.mxu2 %v6059_v52  ;;  %1555 = vmatpush.bf16.msrb.mxu3 %v6063_v55  ;;  %v6282_v52 = vld [vmem:[#allocation7 + $0x1c0] sm:$0xf]  ;;  %v6210_v55 = vld [vmem:[#allocation7 + $0x130] sm:$0xf] }
 0x1f8   : > { %v6283_v0 = vor.u32 %v8149_v53, %v6282_v52  ;;  %v6211_v3 = vor.u32 %v8131_v56, %v6210_v55  ;;  %v6194_v52 = vld [vmem:[#allocation7 + $0x110] sm:$0xf]  ;;  %v8127_v53 = vld [vmem:[#allocation7 + $0x114] sm:$0xf0] }
 0x1f9   : > { %1665 = vmatpush.bf16.msra.mxu0 %v6139_v59  ;;  %v6195_v55 = vor.u32 %v8127_v53, %v6194_v52  ;;  %v8143_v56 = vld [vmem:[#allocation7 + $0x194] sm:$0xf0]  ;;  %v8101_v52 = vld [vmem:[#allocation7 + $0x44] sm:$0xf0]  ;;  %v6410_v53 = vld [vmem:[#allocation7 + $0xc0] sm:$0xf] }
 0x1fa   : > { %1679 = vmatpush.bf16.msra.mxu1 %v6143_v61 }
 0x1fb   : > { %1959 = vmatpush.bf16.msra.mxu2 %v6243_v20  ;;  %1973 = vmatpush.bf16.msra.mxu3 %v6307_v24  ;;  %v8150_v20 = vld [vmem:[#allocation7 + $0x1d4] sm:$0xf]  ;;  %v6266_v24 = vld [vmem:[#allocation7 + $0x1a0] sm:$0xf] }
 0x1fc   : > { %v6295_v28 = vor.u32 %v8150_v20, %v6292_v21  ;;  %v8106_v20 = vld [vmem:[#allocation7 + $0x74] sm:$0xf] }
 0x1fd   : > { %1666 = vmatpush.bf16.msra.mxu0 %v6131_v1  ;;  %v8152_v1 = vld [vmem:[#allocation7 + $0x1e4] sm:$0xf] }
 0x1fe   : > { %1680 = vmatpush.bf16.msra.mxu1 %v6135_v6 }
 0x1ff   : > { %1960 = vmatpush.bf16.msra.mxu2 %v6235_v29  ;;  %1974 = vmatpush.bf16.msra.mxu3 %v6299_v30  ;;  %v8132_v29 = vld [vmem:[#allocation7 + $0x144] sm:$0xf] }
 0x201   : > { %1667 = vmatpush.bf16.msra.mxu0 %v6123_v9  ;;  %v8129_v9 = vld [vmem:[#allocation7 + $0x124] sm:$0xf0] }
 0x202   : > { %1681 = vmatpush.bf16.msra.mxu1 %v6127_v10 }
 0x203   : > { %1961 = vmatpush.bf16.msra.mxu2 %v6227_v39  ;;  %1975 = vmatpush.bf16.msra.mxu3 %v6291_v42  ;;  %v6212_v39 = vld [vmem:[#allocation7 + $0x138] sm:$0xf0] }
 0x207   : > { %1962 = vmatpush.bf16.msra.mxu2 %v6219_v51  ;;  %1976 = vmatpush.bf16.msra.mxu3 %v6283_v0 }
 0x20b   : > { %1963 = vmatpush.bf16.msra.mxu2 %v6211_v3  ;;  %v8141_v3 = vld [vmem:[#allocation7 + $0x184] sm:$0xf0] }
 0x260   : > { %v1142_v11 = vpop.f32.mrf.mxu1 }
 0x268   : > { %v1144_v31 = vpop.f32.mrf.mxu1 }
 0x26b   : > { %v1204_v14 = vpop.f32.mrf.mxu2  ;;  %v1284_v15 = vpop.f32.mrf.mxu3 }
 0x26c   : > { %v1205_v16 = vadd.f32 %v1204_v14, %v1142_v11  ;;  %v6239_v14 = vor.u32 %v8136_v62, %v6236_v63  ;;  %v6260_v62 = vld [vmem:[#allocation7 + $0x198] sm:$0xf0]  ;;  %v6186_v63 = vld [vmem:[#allocation7 + $0x100] sm:$0xf] }
 0x26e   : > { %v1289_v22 = vadd.f32 %v1284_v15, %v1205_v16  ;;  %v6303_v15 = vor.u32 %v8152_v1, %v6300_v2  ;;  %v8134_v16 = vld [vmem:[#allocation7 + $0x154] sm:$0xf]  ;;  %v8125_v1 = vld [vmem:[#allocation7 + $0x104] sm:$0xf0]  ;;  %v6250_v2 = vld [vmem:[#allocation7 + $0x180] sm:$0xf] }
 0x26f   : > { %v6231_v27 = vor.u32 %v8134_v16, %v6228_v17 }
 0x270   : > { %v1295_v34 = vadd.f32 %v8674_v23, %v1289_v22  ;;  %v6275_v22 = vor.u32 %v8147_v7, %v6274_v5  ;;  %v6187_v5 = vor.u32 %v8125_v1, %v6186_v63  ;;  %v8124_v7 = vld [vmem:[#allocation7 + $0x104] sm:$0xf]  ;;  %v6338_v63 = vld [vmem:[#allocation7 + $0x30] sm:$0xf] }
 0x271   : > { %v6402_v1 = vld [vmem:[#allocation7 + $0xb0] sm:$0xf] }
 0x272   : > { %v9311_v47 = vmax.f32 %v1295_v34, 0.0  ;;  %1977 = vmatpush.bf16.msra.mxu3 %v6275_v22  ;;  %v6267_v34 = vor.u32 %v8145_v25, %v6266_v24  ;;  %v6372_v22 = vld [vmem:[#allocation7 + $0x78] sm:$0xf0] }
 0x273   : > { %v1206_v32 = vpop.f32.mrf.mxu2  ;;  %v1286_v38 = vpop.f32.mrf.mxu3  ;;  %v6436_v24 = vld [vmem:[#allocation7 + $0xf8] sm:$0xf0]  ;;  %v6375_v25 = vor.u32 %v8106_v20, %v6372_v22  ;;  %v6332_v20 = vld [vmem:[#allocation7 + $0x28] sm:$0xf0] }
 0x274   : > { %v1207_v35 = vadd.f32 %v1206_v32, %v1144_v31  ;;  %v1299_v59 = vrot.slane %v9311_v47, 7  ;;  %v1305_v26 = vrot.slane %v9311_v47, 1  ;;  %v6220_v31 = vld [vmem:[#allocation7 + $0x148] sm:$0xf0]  ;;  %v8148_v32 = vld [vmem:[#allocation7 + $0x1c4] sm:$0xf] }
 0x275   : > { %v6223_v36 = vor.u32 %v8132_v29, %v6220_v31  ;;  %v6287_v37 = vor.u32 %v8148_v32, %v6284_v33  ;;  %v6426_v29 = vld [vmem:[#allocation7 + $0xe0] sm:$0xf]  ;;  %v8121_v31 = vld [vmem:[#allocation7 + $0xe4] sm:$0xf0]  ;;  %v8104_v32 = vld [vmem:[#allocation7 + $0x64] sm:$0xf] }
 0x276   : > { %v1290_v41 = vadd.f32 %v1286_v38, %v1207_v35  ;;  %v8130_v38 = vld [vmem:[#allocation7 + $0x134] sm:$0xf]  ;;  %1978 = vmatpush.bf16.msra.mxu3 %v6267_v34  ;;  %v6364_v33 = vld [vmem:[#allocation7 + $0x68] sm:$0xf0]  ;;  %v6427_v34 = vor.u32 %v8121_v31, %v6426_v29 }
 0x277   : > { %v6215_v44 = vor.u32 %v8130_v38, %v6212_v39  ;;  %v6354_v39 = vld [vmem:[#allocation7 + $0x50] sm:$0xf]  ;;  %v8094_v31 = vld [vmem:[#allocation7 + $0x14] sm:$0xf] }
 0x278   : > { %v1296_v48 = vadd.f32 %v8674_v23, %v1290_v41  ;;  %v6203_v23 = vor.u32 %v8129_v9, %v6202_v8  ;;  %v6276_v41 = vld [vmem:[#allocation7 + $0x1b8] sm:$0xf0]  ;;  %v6188_v8 = vld [vmem:[#allocation7 + $0x108] sm:$0xf0]  ;;  %v8140_v9 = vld [vmem:[#allocation7 + $0x184] sm:$0xf] }
 0x279   : > { %v6279_v45 = vor.u32 %v8146_v40, %v6276_v41  ;;  %v8103_v40 = vld [vmem:[#allocation7 + $0x54] sm:$0xf0]  ;;  %v6418_v41 = vld [vmem:[#allocation7 + $0xd0] sm:$0xf] }
 0x27a   : > { %v9313_v54 = vmax.f32 %v1296_v48, 0.0  ;;  %1964 = vmatpush.bf16.msra.mxu2 %v6203_v23  ;;  %v8144_v48 = vld [vmem:[#allocation7 + $0x1a4] sm:$0xf]  ;;  %v8122_v23 = vld [vmem:[#allocation7 + $0xf4] sm:$0xf] }
 0x27b   : > { %v6271_v51 = vor.u32 %v8144_v48, %v6268_v49  ;;  %v8118_v48 = vld [vmem:[#allocation7 + $0xd4] sm:$0xf]  ;;  %v6420_v49 = vld [vmem:[#allocation7 + $0xd8] sm:$0xf0] }
 0x27c   : > { %v1300_v60 = vrot.slane %v9313_v54, 7  ;;  %v1328_v61 = vpack.c.bf16 %v9313_v54, %v9311_v47  ;;  %v1306_v18 = vrot.slane %v9313_v54, 1  ;;  %v6204_v47 = vld [vmem:[#allocation7 + $0x128] sm:$0xf0]  ;;  %v6258_v54 = vld [vmem:[#allocation7 + $0x190] sm:$0xf] }
 0x27d   : > { %v6207_v50 = vor.u32 %v8128_v46, %v6204_v47 }
 0x27e   : > { %1434 = vmatmul.bf16.vlgmr.msrb.gmra.mxu0 %v1328_v61  ;;  %1448 = vmatmul.bf16.vlgmr.msrb.gmra.mxu1 %v1328_v61  ;;  %v1302_v6 = vsel %vm895_vm2, %v1300_v60, %v1299_v59  ;;  %v1301_v11 = vsel %vm895_vm2, %v1299_v59, %v1300_v60  ;;  %v1308_v30 = vsel %vm902_vm3, %v1306_v18, %v1305_v26  ;;  %v8142_v61 = vld [vmem:[#allocation7 + $0x194] sm:$0xf] }
 0x27f   : > { %v1303_v10 = vmul.f32 %v9266_v12, %v1302_v6  ;;  %1987 = vmatpush.bf16.msrb.mxu0 %v6247_v57  ;;  %2001 = vmatpush.bf16.msrb.mxu1 %v6311_v58  ;;  %v1310_v35 = vmul.f32 %v9268_v13, %v1308_v30  ;;  %v1307_v42 = vsel %vm902_vm3, %v1305_v26, %v1306_v18  ;;  %v8126_v57 = vld [vmem:[#allocation7 + $0x114] sm:$0xf]  ;;  %v6196_v58 = vld [vmem:[#allocation7 + $0x118] sm:$0xf0]  ;;  %v6434_v18 = vld [vmem:[#allocation7 + $0xf0] sm:$0xf] }
 0x280   : > { %v6259_v59 = vor.u32 %v8143_v56, %v6258_v54  ;;  %v6199_v60 = vor.u32 %v8126_v57, %v6196_v58  ;;  %1965 = vmatpush.bf16.msra.mxu2 %v6195_v55  ;;  %v6263_v0 = vor.u32 %v8142_v61, %v6260_v62  ;;  %v6251_v6 = vor.u32 %v8141_v3, %v6250_v2  ;;  %v8117_v55 = vld [vmem:[#allocation7 + $0xc4] sm:$0xf0]  ;;  %v8100_v56 = vld [vmem:[#allocation7 + $0x44] sm:$0xf]  ;;  %v6348_v57 = vld [vmem:[#allocation7 + $0x48] sm:$0xf0] }
 0x281   : > { %v1311_v19 = vpack.c.bf16 %v1301_v11, %v1303_v10  ;;  %v1562_v43 = vpack.c.bf16 %v1310_v35, %v1307_v42  ;;  %v6191_v10 = vor.u32 %v8124_v7, %v6188_v8  ;;  %v6252_v11 = vld [vmem:[#allocation7 + $0x188] sm:$0xf0]  ;;  %v6439_v26 = vor.u32 %v8122_v23, %v6436_v24  ;;  %v8115_v3 = vld [vmem:[#allocation7 + $0xb4] sm:$0xf0]  ;;  %v8112_v23 = vld [vmem:[#allocation7 + $0xa4] sm:$0xf] }
 0x282   : > { %1979 = vmatpush.bf16.msra.mxu3 %v6259_v59  ;;  %v6255_v16 = vor.u32 %v8140_v9, %v6252_v11  ;;  %v6367_v35 = vor.u32 %v8104_v32, %v6364_v33  ;;  %v6355_v42 = vor.u32 %v8103_v40, %v6354_v39  ;;  %v6411_v58 = vor.u32 %v8117_v55, %v6410_v53  ;;  %v6412_v61 = vld [vmem:[#allocation7 + $0xc8] sm:$0xf0]  ;;  %v8114_v9 = vld [vmem:[#allocation7 + $0xb4] sm:$0xf]  ;;  %v6324_v32 = vld [vmem:[#allocation7 + $0x18] sm:$0xf0] }
 0x283   : > { %1542 = vmatmul.bf16.vlgmr.msrb.gmra.mxu2 %v1311_v19  ;;  %1556 = vmatmul.bf16.vlgmr.msrb.gmra.mxu3 %v1311_v19  ;;  %v8123_v19 = vld [vmem:[#allocation7 + $0xf4] sm:$0xf0]  ;;  %v6351_v59 = vor.u32 %v8100_v56, %v6348_v57  ;;  %v6403_v7 = vor.u32 %v8115_v3, %v6402_v1  ;;  %v6396_v24 = vld [vmem:[#allocation7 + $0xa8] sm:$0xf0]  ;;  %v6314_v40 = vld [vmem:[#allocation7] sm:$0xf] }
 0x284   : > { %1988 = vmatpush.bf16.msrb.mxu0 %v6239_v14  ;;  %2002 = vmatpush.bf16.msrb.mxu1 %v6303_v15  ;;  %v6370_v14 = vld [vmem:[#allocation7 + $0x70] sm:$0xf]  ;;  %v8107_v15 = vld [vmem:[#allocation7 + $0x74] sm:$0xf0]  ;;  %v6435_v21 = vor.u32 %v8123_v19, %v6434_v18  ;;  %v8113_v18 = vld [vmem:[#allocation7 + $0xa4] sm:$0xf0] }
 0x285   : > { %v6371_v17 = vor.u32 %v8107_v15, %v6370_v14  ;;  %1966 = vmatpush.bf16.msra.mxu2 %v6187_v5  ;;  %v8098_v5 = vld [vmem:[#allocation7 + $0x34] sm:$0xf]  ;;  %v6330_v14 = vld [vmem:[#allocation7 + $0x20] sm:$0xf]  ;;  %v8097_v15 = vld [vmem:[#allocation7 + $0x24] sm:$0xf0] }
 0x286   : > { %1980 = vmatpush.bf16.msra.mxu3 %v6251_v6  ;;  %v6340_v6 = vld [vmem:[#allocation7 + $0x38] sm:$0xf0]  ;;  %v8096_v19 = vld [vmem:[#allocation7 + $0x24] sm:$0xf] }
 0x287   : > { %v6343_v8 = vor.u32 %v8098_v5, %v6340_v6  ;;  %v6335_v22 = vor.u32 %v8096_v19, %v6332_v20  ;;  %v8187_v19 = vld [vmem:[#allocation7 + $0x2f4] sm:$0xf0] }
 0x288   : > { %1989 = vmatpush.bf16.msrb.mxu0 %v6231_v27  ;;  %2003 = vmatpush.bf16.msrb.mxu1 %v6295_v28  ;;  %v6362_v27 = vld [vmem:[#allocation7 + $0x60] sm:$0xf]  ;;  %v8105_v28 = vld [vmem:[#allocation7 + $0x64] sm:$0xf0] }
 0x289   : > { %2175 = vmatpush.bf16.msrb.mxu2 %v6371_v17  ;;  %v6363_v30 = vor.u32 %v8105_v28, %v6362_v27  ;;  %v6331_v17 = vor.u32 %v8097_v15, %v6330_v14  ;;  %v8095_v27 = vld [vmem:[#allocation7 + $0x14] sm:$0xf0]  ;;  %v6386_v28 = vld [vmem:[#allocation7 + $0x90] sm:$0xf] }
 0x28a   : > { %2189 = vmatpush.bf16.msrb.mxu3 %v6435_v21 }
 0x28c   : > { %1990 = vmatpush.bf16.msrb.mxu0 %v6223_v36  ;;  %2004 = vmatpush.bf16.msrb.mxu1 %v6287_v37  ;;  %v8120_v36 = vld [vmem:[#allocation7 + $0xe4] sm:$0xf]  ;;  %v6428_v37 = vld [vmem:[#allocation7 + $0xe8] sm:$0xf0] }
 0x28d   : > { %v6431_v38 = vor.u32 %v8120_v36, %v6428_v37  ;;  %2176 = vmatpush.bf16.msrb.mxu2 %v6363_v30  ;;  %v8111_v30 = vld [vmem:[#allocation7 + $0x94] sm:$0xf0]  ;;  %v6388_v36 = vld [vmem:[#allocation7 + $0x98] sm:$0xf0] }
 0x28e   : > { %1668 = vmatmul.bf16.vlgmr.msra.gmra.mxu0 %v1562_v43  ;;  %1682 = vmatmul.bf16.vlgmr.msra.gmra.mxu1 %v1562_v43  ;;  %v8119_v43 = vld [vmem:[#allocation7 + $0xd4] sm:$0xf0]  ;;  %v6387_v33 = vor.u32 %v8111_v30, %v6386_v28 }
 0x28f   : > { %2190 = vmatpush.bf16.msrb.mxu3 %v6427_v34  ;;  %v6419_v46 = vor.u32 %v8119_v43, %v6418_v41  ;;  %v6327_v34 = vor.u32 %v8094_v31, %v6324_v32  ;;  %v8093_v41 = vld [vmem:[#allocation7 + $0x4] sm:$0xf0]  ;;  %v6490_v32 = vld [vmem:[#allocation7 + $0x260] sm:$0xf] }
 0x290   : > { %1991 = vmatpush.bf16.msrb.mxu0 %v6215_v44  ;;  %2005 = vmatpush.bf16.msrb.mxu1 %v6279_v45  ;;  %v8102_v44 = vld [vmem:[#allocation7 + $0x54] sm:$0xf]  ;;  %v6356_v45 = vld [vmem:[#allocation7 + $0x58] sm:$0xf0]  ;;  %v6315_v43 = vor.u32 %v8093_v41, %v6314_v40  ;;  %v8184_v40 = vld [vmem:[#allocation7 + $0x2e4] sm:$0xf] }
 0x291   : > { %v6359_v47 = vor.u32 %v8102_v44, %v6356_v45  ;;  %2177 = vmatpush.bf16.msrb.mxu2 %v6355_v42  ;;  %v6378_v42 = vld [vmem:[#allocation7 + $0x80] sm:$0xf]  ;;  %v8109_v44 = vld [vmem:[#allocation7 + $0x84] sm:$0xf0]  ;;  %v8092_v45 = vld [vmem:[#allocation7 + $0x4] sm:$0xf] }
 0x292   : > { %v6556_v41 = vld [vmem:[#allocation7 + $0x2e8] sm:$0xf0] }
 0x293   : > { %2191 = vmatpush.bf16.msrb.mxu3 %v6419_v46  ;;  %v6316_v46 = vld [vmem:[#allocation7 + $0x8] sm:$0xf0] }
 0x294   : > { %1992 = vmatpush.bf16.msrb.mxu0 %v6207_v50  ;;  %2006 = vmatpush.bf16.msrb.mxu1 %v6271_v51  ;;  %v6423_v50 = vor.u32 %v8118_v48, %v6420_v49  ;;  %v6346_v51 = vld [vmem:[#allocation7 + $0x40] sm:$0xf]  ;;  %v6319_v48 = vor.u32 %v8092_v45, %v6316_v46  ;;  %v8108_v49 = vld [vmem:[#allocation7 + $0x84] sm:$0xf]  ;;  %v8167_v45 = vld [vmem:[#allocation7 + $0x254] sm:$0xf0] }
 0x295   : > { %v6347_v54 = vor.u32 %v8101_v52, %v6346_v51  ;;  %v6546_v46 = vld [vmem:[#allocation7 + $0x2d0] sm:$0xf] }
 0x297   : > { %2178 = vmatpush.bf16.msrb.mxu2 %v6347_v54  ;;  %2192 = vmatpush.bf16.msrb.mxu3 %v6411_v58  ;;  %v1692_v58 = vld [vmem:[%s9669_s14] sm:$0x3] }
 0x298   : > { %1993 = vmatpush.bf16.msrb.mxu0 %v6199_v60  ;;  %2007 = vmatpush.bf16.msrb.mxu1 %v6263_v0  ;;  %v8116_v60 = vld [vmem:[#allocation7 + $0xc4] sm:$0xf]  ;;  %v8099_v0 = vld [vmem:[#allocation7 + $0x34] sm:$0xf0] }
 0x299   : > { %v6415_v62 = vor.u32 %v8116_v60, %v6412_v61  ;;  %v6339_v2 = vor.u32 %v8099_v0, %v6338_v63  ;;  %v1694_v0 = vperm.slane %v1692_v58, 0 }
 0x29b   : > { %2179 = vmatpush.bf16.msrb.mxu2 %v6339_v2  ;;  %2193 = vmatpush.bf16.msrb.mxu3 %v6403_v7  ;;  %v1695_v2 = vperm.slane %v1692_v58, 1 }
 0x29c   : > { %1994 = vmatpush.bf16.msrb.mxu0 %v6191_v10  ;;  %2008 = vmatpush.bf16.msrb.mxu1 %v6255_v16  ;;  %v6404_v10 = vld [vmem:[#allocation7 + $0xb8] sm:$0xf0]  ;;  %v6394_v16 = vld [vmem:[#allocation7 + $0xa0] sm:$0xf] }
 0x29d   : > { %v6407_v11 = vor.u32 %v8114_v9, %v6404_v10  ;;  %v6395_v21 = vor.u32 %v8113_v18, %v6394_v16  ;;  %v6498_v16 = vld [vmem:[#allocation7 + $0x270] sm:$0xf] }
 0x29e   : > { %v6562_v18 = vld [vmem:[#allocation7 + $0x2f0] sm:$0xf] }
 0x29f   : > { %2180 = vmatpush.bf16.msrb.mxu2 %v6331_v17  ;;  %2194 = vmatpush.bf16.msrb.mxu3 %v6395_v21  ;;  %v8171_v17 = vld [vmem:[#allocation7 + $0x274] sm:$0xf0]  ;;  %v6563_v31 = vor.u32 %v8187_v19, %v6562_v18  ;;  %v6530_v19 = vld [vmem:[#allocation7 + $0x2b0] sm:$0xf] }
 0x2a0   : > { %2203 = vmatpush.bf16.msra.mxu0 %v6375_v25  ;;  %2217 = vmatpush.bf16.msra.mxu1 %v6439_v26  ;;  %v6399_v25 = vor.u32 %v8112_v23, %v6396_v24  ;;  %v6322_v26 = vld [vmem:[#allocation7 + $0x10] sm:$0xf]  ;;  %v6500_v23 = vld [vmem:[#allocation7 + $0x278] sm:$0xf0]  ;;  %v6499_v30 = vor.u32 %v8171_v17, %v6498_v16  ;;  %v8163_v16 = vld [vmem:[#allocation7 + $0x234] sm:$0xf0] }
 0x2a1   : > { %v6323_v29 = vor.u32 %v8095_v27, %v6322_v26  ;;  %v8186_v26 = vld [vmem:[#allocation7 + $0x2f4] sm:$0xf]  ;;  %v6564_v27 = vld [vmem:[#allocation7 + $0x2f8] sm:$0xf0] }
 0x2a3   : > { %2181 = vmatpush.bf16.msrb.mxu2 %v6323_v29  ;;  %2195 = vmatpush.bf16.msrb.mxu3 %v6387_v33  ;;  %v8169_v33 = vld [vmem:[#allocation7 + $0x264] sm:$0xf0] }
 0x2a4   : > { %2204 = vmatpush.bf16.msra.mxu0 %v6367_v35  ;;  %2218 = vmatpush.bf16.msra.mxu1 %v6431_v38  ;;  %v8110_v35 = vld [vmem:[#allocation7 + $0x94] sm:$0xf] }
 0x2a5   : > { %v6391_v37 = vor.u32 %v8110_v35, %v6388_v36  ;;  %v6567_v35 = vor.u32 %v8186_v26, %v6564_v27  ;;  %v6554_v36 = vld [vmem:[#allocation7 + $0x2e0] sm:$0xf]  ;;  %v6468_v26 = vld [vmem:[#allocation7 + $0x238] sm:$0xf0]  ;;  %v8178_v27 = vld [vmem:[#allocation7 + $0x2b4] sm:$0xf] }
 0x2a7   : > { %2182 = vmatpush.bf16.msrb.mxu2 %v6315_v43  ;;  %v6491_v43 = vor.u32 %v8169_v33, %v6490_v32 }
 0x2a8   : > { %2205 = vmatpush.bf16.msra.mxu0 %v6359_v47  ;;  %2219 = vmatpush.bf16.msra.mxu1 %v6423_v50  ;;  %v6379_v47 = vor.u32 %v8109_v44, %v6378_v42  ;;  %v6380_v50 = vld [vmem:[#allocation7 + $0x88] sm:$0xf0]  ;;  %v6482_v42 = vld [vmem:[#allocation7 + $0x250] sm:$0xf] }
 0x2a9   : > { %v6383_v51 = vor.u32 %v8108_v49, %v6380_v50  ;;  %v6483_v58 = vor.u32 %v8167_v45, %v6482_v42  ;;  %v6460_v42 = vld [vmem:[#allocation7 + $0x228] sm:$0xf0] }
 0x2aa   : > { %2196 = vmatpush.bf16.msrb.mxu3 %v6379_v47  ;;  %v8183_v47 = vld [vmem:[#allocation7 + $0x2d4] sm:$0xf0] }
 0x2ac   : > { %2206 = vmatpush.bf16.msra.mxu0 %v6351_v59  ;;  %2220 = vmatpush.bf16.msra.mxu1 %v6415_v62 }
 0x2b0   : > { %2207 = vmatpush.bf16.msra.mxu0 %v6343_v8  ;;  %2221 = vmatpush.bf16.msra.mxu1 %v6407_v11 }
 0x2b4   : > { %2208 = vmatpush.bf16.msra.mxu0 %v6335_v22  ;;  %2222 = vmatpush.bf16.msra.mxu1 %v6399_v25  ;;  %v8170_v22 = vld [vmem:[#allocation7 + $0x274] sm:$0xf] }
 0x2b8   : > { %2209 = vmatpush.bf16.msra.mxu0 %v6327_v34  ;;  %2223 = vmatpush.bf16.msra.mxu1 %v6391_v37  ;;  %v6503_v34 = vor.u32 %v8170_v22, %v6500_v23  ;;  %v8185_v37 = vld [vmem:[#allocation7 + $0x2e4] sm:$0xf0]  ;;  %v8179_v22 = vld [vmem:[#allocation7 + $0x2b4] sm:$0xf0]  ;;  %v8162_v23 = vld [vmem:[#allocation7 + $0x234] sm:$0xf] }
 0x2b9   : > { %v6555_v44 = vor.u32 %v8185_v37, %v6554_v36  ;;  %v8161_v36 = vld [vmem:[#allocation7 + $0x224] sm:$0xf0]  ;;  %v6471_v37 = vor.u32 %v8162_v23, %v6468_v26  ;;  %v6682_v26 = vld [vmem:[#allocation9 + $0x1e0] sm:$0xf] }
 0x2bc   : > { %2210 = vmatpush.bf16.msra.mxu0 %v6319_v48  ;;  %2224 = vmatpush.bf16.msra.mxu1 %v6383_v51  ;;  %v6559_v51 = vor.u32 %v8184_v40, %v6556_v41  ;;  %v8177_v40 = vld [vmem:[#allocation7 + $0x2a4] sm:$0xf0]  ;;  %v8160_v41 = vld [vmem:[#allocation7 + $0x224] sm:$0xf] }
 0x2fb   : > { %v1435_v38 = vpop.f32.mrf.mxu0  ;;  %v1449_v39 = vpop.f32.mrf.mxu1 }
 0x303   : > { %v1437_v52 = vpop.f32.mrf.mxu0  ;;  %v1451_v53 = vpop.f32.mrf.mxu1 }
 0x306   : > { %v1543_v54 = vpop.f32.mrf.mxu2  ;;  %v1557_v55 = vpop.f32.mrf.mxu3 }
 0x307   : > { %v1544_v59 = vadd.f32 %v1543_v54, %v1435_v38  ;;  %v1558_v60 = vadd.f32 %v1557_v55, %v1449_v39  ;;  %v8168_v38 = vld [vmem:[#allocation7 + $0x264] sm:$0xf]  ;;  %v6492_v39 = vld [vmem:[#allocation7 + $0x268] sm:$0xf0]  ;;  %v8182_v54 = vld [vmem:[#allocation7 + $0x2d4] sm:$0xf] }
 0x308   : > { %v6495_v50 = vor.u32 %v8168_v38, %v6492_v39  ;;  %v6548_v55 = vld [vmem:[#allocation7 + $0x2d8] sm:$0xf0]  ;;  %v6522_v39 = vld [vmem:[#allocation7 + $0x2a0] sm:$0xf] }
 0x30b   : > { %v1669_v56 = vpop.f32.mrf.mxu0  ;;  %v1683_v57 = vpop.f32.mrf.mxu1 }
 0x30c   : > { %v1688_v63 = vadd.f32 %v1669_v56, %v1544_v59  ;;  %v1689_v1 = vadd.f32 %v1683_v57, %v1558_v60  ;;  %v6547_v59 = vor.u32 %v8183_v47, %v6546_v46  ;;  %v6523_v46 = vor.u32 %v8177_v40, %v6522_v39  ;;  %v6450_v47 = vld [vmem:[#allocation7 + $0x210] sm:$0xf]  ;;  %v6628_v40 = vld [vmem:[#allocation9 + $0x178] sm:$0xf0] }
 0x30e   : > { %v1545_v61 = vpop.f32.mrf.mxu2  ;;  %v1559_v62 = vpop.f32.mrf.mxu3  ;;  %v1698_v10 = vadd.f32 %v1694_v0, %v1688_v63  ;;  %v1699_v11 = vadd.f32 %v1695_v2, %v1689_v1  ;;  %v6551_v63 = vor.u32 %v8182_v54, %v6548_v55  ;;  %v8181_v1 = vld [vmem:[#allocation7 + $0x2c4] sm:$0xf0]  ;;  %v6452_v54 = vld [vmem:[#allocation7 + $0x218] sm:$0xf0] }
 0x30f   : > { %v1546_v3 = vadd.f32 %v1545_v61, %v1437_v52  ;;  %v1560_v5 = vadd.f32 %v1559_v62, %v1451_v53  ;;  %v8166_v52 = vld [vmem:[#allocation7 + $0x254] sm:$0xf]  ;;  %v6484_v53 = vld [vmem:[#allocation7 + $0x258] sm:$0xf0]  ;;  %v6474_v61 = vld [vmem:[#allocation7 + $0x240] sm:$0xf] }
 0x310   : > { %v9338_v24 = vmax.f32 %v1698_v10, 0.0  ;;  %v9340_v25 = vmax.f32 %v1699_v11, 0.0  ;;  %v6487_v60 = vor.u32 %v8166_v52, %v6484_v53  ;;  %v8165_v62 = vld [vmem:[#allocation7 + $0x244] sm:$0xf0]  ;;  %v8175_v52 = vld [vmem:[#allocation7 + $0x294] sm:$0xf0] }
 0x311   : > { %v8158_v53 = vld [vmem:[#allocation7 + $0x214] sm:$0xf] }
 0x312   : > { %v1706_v56 = vrot.slane %v9338_v24, 7  ;;  %v1707_v57 = vrot.slane %v9340_v25, 7 }
 0x313   : > { %v1671_v6 = vpop.f32.mrf.mxu0  ;;  %v1685_v7 = vpop.f32.mrf.mxu1 }
 0x314   : > { %v1690_v8 = vadd.f32 %v1671_v6, %v1546_v3  ;;  %v1691_v9 = vadd.f32 %v1685_v7, %v1560_v5  ;;  %v6476_v6 = vld [vmem:[#allocation7 + $0x248] sm:$0xf0]  ;;  %v8180_v7 = vld [vmem:[#allocation7 + $0x2c4] sm:$0xf] }
 0x316   : > { %v1700_v14 = vadd.f32 %v1694_v0, %v1690_v8  ;;  %v1701_v15 = vadd.f32 %v1695_v2, %v1691_v9  ;;  %v6538_v0 = vld [vmem:[#allocation7 + $0x2c0] sm:$0xf]  ;;  %v8164_v2 = vld [vmem:[#allocation7 + $0x244] sm:$0xf]  ;;  %v6540_v8 = vld [vmem:[#allocation7 + $0x2c8] sm:$0xf0]  ;;  %v6475_v9 = vor.u32 %v8165_v62, %v6474_v61 }
 0x317   : > { %v6539_v10 = vor.u32 %v8181_v1, %v6538_v0  ;;  %v6479_v17 = vor.u32 %v8164_v2, %v6476_v6  ;;  %v6543_v18 = vor.u32 %v8180_v7, %v6540_v8  ;;  %v8157_v0 = vld [vmem:[#allocation7 + $0x204] sm:$0xf0]  ;;  %v6506_v1 = vld [vmem:[#allocation7 + $0x280] sm:$0xf]  ;;  %v6455_v2 = vor.u32 %v8158_v53, %v6452_v54  ;;  %v8172_v6 = vld [vmem:[#allocation7 + $0x284] sm:$0xf] }
 0x318   : > { %v9334_v20 = vmax.f32 %v1700_v14, 0.0  ;;  %v9336_v21 = vmax.f32 %v1701_v15, 0.0  ;;  %v6466_v15 = vld [vmem:[#allocation7 + $0x230] sm:$0xf]  ;;  %v6508_v7 = vld [vmem:[#allocation7 + $0x288] sm:$0xf0] }
 0x319   : > { %v6690_v8 = vld [vmem:[#allocation9 + $0x1f0] sm:$0xf]  ;;  %v6666_v54 = vld [vmem:[#allocation9 + $0x1c0] sm:$0xf] }
 0x31a   : > { %v1764_v28 = vpack.c.bf16 %v9334_v20, %v9338_v24  ;;  %v1765_v29 = vpack.c.bf16 %v9336_v21, %v9340_v25  ;;  %v1708_v48 = vrot.slane %v9334_v20, 7  ;;  %v1709_v49 = vrot.slane %v9336_v21, 7 }
 0x31b   : > { %v1720_v55 = vrot.slane %v9334_v20, 1  ;;  %v8173_v20 = vld [vmem:[#allocation7 + $0x284] sm:$0xf0] }
 0x31c   : > { %1967 = vmatmul.bf16.vlgmr.msra.gmra.mxu2 %v1764_v28  ;;  %1981 = vmatmul.bf16.vlgmr.msra.gmra.mxu3 %v1765_v29  ;;  %v1712_v3 = vsel %vm895_vm2, %v1708_v48, %v1706_v56  ;;  %v1713_v5 = vsel %vm895_vm2, %v1709_v49, %v1707_v57 }
 0x31d   : > { %1995 = vmatmul.bf16.vlgmr.msrb.gmra.mxu0 %v1764_v28  ;;  %2009 = vmatmul.bf16.vlgmr.msrb.gmra.mxu1 %v1765_v29  ;;  %v1714_v11 = vmul.f32 %v9266_v12, %v1712_v3  ;;  %v1715_v14 = vmul.f32 %v9266_v12, %v1713_v5  ;;  %v6532_v28 = vld [vmem:[#allocation7 + $0x2b8] sm:$0xf0]  ;;  %v1710_v29 = vsel %vm895_vm2, %v1706_v56, %v1708_v48  ;;  %v8159_v48 = vld [vmem:[#allocation7 + $0x214] sm:$0xf0]  ;;  %v1721_v56 = vrot.slane %v9336_v21, 1 }
 0x31e   : > { %2426 = vmatpush.bf16.msra.mxu2 %v6499_v30  ;;  %2440 = vmatpush.bf16.msra.mxu3 %v6563_v31  ;;  %v1711_v30 = vsel %vm895_vm2, %v1707_v57, %v1709_v49  ;;  %v6467_v31 = vor.u32 %v8163_v16, %v6466_v15  ;;  %v6535_v38 = vor.u32 %v8178_v27, %v6532_v28  ;;  %v6514_v49 = vld [vmem:[#allocation7 + $0x290] sm:$0xf]  ;;  %v8174_v57 = vld [vmem:[#allocation7 + $0x294] sm:$0xf]  ;;  %v8156_v5 = vld [vmem:[#allocation7 + $0x204] sm:$0xf] }
 0x31f   : > { %2454 = vmatpush.bf16.msrb.mxu0 %v6503_v34  ;;  %2468 = vmatpush.bf16.msrb.mxu1 %v6567_v35  ;;  %v1730_v32 = vpack.c.bf16 %v1710_v29, %v1714_v11  ;;  %v1731_v33 = vpack.c.bf16 %v1711_v30, %v1715_v14  ;;  %v6531_v34 = vor.u32 %v8179_v22, %v6530_v19  ;;  %v6458_v35 = vld [vmem:[#allocation7 + $0x220] sm:$0xf]  ;;  %v6444_v21 = vld [vmem:[#allocation7 + $0x208] sm:$0xf0]  ;;  %v6692_v11 = vld [vmem:[#allocation9 + $0x1f8] sm:$0xf0] }
 0x320   : > { %v6459_v45 = vor.u32 %v8161_v36, %v6458_v35  ;;  %v6451_v61 = vor.u32 %v8159_v48, %v6450_v47  ;;  %v6515_v62 = vor.u32 %v8175_v52, %v6514_v49  ;;  %v6507_v15 = vor.u32 %v8173_v20, %v6506_v1  ;;  %v8249_v27 = vld [vmem:[#allocation9 + $0x1e4] sm:$0xf0]  ;;  %v8248_v28 = vld [vmem:[#allocation9 + $0x1e4] sm:$0xf]  ;;  %v6684_v29 = vld [vmem:[#allocation9 + $0x1e8] sm:$0xf0] }
 0x321   : > { %v6447_v16 = vor.u32 %v8156_v5, %v6444_v21  ;;  %v6687_v35 = vor.u32 %v8248_v28, %v6684_v29  ;;  %v6626_v36 = vld [vmem:[#allocation9 + $0x170] sm:$0xf]  ;;  %v6618_v47 = vld [vmem:[#allocation9 + $0x160] sm:$0xf]  ;;  %v8233_v48 = vld [vmem:[#allocation9 + $0x164] sm:$0xf0] }
 0x322   : > { %2427 = vmatpush.bf16.msra.mxu2 %v6491_v43  ;;  %2441 = vmatpush.bf16.msra.mxu3 %v6555_v44  ;;  %v8176_v43 = vld [vmem:[#allocation7 + $0x2a4] sm:$0xf]  ;;  %v6524_v44 = vld [vmem:[#allocation7 + $0x2a8] sm:$0xf0]  ;;  %v8242_v20 = vld [vmem:[#allocation9 + $0x1b4] sm:$0xf] }
 0x323   : > { %2455 = vmatpush.bf16.msrb.mxu0 %v6495_v50  ;;  %2469 = vmatpush.bf16.msrb.mxu1 %v6559_v51  ;;  %v6463_v50 = vor.u32 %v8160_v41, %v6460_v42  ;;  %v6527_v51 = vor.u32 %v8176_v43, %v6524_v44  ;;  %v6674_v42 = vld [vmem:[#allocation9 + $0x1d0] sm:$0xf]  ;;  %v8247_v43 = vld [vmem:[#allocation9 + $0x1d4] sm:$0xf0]  ;;  %v8246_v44 = vld [vmem:[#allocation9 + $0x1d4] sm:$0xf] }
 0x324   : > { %v6620_v52 = vld [vmem:[#allocation9 + $0x168] sm:$0xf0]  ;;  %v6660_v21 = vld [vmem:[#allocation9 + $0x1b8] sm:$0xf0]  ;;  %v6642_v29 = vld [vmem:[#allocation9 + $0x190] sm:$0xf] }
 0x326   : > { %2428 = vmatpush.bf16.msra.mxu2 %v6483_v58  ;;  %2442 = vmatpush.bf16.msra.mxu3 %v6547_v59  ;;  %v6516_v58 = vld [vmem:[#allocation7 + $0x298] sm:$0xf0]  ;;  %v1718_v59 = vrot.slane %v9338_v24, 1 }
 0x327   : > { %2456 = vmatpush.bf16.msrb.mxu0 %v6487_v60  ;;  %2470 = vmatpush.bf16.msrb.mxu1 %v6551_v63  ;;  %v1719_v60 = vrot.slane %v9340_v25, 1  ;;  %v6442_v63 = vld [vmem:[#allocation7 + $0x200] sm:$0xf]  ;;  %v6519_v3 = vor.u32 %v8174_v57, %v6516_v58  ;;  %v6668_v58 = vld [vmem:[#allocation9 + $0x1c8] sm:$0xf0] }
 0x328   : > { %v1724_v24 = vsel %vm902_vm3, %v1720_v55, %v1718_v59  ;;  %v6443_v14 = vor.u32 %v8157_v0, %v6442_v63  ;;  %v1722_v30 = vsel %vm902_vm3, %v1718_v59, %v1720_v55  ;;  %v8245_v55 = vld [vmem:[#allocation9 + $0x1c4] sm:$0xf0]  ;;  %v6612_v0 = vld [vmem:[#allocation9 + $0x158] sm:$0xf0] }
 0x329   : > { %v1725_v25 = vsel %vm902_vm3, %v1721_v56, %v1719_v60  ;;  %v6667_v57 = vor.u32 %v8245_v55, %v6666_v54  ;;  %v8223_v54 = vld [vmem:[#allocation9 + $0x114] sm:$0xf0]  ;;  %v8222_v55 = vld [vmem:[#allocation9 + $0x114] sm:$0xf] }
 0x32a   : > { %2429 = vmatpush.bf16.msra.mxu2 %v6475_v9  ;;  %2443 = vmatpush.bf16.msra.mxu3 %v6539_v10  ;;  %v8251_v9 = vld [vmem:[#allocation9 + $0x1f4] sm:$0xf0]  ;;  %v8250_v10 = vld [vmem:[#allocation9 + $0x1f4] sm:$0xf]  ;;  %v1729_v19 = vmul.f32 %v9268_v13, %v1725_v25 }
 0x32b   : > { %2457 = vmatpush.bf16.msrb.mxu0 %v6479_v17  ;;  %2471 = vmatpush.bf16.msrb.mxu1 %v6543_v18  ;;  %v6511_v17 = vor.u32 %v8172_v6, %v6508_v7  ;;  %v1728_v18 = vmul.f32 %v9268_v13, %v1724_v24  ;;  %v6691_v22 = vor.u32 %v8251_v9, %v6690_v8  ;;  %v6602_v6 = vld [vmem:[#allocation9 + $0x140] sm:$0xf]  ;;  %v8229_v7 = vld [vmem:[#allocation9 + $0x144] sm:$0xf0]  ;;  %v8228_v8 = vld [vmem:[#allocation9 + $0x144] sm:$0xf] }
 0x32c   : > { %2183 = vmatmul.bf16.vlgmr.msrb.gmra.mxu2 %v1730_v32  ;;  %2197 = vmatmul.bf16.vlgmr.msrb.gmra.mxu3 %v1731_v33  ;;  %v6695_v23 = vor.u32 %v8250_v10, %v6692_v11  ;;  %v6663_v24 = vor.u32 %v8242_v20, %v6660_v21  ;;  %v6603_v25 = vor.u32 %v8229_v7, %v6602_v6  ;;  %v6604_v9 = vld [vmem:[#allocation9 + $0x148] sm:$0xf0]  ;;  %v6650_v11 = vld [vmem:[#allocation9 + $0x1a0] sm:$0xf]  ;;  %v8220_v20 = vld [vmem:[#allocation9 + $0x104] sm:$0xf] }
 0x32d   : > { %2211 = vmatmul.bf16.vlgmr.msra.gmra.mxu0 %v1730_v32  ;;  %2225 = vmatmul.bf16.vlgmr.msra.gmra.mxu1 %v1731_v33  ;;  %v2231_v32 = vpack.c.bf16 %v1728_v18, %v1722_v30  ;;  %v6607_v10 = vor.u32 %v8228_v8, %v6604_v9  ;;  %v8239_v30 = vld [vmem:[#allocation9 + $0x194] sm:$0xf0]  ;;  %v6754_v21 = vld [vmem:[#allocation9 + $0x70] sm:$0xf] }
 0x32e   : > { %2430 = vmatpush.bf16.msra.mxu2 %v6467_v31  ;;  %2444 = vmatpush.bf16.msra.mxu3 %v6531_v34  ;;  %v1723_v31 = vsel %vm902_vm3, %v1719_v60, %v1721_v56  ;;  %v6683_v34 = vor.u32 %v8249_v27, %v6682_v26  ;;  %v8244_v56 = vld [vmem:[#allocation9 + $0x1c4] sm:$0xf]  ;;  %v6610_v60 = vld [vmem:[#allocation9 + $0x150] sm:$0xf]  ;;  %v6596_v27 = vld [vmem:[#allocation9 + $0x138] sm:$0xf0] }
 0x32f   : > { %2458 = vmatpush.bf16.msrb.mxu0 %v6471_v37  ;;  %2472 = vmatpush.bf16.msrb.mxu1 %v6535_v38  ;;  %v2232_v33 = vpack.c.bf16 %v1729_v19, %v1723_v31  ;;  %v8235_v37 = vld [vmem:[#allocation9 + $0x174] sm:$0xf0]  ;;  %v8234_v38 = vld [vmem:[#allocation9 + $0x174] sm:$0xf]  ;;  %v6671_v59 = vor.u32 %v8244_v56, %v6668_v58  ;;  %v6594_v19 = vld [vmem:[#allocation9 + $0x130] sm:$0xf] }
 0x330   : > { %v6627_v39 = vor.u32 %v8235_v37, %v6626_v36  ;;  %v6631_v41 = vor.u32 %v8234_v38, %v6628_v40  ;;  %v8238_v31 = vld [vmem:[#allocation9 + $0x194] sm:$0xf]  ;;  %v8225_v36 = vld [vmem:[#allocation9 + $0x124] sm:$0xf0]  ;;  %v8224_v37 = vld [vmem:[#allocation9 + $0x124] sm:$0xf] }
 0x331   : > { %v6580_v56 = vld [vmem:[#allocation9 + $0x118] sm:$0xf0]  ;;  %v8203_v7 = vld [vmem:[#allocation9 + $0x74] sm:$0xf0] }
 0x332   : > { %2431 = vmatpush.bf16.msra.mxu2 %v6459_v45  ;;  %2445 = vmatpush.bf16.msra.mxu3 %v6523_v46  ;;  %v6675_v45 = vor.u32 %v8247_v43, %v6674_v42  ;;  %v6676_v46 = vld [vmem:[#allocation9 + $0x1d8] sm:$0xf0]  ;;  %v8237_v42 = vld [vmem:[#allocation9 + $0x184] sm:$0xf0]  ;;  %v8236_v43 = vld [vmem:[#allocation9 + $0x184] sm:$0xf]  ;;  %v6583_v58 = vor.u32 %v8222_v55, %v6580_v56  ;;  %v6755_v8 = vor.u32 %v8203_v7, %v6754_v21 }
 0x333   : > { %2459 = vmatpush.bf16.msrb.mxu0 %v6463_v50  ;;  %2473 = vmatpush.bf16.msrb.mxu1 %v6527_v51  ;;  %v6679_v49 = vor.u32 %v8246_v44, %v6676_v46  ;;  %v6619_v50 = vor.u32 %v8233_v48, %v6618_v47  ;;  %v8232_v51 = vld [vmem:[#allocation9 + $0x164] sm:$0xf]  ;;  %v6818_v46 = vld [vmem:[#allocation9 + $0xf0] sm:$0xf]  ;;  %v8219_v47 = vld [vmem:[#allocation9 + $0xf4] sm:$0xf0] }
 0x334   : > { %v6623_v53 = vor.u32 %v8232_v51, %v6620_v52  ;;  %v6820_v51 = vld [vmem:[#allocation9 + $0xf8] sm:$0xf0]  ;;  %v6578_v52 = vld [vmem:[#allocation9 + $0x110] sm:$0xf]  ;;  %v6732_v56 = vld [vmem:[#allocation9 + $0x48] sm:$0xf0] }
 0x335   : > { %v6724_v21 = vld [vmem:[#allocation9 + $0x38] sm:$0xf0]  ;;  %v6770_v7 = vld [vmem:[#allocation9 + $0x90] sm:$0xf] }
 0x336   : > { %2432 = vmatpush.bf16.msra.mxu2 %v6451_v61  ;;  %2446 = vmatpush.bf16.msra.mxu3 %v6515_v62  ;;  %v8231_v61 = vld [vmem:[#allocation9 + $0x154] sm:$0xf0]  ;;  %v8230_v62 = vld [vmem:[#allocation9 + $0x154] sm:$0xf] }
 0x337   : > { %2460 = vmatpush.bf16.msrb.mxu0 %v6455_v2  ;;  %2474 = vmatpush.bf16.msrb.mxu1 %v6519_v3  ;;  %v6611_v63 = vor.u32 %v8231_v61, %v6610_v60  ;;  %v6615_v1 = vor.u32 %v8230_v62, %v6612_v0  ;;  %v6658_v2 = vld [vmem:[#allocation9 + $0x1b0] sm:$0xf]  ;;  %v8243_v3 = vld [vmem:[#allocation9 + $0x1b4] sm:$0xf0]  ;;  %v8217_v60 = vld [vmem:[#allocation9 + $0xe4] sm:$0xf0] }
 0x338   : > { %v6659_v5 = vor.u32 %v8243_v3, %v6658_v2  ;;  %v8216_v61 = vld [vmem:[#allocation9 + $0xe4] sm:$0xf]  ;;  %v6570_v0 = vld [vmem:[#allocation9 + $0x100] sm:$0xf] }
 0x33a   : > { %2433 = vmatpush.bf16.msra.mxu2 %v6443_v14  ;;  %2447 = vmatpush.bf16.msra.mxu3 %v6507_v15  ;;  %v8241_v14 = vld [vmem:[#allocation9 + $0x1a4] sm:$0xf0]  ;;  %v8240_v15 = vld [vmem:[#allocation9 + $0x1a4] sm:$0xf] }
 0x33b   : > { %2461 = vmatpush.bf16.msrb.mxu0 %v6447_v16  ;;  %2475 = vmatpush.bf16.msrb.mxu1 %v6511_v17  ;;  %v6651_v16 = vor.u32 %v8241_v14, %v6650_v11  ;;  %v6652_v17 = vld [vmem:[#allocation9 + $0x1a8] sm:$0xf0]  ;;  %v8215_v11 = vld [vmem:[#allocation9 + $0xd4] sm:$0xf0]  ;;  %v8214_v14 = vld [vmem:[#allocation9 + $0xd4] sm:$0xf] }
 0x33c   : > { %v6655_v18 = vor.u32 %v8240_v15, %v6652_v17 }
 0x33d   : > { %2434 = vmatmul.bf16.vlgmr.msra.gmra.mxu2 %v2231_v32  ;;  %2448 = vmatmul.bf16.vlgmr.msra.gmra.mxu3 %v2232_v33 }
 0x33e   : > { %2767 = vmatpush.bf16.msrb.mxu3 %v6691_v22  ;;  %2462 = vmatmul.bf16.vlgmr.msrb.gmra.mxu0 %v2231_v32  ;;  %v8227_v22 = vld [vmem:[#allocation9 + $0x134] sm:$0xf0]  ;;  %v6643_v32 = vor.u32 %v8239_v30, %v6642_v29  ;;  %v6794_v30 = vld [vmem:[#allocation9 + $0xc0] sm:$0xf] }
 0x33f   : > { %2795 = vmatpush.bf16.msra.mxu1 %v6695_v23  ;;  %2753 = vmatpush.bf16.msrb.mxu2 %v6627_v39  ;;  %v8226_v23 = vld [vmem:[#allocation9 + $0x134] sm:$0xf]  ;;  %v6595_v26 = vor.u32 %v8227_v22, %v6594_v19  ;;  %v6588_v39 = vld [vmem:[#allocation9 + $0x128] sm:$0xf0]  ;;  %v6746_v22 = vld [vmem:[#allocation9 + $0x60] sm:$0xf] }
 0x340   : > { %2476 = vmatmul.bf16.vlgmr.msrb.gmra.mxu1 %v2232_v33  ;;  %2781 = vmatpush.bf16.msra.mxu0 %v6631_v41  ;;  %v6599_v28 = vor.u32 %v8226_v23, %v6596_v27  ;;  %v6644_v33 = vld [vmem:[#allocation9 + $0x198] sm:$0xf0]  ;;  %v6591_v40 = vor.u32 %v8224_v37, %v6588_v39  ;;  %v6634_v41 = vld [vmem:[#allocation9 + $0x180] sm:$0xf]  ;;  %v8201_v23 = vld [vmem:[#allocation9 + $0x64] sm:$0xf0] }
 0x341   : > { %v6635_v44 = vor.u32 %v8237_v42, %v6634_v41  ;;  %v6747_v27 = vor.u32 %v8201_v23, %v6746_v22  ;;  %v8199_v37 = vld [vmem:[#allocation9 + $0x54] sm:$0xf0]  ;;  %v8198_v41 = vld [vmem:[#allocation9 + $0x54] sm:$0xf]  ;;  %v6740_v42 = vld [vmem:[#allocation9 + $0x58] sm:$0xf0] }
 0x342   : > { %2768 = vmatpush.bf16.msrb.mxu3 %v6683_v34  ;;  %v6647_v34 = vor.u32 %v8238_v31, %v6644_v33  ;;  %v8213_v31 = vld [vmem:[#allocation9 + $0xc4] sm:$0xf0]  ;;  %v6716_v23 = vld [vmem:[#allocation9 + $0x28] sm:$0xf0] }
 0x343   : > { %2796 = vmatpush.bf16.msra.mxu1 %v6687_v35  ;;  %2754 = vmatpush.bf16.msrb.mxu2 %v6619_v50  ;;  %v6586_v35 = vld [vmem:[#allocation9 + $0x120] sm:$0xf]  ;;  %v8218_v50 = vld [vmem:[#allocation9 + $0xf4] sm:$0xf]  ;;  %v6795_v33 = vor.u32 %v8213_v31, %v6794_v30  ;;  %v6764_v31 = vld [vmem:[#allocation9 + $0x88] sm:$0xf0] }
 0x344   : > { %2782 = vmatpush.bf16.msra.mxu0 %v6623_v53  ;;  %v6587_v38 = vor.u32 %v8225_v36, %v6586_v35  ;;  %v6823_v53 = vor.u32 %v8218_v50, %v6820_v51  ;;  %v6738_v36 = vld [vmem:[#allocation9 + $0x50] sm:$0xf] }
 0x346   : > { %2769 = vmatpush.bf16.msrb.mxu3 %v6675_v45  ;;  %v6636_v45 = vld [vmem:[#allocation9 + $0x188] sm:$0xf0] }
 0x347   : > { %2797 = vmatpush.bf16.msra.mxu1 %v6679_v49  ;;  %2755 = vmatpush.bf16.msrb.mxu2 %v6611_v63  ;;  %v6639_v48 = vor.u32 %v8236_v43, %v6636_v45  ;;  %v6819_v49 = vor.u32 %v8219_v47, %v6818_v46  ;;  %v6812_v63 = vld [vmem:[#allocation9 + $0xe8] sm:$0xf0]  ;;  %v6743_v43 = vor.u32 %v8198_v41, %v6740_v42  ;;  %v8211_v45 = vld [vmem:[#allocation9 + $0xb4] sm:$0xf0]  ;;  %v8210_v46 = vld [vmem:[#allocation9 + $0xb4] sm:$0xf] }
 0x348   : > { %2783 = vmatpush.bf16.msra.mxu0 %v6615_v1  ;;  %v8221_v1 = vld [vmem:[#allocation9 + $0x104] sm:$0xf0]  ;;  %v6815_v2 = vor.u32 %v8216_v61, %v6812_v63  ;;  %v8208_v61 = vld [vmem:[#allocation9 + $0xa4] sm:$0xf] }
 0x349   : > { %v6571_v3 = vor.u32 %v8221_v1, %v6570_v0  ;;  %v6722_v0 = vld [vmem:[#allocation9 + $0x30] sm:$0xf]  ;;  %v8195_v1 = vld [vmem:[#allocation9 + $0x34] sm:$0xf0] }
 0x34a   : > { %2770 = vmatpush.bf16.msrb.mxu3 %v6667_v57  ;;  %v6579_v57 = vor.u32 %v8223_v54, %v6578_v52  ;;  %v6730_v52 = vld [vmem:[#allocation9 + $0x40] sm:$0xf]  ;;  %v8196_v54 = vld [vmem:[#allocation9 + $0x44] sm:$0xf] }
 0x34b   : > { %2798 = vmatpush.bf16.msra.mxu1 %v6671_v59  ;;  %2756 = vmatpush.bf16.msrb.mxu2 %v6603_v25  ;;  %v6810_v59 = vld [vmem:[#allocation9 + $0xe0] sm:$0xf]  ;;  %v6756_v25 = vld [vmem:[#allocation9 + $0x78] sm:$0xf0] }
 0x34c   : > { %2784 = vmatpush.bf16.msra.mxu0 %v6607_v10  ;;  %v6811_v62 = vor.u32 %v8217_v60, %v6810_v59  ;;  %v6802_v10 = vld [vmem:[#allocation9 + $0xd0] sm:$0xf]  ;;  %v8209_v59 = vld [vmem:[#allocation9 + $0xa4] sm:$0xf0] }
 0x34d   : > { %v6803_v15 = vor.u32 %v8215_v11, %v6802_v10 }
 0x34e   : > { %2771 = vmatpush.bf16.msrb.mxu3 %v6659_v5  ;;  %v6572_v5 = vld [vmem:[#allocation9 + $0x108] sm:$0xf0] }
 0x34f   : > { %2799 = vmatpush.bf16.msra.mxu1 %v6663_v24  ;;  %2757 = vmatpush.bf16.msrb.mxu2 %v6595_v26  ;;  %v6575_v6 = vor.u32 %v8220_v20, %v6572_v5  ;;  %v8202_v24 = vld [vmem:[#allocation9 + $0x74] sm:$0xf]  ;;  %v8200_v26 = vld [vmem:[#allocation9 + $0x64] sm:$0xf]  ;;  %v6723_v5 = vor.u32 %v8195_v1, %v6722_v0 }
 0x350   : > { %2785 = vmatpush.bf16.msra.mxu0 %v6599_v28  ;;  %v6759_v9 = vor.u32 %v8202_v24, %v6756_v25  ;;  %v6748_v28 = vld [vmem:[#allocation9 + $0x68] sm:$0xf0]  ;;  %v8207_v24 = vld [vmem:[#allocation9 + $0x94] sm:$0xf0]  ;;  %v8206_v25 = vld [vmem:[#allocation9 + $0x94] sm:$0xf] }
 0x351   : > { %v6751_v29 = vor.u32 %v8200_v26, %v6748_v28  ;;  %v8205_v28 = vld [vmem:[#allocation9 + $0x84] sm:$0xf0] }
 0x352   : > { %2772 = vmatpush.bf16.msrb.mxu3 %v6651_v16  ;;  %v6804_v16 = vld [vmem:[#allocation9 + $0xd8] sm:$0xf0] }
 0x353   : > { %2800 = vmatpush.bf16.msra.mxu1 %v6655_v18  ;;  %2758 = vmatpush.bf16.msrb.mxu2 %v6587_v38  ;;  %v6807_v19 = vor.u32 %v8214_v14, %v6804_v16  ;;  %v8193_v16 = vld [vmem:[#allocation9 + $0x24] sm:$0xf0] }
 0x354   : > { %2786 = vmatpush.bf16.msra.mxu0 %v6591_v40  ;;  %v6739_v40 = vor.u32 %v8199_v37, %v6738_v36  ;;  %v8191_v36 = vld [vmem:[#allocation9 + $0x14] sm:$0xf0]  ;;  %v8190_v37 = vld [vmem:[#allocation9 + $0x14] sm:$0xf] }
 0x356   : > { %2773 = vmatpush.bf16.msrb.mxu3 %v6643_v32  ;;  %v8212_v32 = vld [vmem:[#allocation9 + $0xc4] sm:$0xf] }
 0x357   : > { %2801 = vmatpush.bf16.msra.mxu1 %v6647_v34  ;;  %2759 = vmatpush.bf16.msrb.mxu2 %v6579_v57  ;;  %v6796_v34 = vld [vmem:[#allocation9 + $0xc8] sm:$0xf0]  ;;  %v6735_v57 = vor.u32 %v8196_v54, %v6732_v56 }
 0x358   : > { %2787 = vmatpush.bf16.msra.mxu0 %v6583_v58  ;;  %v6799_v35 = vor.u32 %v8212_v32, %v6796_v34  ;;  %v6778_v58 = vld [vmem:[#allocation9 + $0xa0] sm:$0xf] }
 0x359   : > { %v6779_v60 = vor.u32 %v8209_v59, %v6778_v58 }
 0x35a   : > { %2774 = vmatpush.bf16.msrb.mxu3 %v6635_v44  ;;  %v6786_v44 = vld [vmem:[#allocation9 + $0xb0] sm:$0xf] }
 0x35b   : > { %2802 = vmatpush.bf16.msra.mxu1 %v6639_v48  ;;  %2760 = vmatpush.bf16.msrb.mxu2 %v6571_v3  ;;  %v6787_v47 = vor.u32 %v8211_v45, %v6786_v44  ;;  %v6788_v48 = vld [vmem:[#allocation9 + $0xb8] sm:$0xf0]  ;;  %v6698_v45 = vld [vmem:[#allocation9] sm:$0xf] }
 0x35c   : > { %2788 = vmatpush.bf16.msra.mxu0 %v6575_v6  ;;  %v6791_v51 = vor.u32 %v8210_v46, %v6788_v48  ;;  %v8189_v46 = vld [vmem:[#allocation9 + $0x4] sm:$0xf0]  ;;  %v8188_v48 = vld [vmem:[#allocation9 + $0x4] sm:$0xf] }
 0x35e   : > { %2983 = vmatpush.bf16.msra.mxu3 %v6819_v49 }
 0x35f   : > { %3011 = vmatpush.bf16.msrb.mxu1 %v6823_v53  ;;  %2969 = vmatpush.bf16.msra.mxu2 %v6755_v8  ;;  %v8197_v53 = vld [vmem:[#allocation9 + $0x44] sm:$0xf0]  ;;  %v6771_v8 = vor.u32 %v8207_v24, %v6770_v7 }
 0x360   : > { %2997 = vmatpush.bf16.msrb.mxu0 %v6759_v9  ;;  %v6731_v55 = vor.u32 %v8197_v53, %v6730_v52  ;;  %v6772_v9 = vld [vmem:[#allocation9 + $0x98] sm:$0xf0] }
 0x361   : > { %v6775_v14 = vor.u32 %v8206_v25, %v6772_v9 }
 0x362   : > { %2984 = vmatpush.bf16.msra.mxu3 %v6811_v62  ;;  %v6780_v62 = vld [vmem:[#allocation9 + $0xa8] sm:$0xf0] }
 0x363   : > { %3012 = vmatpush.bf16.msrb.mxu1 %v6815_v2  ;;  %2970 = vmatpush.bf16.msra.mxu2 %v6747_v27  ;;  %v6783_v63 = vor.u32 %v8208_v61, %v6780_v62  ;;  %v8194_v2 = vld [vmem:[#allocation9 + $0x34] sm:$0xf]  ;;  %v6762_v27 = vld [vmem:[#allocation9 + $0x80] sm:$0xf] }
 0x364   : > { %2998 = vmatpush.bf16.msrb.mxu0 %v6751_v29  ;;  %v6727_v6 = vor.u32 %v8194_v2, %v6724_v21  ;;  %v8204_v29 = vld [vmem:[#allocation9 + $0x84] sm:$0xf]  ;;  %v6763_v30 = vor.u32 %v8205_v28, %v6762_v27  ;;  %v2486_v62 = vld [vmem:[%s9670_s15] sm:$0x3] }
 0x365   : > { %v6767_v32 = vor.u32 %v8204_v29, %v6764_v31 }
 0x366   : > { %2985 = vmatpush.bf16.msra.mxu3 %v6803_v15  ;;  %v6714_v15 = vld [vmem:[#allocation9 + $0x20] sm:$0xf] }
 0x367   : > { %3013 = vmatpush.bf16.msrb.mxu1 %v6807_v19  ;;  %2971 = vmatpush.bf16.msra.mxu2 %v6739_v40  ;;  %v8192_v19 = vld [vmem:[#allocation9 + $0x24] sm:$0xf]  ;;  %v6715_v22 = vor.u32 %v8193_v16, %v6714_v15  ;;  %v6708_v40 = vld [vmem:[#allocation9 + $0x18] sm:$0xf0] }
 0x368   : > { %2999 = vmatpush.bf16.msrb.mxu0 %v6743_v43  ;;  %v6719_v26 = vor.u32 %v8192_v19, %v6716_v23  ;;  %v6711_v42 = vor.u32 %v8190_v37, %v6708_v40  ;;  %v8283_v19 = vld [vmem:[#allocation9 + $0x2f4] sm:$0xf0]  ;;  %v6948_v23 = vld [vmem:[#allocation9 + $0x2f8] sm:$0xf0]  ;;  %v6882_v40 = vld [vmem:[#allocation9 + $0x270] sm:$0xf] }
 0x36a   : > { %2986 = vmatpush.bf16.msra.mxu3 %v6795_v33  ;;  %v6706_v33 = vld [vmem:[#allocation9 + $0x10] sm:$0xf] }
 0x36b   : > { %3014 = vmatpush.bf16.msrb.mxu1 %v6799_v35  ;;  %2972 = vmatpush.bf16.msra.mxu2 %v6731_v55  ;;  %v6707_v41 = vor.u32 %v8191_v36, %v6706_v33  ;;  %v6940_v36 = vld [vmem:[#allocation9 + $0x2e8] sm:$0xf0] }
 0x36c   : > { %3000 = vmatpush.bf16.msrb.mxu0 %v6735_v57 }
 0x36e   : > { %2987 = vmatpush.bf16.msra.mxu3 %v6787_v47  ;;  %v6699_v47 = vor.u32 %v8189_v46, %v6698_v45 }
 0x36f   : > { %3015 = vmatpush.bf16.msrb.mxu1 %v6791_v51  ;;  %2973 = vmatpush.bf16.msra.mxu2 %v6723_v5  ;;  %v6700_v51 = vld [vmem:[#allocation9 + $0x8] sm:$0xf0] }
 0x370   : > { %3001 = vmatpush.bf16.msrb.mxu0 %v6727_v6  ;;  %v6703_v52 = vor.u32 %v8188_v48, %v6700_v51  ;;  %v6930_v48 = vld [vmem:[#allocation9 + $0x2d0] sm:$0xf]  ;;  %v8279_v51 = vld [vmem:[#allocation9 + $0x2d4] sm:$0xf0] }
 0x372   : > { %2988 = vmatpush.bf16.msra.mxu3 %v6779_v60 }
 0x373   : > { %3016 = vmatpush.bf16.msrb.mxu1 %v6783_v63  ;;  %2974 = vmatpush.bf16.msra.mxu2 %v6715_v22  ;;  %v8282_v22 = vld [vmem:[#allocation9 + $0x2f4] sm:$0xf] }
 0x374   : > { %3002 = vmatpush.bf16.msrb.mxu0 %v6719_v26  ;;  %v6951_v31 = vor.u32 %v8282_v22, %v6948_v23  ;;  %v6858_v22 = vld [vmem:[#allocation9 + $0x240] sm:$0xf] }
 0x376   : > { %2989 = vmatpush.bf16.msra.mxu3 %v6771_v8 }
 0x377   : > { %3017 = vmatpush.bf16.msrb.mxu1 %v6775_v14  ;;  %2975 = vmatpush.bf16.msra.mxu2 %v6707_v41  ;;  %v8267_v41 = vld [vmem:[#allocation9 + $0x274] sm:$0xf0] }
 0x378   : > { %3003 = vmatpush.bf16.msrb.mxu0 %v6711_v42  ;;  %v8266_v42 = vld [vmem:[#allocation9 + $0x274] sm:$0xf] }
 0x37a   : > { %2990 = vmatpush.bf16.msra.mxu3 %v6763_v30 }
 0x37b   : > { %3018 = vmatpush.bf16.msrb.mxu1 %v6767_v32  ;;  %2976 = vmatpush.bf16.msra.mxu2 %v6699_v47  ;;  %v6938_v32 = vld [vmem:[#allocation9 + $0x2e0] sm:$0xf] }
 0x37c   : > { %3004 = vmatpush.bf16.msrb.mxu0 %v6703_v52  ;;  %v8278_v52 = vld [vmem:[#allocation9 + $0x2d4] sm:$0xf] }
 0x39a   : > { %v9374_v17 = vpop.f32.mrf.mxu0  ;;  %v9376_v18 = vpop.f32.mrf.mxu1 }
 0x39b   : > { %v2011_v55 = vadd.f32 %v9376_v18, %v9374_v17  ;;  %v2489_v18 = vperm.slane %v2486_v62, 1 }
 0x39f   : > { %v9378_v38 = vpop.f32.mrf.mxu2  ;;  %v9380_v39 = vpop.f32.mrf.mxu3 }
 0x3a0   : > { %v1983_v61 = vadd.f32 %v9380_v39, %v9378_v38 }
 0x3a2   : > { %v9382_v49 = vpop.f32.mrf.mxu0  ;;  %v9384_v50 = vpop.f32.mrf.mxu1 }
 0x3a3   : > { %v2013_v59 = vadd.f32 %v9384_v50, %v9382_v49 }
 0x3a7   : > { %v9386_v3 = vpop.f32.mrf.mxu2  ;;  %v9388_v20 = vpop.f32.mrf.mxu3 }
 0x3a8   : > { %v1985_v21 = vadd.f32 %v9388_v20, %v9386_v3 }
 0x3aa   : > { %v2212_v10 = vpop.f32.mrf.mxu0  ;;  %v2226_v11 = vpop.f32.mrf.mxu1 }
 0x3ab   : > { %v2213_v58 = vadd.f32 %v2212_v10, %v2011_v55  ;;  %v2488_v10 = vperm.slane %v2486_v62, 0 }
 0x3ad   : > { %v2227_v63 = vadd.f32 %v2226_v11, %v2213_v58  ;;  %v6946_v11 = vld [vmem:[#allocation9 + $0x2f0] sm:$0xf]  ;;  %v6874_v58 = vld [vmem:[#allocation9 + $0x260] sm:$0xf] }
 0x3ae   : > { %v6947_v30 = vor.u32 %v8283_v19, %v6946_v11  ;;  %v8274_v11 = vld [vmem:[#allocation9 + $0x2b4] sm:$0xf] }
 0x3af   : > { %v2184_v34 = vpop.f32.mrf.mxu2  ;;  %v2198_v35 = vpop.f32.mrf.mxu3 }
 0x3b0   : > { %v2185_v5 = vadd.f32 %v2184_v34, %v1983_v61  ;;  %v8281_v34 = vld [vmem:[#allocation9 + $0x2e4] sm:$0xf0]  ;;  %v6876_v61 = vld [vmem:[#allocation9 + $0x268] sm:$0xf0] }
 0x3b1   : > { %v6939_v46 = vor.u32 %v8281_v34, %v6938_v32  ;;  %v8273_v34 = vld [vmem:[#allocation9 + $0x2a4] sm:$0xf0] }
 0x3b2   : > { %v2214_v43 = vpop.f32.mrf.mxu0  ;;  %v2228_v44 = vpop.f32.mrf.mxu1  ;;  %v2199_v38 = vadd.f32 %v2198_v35, %v2185_v5  ;;  %v8280_v35 = vld [vmem:[#allocation9 + $0x2e4] sm:$0xf] }
 0x3b3   : > { %v2215_v0 = vadd.f32 %v2214_v43, %v2013_v59  ;;  %v6884_v43 = vld [vmem:[#allocation9 + $0x278] sm:$0xf0]  ;;  %v6943_v47 = vor.u32 %v8280_v35, %v6940_v36  ;;  %v8265_v59 = vld [vmem:[#allocation9 + $0x264] sm:$0xf0]  ;;  %v8276_v5 = vld [vmem:[#allocation9 + $0x2c4] sm:$0xf] }
 0x3b4   : > { %v8272_v35 = vld [vmem:[#allocation9 + $0x2a4] sm:$0xf]  ;;  %v6908_v36 = vld [vmem:[#allocation9 + $0x2a8] sm:$0xf0] }
 0x3b5   : > { %v2229_v7 = vadd.f32 %v2228_v44, %v2215_v0 }
 0x3b7   : > { %v2186_v53 = vpop.f32.mrf.mxu2  ;;  %v2200_v54 = vpop.f32.mrf.mxu3 }
 0x3b8   : > { %v2187_v39 = vadd.f32 %v2186_v53, %v1985_v21  ;;  %v6932_v53 = vld [vmem:[#allocation9 + $0x2d8] sm:$0xf0] }
 0x3b9   : > { %v6935_v0 = vor.u32 %v8278_v52, %v6932_v53  ;;  %v6898_v52 = vld [vmem:[#allocation9 + $0x290] sm:$0xf]  ;;  %v8271_v53 = vld [vmem:[#allocation9 + $0x294] sm:$0xf0] }
 0x3ba   : > { %v2201_v26 = vadd.f32 %v2200_v54, %v2187_v39 }
 0x3bb   : > { %v2463_v56 = vpop.f32.mrf.mxu0 }
 0x3bd   : > { %v2477_v57 = vpop.f32.mrf.mxu1 }
 0x3be   : > { %v2478_v60 = vadd.f32 %v2477_v57, %v2463_v56  ;;  %v6883_v56 = vor.u32 %v8267_v41, %v6882_v40  ;;  %v6887_v57 = vor.u32 %v8266_v42, %v6884_v43  ;;  %v6850_v41 = vld [vmem:[#allocation9 + $0x230] sm:$0xf]  ;;  %v8259_v43 = vld [vmem:[#allocation9 + $0x234] sm:$0xf0] }
 0x3c0   : > { %v2435_v1 = vpop.f32.mrf.mxu2  ;;  %v2449_v2 = vpop.f32.mrf.mxu3  ;;  %v2483_v17 = vadd.f32 %v2478_v60, %v2227_v63  ;;  %v8264_v60 = vld [vmem:[#allocation9 + $0x264] sm:$0xf]  ;;  %v6931_v63 = vor.u32 %v8279_v51, %v6930_v48  ;;  %v6911_v51 = vor.u32 %v8272_v35, %v6908_v36  ;;  %v7076_v35 = vld [vmem:[#allocation10 + $0x1f8] sm:$0xf0] }
 0x3c1   : > { %v2450_v6 = vadd.f32 %v2449_v2, %v2435_v1  ;;  %v6922_v1 = vld [vmem:[#allocation9 + $0x2c0] sm:$0xf]  ;;  %v8277_v2 = vld [vmem:[#allocation9 + $0x2c4] sm:$0xf0]  ;;  %v6879_v21 = vor.u32 %v8264_v60, %v6876_v61 }
 0x3c2   : > { %v2493_v25 = vadd.f32 %v2489_v18, %v2483_v17  ;;  %v6924_v17 = vld [vmem:[#allocation9 + $0x2c8] sm:$0xf0]  ;;  %v6923_v39 = vor.u32 %v8277_v2, %v6922_v1  ;;  %v6842_v60 = vld [vmem:[#allocation9 + $0x220] sm:$0xf]  ;;  %v6899_v2 = vor.u32 %v8271_v53, %v6898_v52  ;;  %v7012_v53 = vld [vmem:[#allocation10 + $0x178] sm:$0xf0] }
 0x3c3   : > { %v2465_v49 = vpop.f32.mrf.mxu0  ;;  %v2482_v9 = vadd.f32 %v2450_v6, %v2199_v38  ;;  %v6866_v6 = vld [vmem:[#allocation9 + $0x250] sm:$0xf] }
 0x3c4   : > { %v9401_v20 = vmax.f32 %v2493_v25, 0.0  ;;  %v6927_v25 = vor.u32 %v8276_v5, %v6924_v17  ;;  %v6890_v17 = vld [vmem:[#allocation9 + $0x280] sm:$0xf] }
 0x3c5   : > { %v2479_v50 = vpop.f32.mrf.mxu1  ;;  %v2492_v28 = vadd.f32 %v2488_v10, %v2482_v9  ;;  %v8275_v9 = vld [vmem:[#allocation9 + $0x2b4] sm:$0xf0] }
 0x3c6   : > { %v2480_v24 = vadd.f32 %v2479_v50, %v2465_v49  ;;  %v2501_v62 = vrot.slane %v9401_v20, 7  ;;  %v8263_v50 = vld [vmem:[#allocation9 + $0x254] sm:$0xf0]  ;;  %v2513_v1 = vrot.slane %v9401_v20, 1 }
 0x3c7   : > { %v9407_v44 = vmax.f32 %v2492_v28, 0.0  ;;  %v6860_v28 = vld [vmem:[#allocation9 + $0x248] sm:$0xf0] }
 0x3c8   : > { %v2485_v8 = vadd.f32 %v2480_v24, %v2229_v7  ;;  %v2437_v15 = vpop.f32.mrf.mxu2  ;;  %v2451_v16 = vpop.f32.mrf.mxu3  ;;  %v8262_v7 = vld [vmem:[#allocation9 + $0x254] sm:$0xf]  ;;  %v6868_v24 = vld [vmem:[#allocation9 + $0x258] sm:$0xf0] }
 0x3c9   : > { %v2452_v3 = vadd.f32 %v2451_v16, %v2437_v15  ;;  %v2500_v15 = vrot.slane %v9407_v44, 7  ;;  %v6867_v16 = vor.u32 %v8263_v50, %v6866_v6  ;;  %v6871_v19 = vor.u32 %v8262_v7, %v6868_v24  ;;  %v6834_v50 = vld [vmem:[#allocation9 + $0x210] sm:$0xf]  ;;  %v8255_v24 = vld [vmem:[#allocation9 + $0x214] sm:$0xf0] }
 0x3ca   : > { %v2495_v14 = vadd.f32 %v2489_v18, %v2485_v8  ;;  %v6875_v18 = vor.u32 %v8265_v59, %v6874_v58  ;;  %v6914_v8 = vld [vmem:[#allocation9 + $0x2b0] sm:$0xf]  ;;  %v6851_v58 = vor.u32 %v8259_v43, %v6850_v41  ;;  %v8344_v41 = vld [vmem:[#allocation10 + $0x1e4] sm:$0xf]  ;;  %v7068_v43 = vld [vmem:[#allocation10 + $0x1e8] sm:$0xf0] }
 0x3cb   : > { %v2484_v29 = vadd.f32 %v2452_v3, %v2201_v26  ;;  %v6915_v23 = vor.u32 %v8275_v9, %v6914_v8  ;;  %v8261_v26 = vld [vmem:[#allocation9 + $0x244] sm:$0xf0]  ;;  %v8260_v3 = vld [vmem:[#allocation9 + $0x244] sm:$0xf] }
 0x3cc   : > { %v9403_v27 = vmax.f32 %v2495_v14, 0.0  ;;  %v6916_v14 = vld [vmem:[#allocation9 + $0x2b8] sm:$0xf0]  ;;  %v6863_v40 = vor.u32 %v8260_v3, %v6860_v28 }
 0x3cd   : > { %v2494_v37 = vadd.f32 %v2488_v10, %v2484_v29 }
 0x3ce   : > { %v2559_v33 = vpack.c.bf16 %v9403_v27, %v9401_v20  ;;  %v2503_v54 = vrot.slane %v9403_v27, 7  ;;  %v8254_v20 = vld [vmem:[#allocation9 + $0x214] sm:$0xf] }
 0x3cf   : > { %v9409_v45 = vmax.f32 %v2494_v37, 0.0  ;;  %v6859_v37 = vor.u32 %v8261_v26, %v6858_v22  ;;  %v6828_v22 = vld [vmem:[#allocation9 + $0x208] sm:$0xf0] }
 0x3d0   : > { %2775 = vmatmul.bf16.vlgmr.msrb.gmra.mxu3 %v2559_v33  ;;  %2803 = vmatmul.bf16.vlgmr.msra.gmra.mxu1 %v2559_v33  ;;  %v2507_v49 = vsel %vm895_vm2, %v2503_v54, %v2501_v62  ;;  %v2505_v29 = vsel %vm895_vm2, %v2501_v62, %v2503_v54  ;;  %v8270_v54 = vld [vmem:[#allocation9 + $0x294] sm:$0xf]  ;;  %v8257_v62 = vld [vmem:[#allocation9 + $0x224] sm:$0xf0] }
 0x3d1   : > { %3234 = vmatpush.bf16.msrb.mxu3 %v6947_v30  ;;  %3262 = vmatpush.bf16.msra.mxu1 %v6951_v31  ;;  %v2558_v55 = vpack.c.bf16 %v9409_v45, %v9407_v44  ;;  %v2502_v38 = vrot.slane %v9409_v45, 7  ;;  %v2509_v10 = vmul.f32 %v9266_v12, %v2507_v49  ;;  %v6919_v30 = vor.u32 %v8274_v11, %v6916_v14  ;;  %v6906_v31 = vld [vmem:[#allocation9 + $0x2a0] sm:$0xf] }
 0x3d2   : > { %v6907_v48 = vor.u32 %v8273_v34, %v6906_v31  ;;  %v6843_v6 = vor.u32 %v8257_v62, %v6842_v60  ;;  %v6835_v11 = vor.u32 %v8255_v24, %v6834_v50  ;;  %v7074_v31 = vld [vmem:[#allocation10 + $0x1f0] sm:$0xf]  ;;  %v8329_v62 = vld [vmem:[#allocation10 + $0x164] sm:$0xf0]  ;;  %v8327_v50 = vld [vmem:[#allocation10 + $0x154] sm:$0xf0] }
 0x3d3   : > { %2761 = vmatmul.bf16.vlgmr.msrb.gmra.mxu2 %v2558_v55  ;;  %2789 = vmatmul.bf16.vlgmr.msra.gmra.mxu0 %v2558_v55  ;;  %v2506_v32 = vsel %vm895_vm2, %v2502_v38, %v2500_v15  ;;  %v2525_v33 = vpack.c.bf16 %v2505_v29, %v2509_v10  ;;  %v6900_v55 = vld [vmem:[#allocation9 + $0x298] sm:$0xf0]  ;;  %v2512_v10 = vrot.slane %v9407_v44, 1 }
 0x3d4   : > { %3220 = vmatpush.bf16.msrb.mxu2 %v6883_v56  ;;  %3248 = vmatpush.bf16.msra.mxu0 %v6887_v57  ;;  %v2508_v42 = vmul.f32 %v9266_v12, %v2506_v32  ;;  %v2515_v56 = vrot.slane %v9403_v27, 1  ;;  %v2504_v57 = vsel %vm895_vm2, %v2500_v15, %v2502_v38  ;;  %v6903_v5 = vor.u32 %v8270_v54, %v6900_v55  ;;  %v8269_v27 = vld [vmem:[#allocation9 + $0x284] sm:$0xf0]  ;;  %v6836_v38 = vld [vmem:[#allocation9 + $0x218] sm:$0xf0] }
 0x3d5   : > { %3235 = vmatpush.bf16.msrb.mxu3 %v6939_v46  ;;  %3263 = vmatpush.bf16.msra.mxu1 %v6943_v47  ;;  %v8258_v46 = vld [vmem:[#allocation9 + $0x234] sm:$0xf]  ;;  %v6852_v47 = vld [vmem:[#allocation9 + $0x238] sm:$0xf0]  ;;  %v6839_v14 = vor.u32 %v8254_v20, %v6836_v38  ;;  %v6826_v15 = vld [vmem:[#allocation9 + $0x200] sm:$0xf] }
 0x3d6   : > { %v6855_v59 = vor.u32 %v8258_v46, %v6852_v47  ;;  %v2524_v61 = vpack.c.bf16 %v2504_v57, %v2508_v42  ;;  %v2519_v7 = vsel %vm902_vm3, %v2515_v56, %v2513_v1  ;;  %v8347_v32 = vld [vmem:[#allocation10 + $0x1f4] sm:$0xf0]  ;;  %v7071_v46 = vor.u32 %v8344_v41, %v7068_v43  ;;  %v7010_v47 = vld [vmem:[#allocation10 + $0x170] sm:$0xf]  ;;  %v8342_v57 = vld [vmem:[#allocation10 + $0x1d4] sm:$0xf] }
 0x3d7   : > { %v2523_v9 = vmul.f32 %v9268_v13, %v2519_v7  ;;  %v7075_v34 = vor.u32 %v8347_v32, %v7074_v31  ;;  %v7058_v55 = vld [vmem:[#allocation10 + $0x1d0] sm:$0xf]  ;;  %v8326_v7 = vld [vmem:[#allocation10 + $0x154] sm:$0xf]  ;;  %v6996_v20 = vld [vmem:[#allocation10 + $0x158] sm:$0xf0] }
 0x3d8   : > { %3221 = vmatpush.bf16.msrb.mxu2 %v6875_v18  ;;  %3249 = vmatpush.bf16.msra.mxu0 %v6879_v21  ;;  %v8268_v18 = vld [vmem:[#allocation9 + $0x284] sm:$0xf]  ;;  %v6892_v21 = vld [vmem:[#allocation9 + $0x288] sm:$0xf0]  ;;  %v6999_v38 = vor.u32 %v8326_v7, %v6996_v20  ;;  %v8323_v31 = vld [vmem:[#allocation10 + $0x134] sm:$0xf0] }
 0x3d9   : > { %3236 = vmatpush.bf16.msrb.mxu3 %v6931_v63  ;;  %3264 = vmatpush.bf16.msra.mxu1 %v6935_v0  ;;  %v8256_v63 = vld [vmem:[#allocation9 + $0x224] sm:$0xf]  ;;  %v6844_v0 = vld [vmem:[#allocation9 + $0x228] sm:$0xf0]  ;;  %v6895_v8 = vor.u32 %v8268_v18, %v6892_v21  ;;  %v8322_v32 = vld [vmem:[#allocation10 + $0x134] sm:$0xf] }
 0x3da   : > { %v6847_v49 = vor.u32 %v8256_v63, %v6844_v0  ;;  %v8328_v63 = vld [vmem:[#allocation10 + $0x164] sm:$0xf]  ;;  %v7052_v21 = vld [vmem:[#allocation10 + $0x1c8] sm:$0xf0] }
 0x3db   : > { %v7196_v20 = vld [vmem:[#allocation10 + $0xe8] sm:$0xf0] }
 0x3dc   : > { %3222 = vmatpush.bf16.msrb.mxu2 %v6867_v16  ;;  %3250 = vmatpush.bf16.msra.mxu0 %v6871_v19  ;;  %v8253_v16 = vld [vmem:[#allocation9 + $0x204] sm:$0xf0]  ;;  %v8252_v19 = vld [vmem:[#allocation9 + $0x204] sm:$0xf] }
 0x3dd   : > { %3237 = vmatpush.bf16.msrb.mxu3 %v6923_v39  ;;  %3265 = vmatpush.bf16.msra.mxu1 %v6927_v25  ;;  %v2514_v39 = vrot.slane %v9409_v45, 1  ;;  %v6891_v25 = vor.u32 %v8269_v27, %v6890_v17  ;;  %v2517_v45 = vsel %vm902_vm3, %v2513_v1, %v2515_v56  ;;  %v6827_v44 = vor.u32 %v8253_v16, %v6826_v15  ;;  %v8343_v56 = vld [vmem:[#allocation10 + $0x1d4] sm:$0xf0]  ;;  %v7004_v1 = vld [vmem:[#allocation10 + $0x168] sm:$0xf0] }
 0x3de   : > { %v3026_v26 = vpack.c.bf16 %v2523_v9, %v2517_v45  ;;  %v6831_v3 = vor.u32 %v8252_v19, %v6828_v22  ;;  %v8341_v17 = vld [vmem:[#allocation10 + $0x1c4] sm:$0xf0]  ;;  %v8340_v27 = vld [vmem:[#allocation10 + $0x1c4] sm:$0xf]  ;;  %v6988_v22 = vld [vmem:[#allocation10 + $0x148] sm:$0xf0] }
 0x3df   : > { %v2516_v29 = vsel %vm902_vm3, %v2512_v10, %v2514_v39  ;;  %v8325_v15 = vld [vmem:[#allocation10 + $0x144] sm:$0xf0]  ;;  %v8324_v16 = vld [vmem:[#allocation10 + $0x144] sm:$0xf] }
 0x3e0   : > { %2991 = vmatmul.bf16.vlgmr.msra.gmra.mxu3 %v2525_v33  ;;  %3019 = vmatmul.bf16.vlgmr.msrb.gmra.mxu1 %v2525_v33  ;;  %v8346_v33 = vld [vmem:[#allocation10 + $0x1f4] sm:$0xf]  ;;  %v6991_v45 = vor.u32 %v8324_v16, %v6988_v22 }
 0x3e1   : > { %3238 = vmatpush.bf16.msrb.mxu3 %v6915_v23  ;;  %3266 = vmatpush.bf16.msra.mxu1 %v6919_v30  ;;  %v2518_v23 = vsel %vm902_vm3, %v2514_v39, %v2512_v10  ;;  %v7079_v36 = vor.u32 %v8346_v33, %v7076_v35  ;;  %v7042_v39 = vld [vmem:[#allocation10 + $0x1b0] sm:$0xf]  ;;  %v7044_v10 = vld [vmem:[#allocation10 + $0x1b8] sm:$0xf0]  ;;  %v8298_v16 = vld [vmem:[#allocation10 + $0x74] sm:$0xf] }
 0x3e2   : > { %3223 = vmatpush.bf16.msrb.mxu2 %v6859_v37  ;;  %3251 = vmatpush.bf16.msra.mxu0 %v6863_v40  ;;  %v2522_v28 = vmul.f32 %v9268_v13, %v2518_v23  ;;  %v7066_v37 = vld [vmem:[#allocation10 + $0x1e0] sm:$0xf]  ;;  %v8345_v40 = vld [vmem:[#allocation10 + $0x1e4] sm:$0xf0] }
 0x3e3   : > { %2977 = vmatmul.bf16.vlgmr.msra.gmra.mxu2 %v2524_v61  ;;  %3005 = vmatmul.bf16.vlgmr.msrb.gmra.mxu0 %v2524_v61  ;;  %v7067_v42 = vor.u32 %v8345_v40, %v7066_v37  ;;  %v7002_v61 = vld [vmem:[#allocation10 + $0x160] sm:$0xf]  ;;  %v8335_v37 = vld [vmem:[#allocation10 + $0x194] sm:$0xf0]  ;;  %v8334_v40 = vld [vmem:[#allocation10 + $0x194] sm:$0xf] }
 0x3e4   : > { %v3025_v30 = vpack.c.bf16 %v2522_v28, %v2516_v29  ;;  %v7003_v0 = vor.u32 %v8329_v62, %v7002_v61  ;;  %v7034_v23 = vld [vmem:[#allocation10 + $0x1a0] sm:$0xf]  ;;  %v7036_v28 = vld [vmem:[#allocation10 + $0x1a8] sm:$0xf0] }
 0x3e5   : > { %3239 = vmatpush.bf16.msrb.mxu3 %v6907_v48  ;;  %3267 = vmatpush.bf16.msra.mxu1 %v6911_v51  ;;  %v8331_v48 = vld [vmem:[#allocation10 + $0x174] sm:$0xf0]  ;;  %v8330_v51 = vld [vmem:[#allocation10 + $0x174] sm:$0xf] }
 0x3e6   : > { %3224 = vmatpush.bf16.msrb.mxu2 %v6851_v58  ;;  %3252 = vmatpush.bf16.msra.mxu0 %v6855_v59  ;;  %v7011_v52 = vor.u32 %v8331_v48, %v7010_v47  ;;  %v7015_v54 = vor.u32 %v8330_v51, %v7012_v53  ;;  %v7059_v58 = vor.u32 %v8343_v56, %v7058_v55  ;;  %v7060_v59 = vld [vmem:[#allocation10 + $0x1d8] sm:$0xf0]  ;;  %v8321_v47 = vld [vmem:[#allocation10 + $0x124] sm:$0xf0]  ;;  %v8320_v48 = vld [vmem:[#allocation10 + $0x124] sm:$0xf] }
 0x3e7   : > { %v7063_v60 = vor.u32 %v8342_v57, %v7060_v59  ;;  %v8333_v55 = vld [vmem:[#allocation10 + $0x184] sm:$0xf0]  ;;  %v8332_v56 = vld [vmem:[#allocation10 + $0x184] sm:$0xf]  ;;  %v7202_v59 = vld [vmem:[#allocation10 + $0xf0] sm:$0xf] }
 0x3e9   : > { %3240 = vmatpush.bf16.msrb.mxu3 %v6899_v2  ;;  %3268 = vmatpush.bf16.msra.mxu1 %v6903_v5  ;;  %v7007_v2 = vor.u32 %v8328_v63, %v7004_v1  ;;  %v7050_v5 = vld [vmem:[#allocation10 + $0x1c0] sm:$0xf]  ;;  %v8314_v63 = vld [vmem:[#allocation10 + $0xf4] sm:$0xf]  ;;  %v6962_v1 = vld [vmem:[#allocation10 + $0x110] sm:$0xf] }
 0x3ea   : > { %3225 = vmatpush.bf16.msrb.mxu2 %v6843_v6  ;;  %3253 = vmatpush.bf16.msra.mxu0 %v6847_v49  ;;  %v7051_v18 = vor.u32 %v8341_v17, %v7050_v5  ;;  %v7055_v6 = vor.u32 %v8340_v27, %v7052_v21  ;;  %v6994_v49 = vld [vmem:[#allocation10 + $0x150] sm:$0xf]  ;;  %v8319_v5 = vld [vmem:[#allocation10 + $0x114] sm:$0xf0]  ;;  %v8318_v17 = vld [vmem:[#allocation10 + $0x114] sm:$0xf] }
 0x3eb   : > { %v6995_v24 = vor.u32 %v8327_v50, %v6994_v49  ;;  %v6964_v27 = vld [vmem:[#allocation10 + $0x118] sm:$0xf0]  ;;  %v8313_v49 = vld [vmem:[#allocation10 + $0xe4] sm:$0xf0]  ;;  %v8312_v50 = vld [vmem:[#allocation10 + $0xe4] sm:$0xf] }
 0x3ec   : > { %v6967_v21 = vor.u32 %v8318_v17, %v6964_v27 }
 0x3ed   : > { %3241 = vmatpush.bf16.msrb.mxu3 %v6891_v25  ;;  %3269 = vmatpush.bf16.msra.mxu1 %v6895_v8  ;;  %v8339_v25 = vld [vmem:[#allocation10 + $0x1b4] sm:$0xf0]  ;;  %v8338_v8 = vld [vmem:[#allocation10 + $0x1b4] sm:$0xf] }
 0x3ee   : > { %3226 = vmatpush.bf16.msrb.mxu2 %v6835_v11  ;;  %3254 = vmatpush.bf16.msra.mxu0 %v6839_v14  ;;  %v7043_v9 = vor.u32 %v8339_v25, %v7042_v39  ;;  %v7047_v11 = vor.u32 %v8338_v8, %v7044_v10  ;;  %v6986_v14 = vld [vmem:[#allocation10 + $0x140] sm:$0xf]  ;;  %v8317_v39 = vld [vmem:[#allocation10 + $0x104] sm:$0xf0]  ;;  %v7199_v25 = vor.u32 %v8312_v50, %v7196_v20  ;;  %v6956_v10 = vld [vmem:[#allocation10 + $0x108] sm:$0xf0] }
 0x3ef   : > { %v6987_v19 = vor.u32 %v8325_v15, %v6986_v14  ;;  %v8299_v15 = vld [vmem:[#allocation10 + $0x74] sm:$0xf0]  ;;  %v8304_v20 = vld [vmem:[#allocation10 + $0xa4] sm:$0xf] }
 0x3f0   : > { %3242 = vmatmul.bf16.vlgmr.msrb.gmra.mxu3 %v3026_v26  ;;  %3270 = vmatmul.bf16.vlgmr.msra.gmra.mxu1 %v3026_v26  ;;  %v8337_v26 = vld [vmem:[#allocation10 + $0x1a4] sm:$0xf0] }
 0x3f1   : > { %3561 = vmatpush.bf16.msra.mxu3 %v7075_v34  ;;  %3589 = vmatpush.bf16.msrb.mxu1 %v7079_v36  ;;  %v6980_v34 = vld [vmem:[#allocation10 + $0x138] sm:$0xf0]  ;;  %v7026_v36 = vld [vmem:[#allocation10 + $0x190] sm:$0xf] }
 0x3f2   : > { %3227 = vmatpush.bf16.msrb.mxu2 %v6827_v44  ;;  %3255 = vmatpush.bf16.msra.mxu0 %v6831_v3  ;;  %v8336_v44 = vld [vmem:[#allocation10 + $0x1a4] sm:$0xf]  ;;  %v7035_v3 = vor.u32 %v8337_v26, %v7034_v23  ;;  %v6983_v35 = vor.u32 %v8322_v32, %v6980_v34  ;;  %v7027_v41 = vor.u32 %v8335_v37, %v7026_v36  ;;  %v7186_v23 = vld [vmem:[#allocation10 + $0xd0] sm:$0xf]  ;;  %v8311_v26 = vld [vmem:[#allocation10 + $0xd4] sm:$0xf0] }
 0x3f3   : > { %v7039_v29 = vor.u32 %v8336_v44, %v7036_v28  ;;  %v8310_v44 = vld [vmem:[#allocation10 + $0xd4] sm:$0xf]  ;;  %v7188_v28 = vld [vmem:[#allocation10 + $0xd8] sm:$0xf0]  ;;  %v8296_v32 = vld [vmem:[#allocation10 + $0x64] sm:$0xf] }
 0x3f4   : > { %v7132_v36 = vld [vmem:[#allocation10 + $0x68] sm:$0xf0] }
 0x3f5   : > { %3228 = vmatmul.bf16.vlgmr.msrb.gmra.mxu2 %v3025_v30  ;;  %3256 = vmatmul.bf16.vlgmr.msra.gmra.mxu0 %v3025_v30  ;;  %v6978_v30 = vld [vmem:[#allocation10 + $0x130] sm:$0xf]  ;;  %v7135_v37 = vor.u32 %v8296_v32, %v7132_v36  ;;  %v7100_v32 = vld [vmem:[#allocation10 + $0x28] sm:$0xf0]  ;;  %v7146_v36 = vld [vmem:[#allocation10 + $0x80] sm:$0xf] }
 0x3f6   : > { %3562 = vmatpush.bf16.msra.mxu3 %v7067_v42  ;;  %3590 = vmatpush.bf16.msrb.mxu1 %v7071_v46  ;;  %v6979_v33 = vor.u32 %v8323_v31, %v6978_v30  ;;  %v7028_v42 = vld [vmem:[#allocation10 + $0x198] sm:$0xf0]  ;;  %v6970_v46 = vld [vmem:[#allocation10 + $0x120] sm:$0xf]  ;;  %v8297_v31 = vld [vmem:[#allocation10 + $0x64] sm:$0xf0] }
 0x3f7   : > { %3547 = vmatpush.bf16.msra.mxu2 %v7011_v52  ;;  %3575 = vmatpush.bf16.msrb.mxu0 %v7015_v54  ;;  %v7031_v43 = vor.u32 %v8334_v40, %v7028_v42  ;;  %v6971_v51 = vor.u32 %v8321_v47, %v6970_v46  ;;  %v6972_v52 = vld [vmem:[#allocation10 + $0x128] sm:$0xf0]  ;;  %v7018_v54 = vld [vmem:[#allocation10 + $0x180] sm:$0xf]  ;;  %v8308_v42 = vld [vmem:[#allocation10 + $0xc4] sm:$0xf] }
 0x3f8   : > { %v6975_v53 = vor.u32 %v8320_v48, %v6972_v52  ;;  %v7019_v57 = vor.u32 %v8333_v55, %v7018_v54  ;;  %v7130_v30 = vld [vmem:[#allocation10 + $0x60] sm:$0xf]  ;;  %v7180_v47 = vld [vmem:[#allocation10 + $0xc8] sm:$0xf0]  ;;  %v8295_v52 = vld [vmem:[#allocation10 + $0x54] sm:$0xf0] }
 0x3f9   : > { %v7178_v40 = vld [vmem:[#allocation10 + $0xc0] sm:$0xf]  ;;  %v7183_v48 = vor.u32 %v8308_v42, %v7180_v47  ;;  %v8294_v54 = vld [vmem:[#allocation10 + $0x54] sm:$0xf]  ;;  %v7124_v55 = vld [vmem:[#allocation10 + $0x58] sm:$0xf0] }
 0x3fa   : > { %3563 = vmatpush.bf16.msra.mxu3 %v7059_v58  ;;  %3591 = vmatpush.bf16.msrb.mxu1 %v7063_v60  ;;  %v7020_v58 = vld [vmem:[#allocation10 + $0x188] sm:$0xf0]  ;;  %v8315_v60 = vld [vmem:[#allocation10 + $0xf4] sm:$0xf0]  ;;  %v7090_v47 = vld [vmem:[#allocation10 + $0x10] sm:$0xf] }
 0x3fb   : > { %3548 = vmatpush.bf16.msra.mxu2 %v7003_v0  ;;  %3576 = vmatpush.bf16.msrb.mxu0 %v7007_v2  ;;  %v7023_v61 = vor.u32 %v8332_v56, %v7020_v58  ;;  %v7203_v62 = vor.u32 %v8315_v60, %v7202_v59  ;;  %v7204_v0 = vld [vmem:[#allocation10 + $0xf8] sm:$0xf0]  ;;  %v7127_v56 = vor.u32 %v8294_v54, %v7124_v55  ;;  %v8307_v58 = vld [vmem:[#allocation10 + $0xb4] sm:$0xf0]  ;;  %v8306_v59 = vld [vmem:[#allocation10 + $0xb4] sm:$0xf] }
 0x3fc   : > { %v7207_v2 = vor.u32 %v8314_v63, %v7204_v0  ;;  %v7114_v0 = vld [vmem:[#allocation10 + $0x40] sm:$0xf]  ;;  %v7148_v42 = vld [vmem:[#allocation10 + $0x88] sm:$0xf0] }
 0x3fe   : > { %3564 = vmatpush.bf16.msra.mxu3 %v7051_v18  ;;  %3592 = vmatpush.bf16.msrb.mxu1 %v7055_v6  ;;  %v6963_v18 = vor.u32 %v8319_v5, %v6962_v1  ;;  %v7194_v6 = vld [vmem:[#allocation10 + $0xe0] sm:$0xf]  ;;  %v8293_v1 = vld [vmem:[#allocation10 + $0x44] sm:$0xf0] }
 0x3ff   : > { %3549 = vmatpush.bf16.msra.mxu2 %v6995_v24  ;;  %3577 = vmatpush.bf16.msrb.mxu0 %v6999_v38  ;;  %v7195_v24 = vor.u32 %v8313_v49, %v7194_v6  ;;  %v6954_v38 = vld [vmem:[#allocation10 + $0x100] sm:$0xf]  ;;  %v7115_v27 = vor.u32 %v8293_v1, %v7114_v0  ;;  %v8305_v49 = vld [vmem:[#allocation10 + $0xa4] sm:$0xf0] }
 0x400   : > { %v6955_v8 = vor.u32 %v8317_v39, %v6954_v38  ;;  %v7162_v6 = vld [vmem:[#allocation10 + $0xa0] sm:$0xf]  ;;  %v7164_v38 = vld [vmem:[#allocation10 + $0xa8] sm:$0xf0] }
 0x401   : > { %v7167_v39 = vor.u32 %v8304_v20, %v7164_v38  ;;  %v3280_v38 = vld [vmem:[%s9671_s16] sm:$0x3] }
 0x402   : > { %3565 = vmatpush.bf16.msra.mxu3 %v7043_v9  ;;  %3593 = vmatpush.bf16.msrb.mxu1 %v7047_v11  ;;  %v8316_v9 = vld [vmem:[#allocation10 + $0x104] sm:$0xf]  ;;  %v7138_v11 = vld [vmem:[#allocation10 + $0x70] sm:$0xf] }
 0x403   : > { %3550 = vmatpush.bf16.msra.mxu2 %v6987_v19  ;;  %3578 = vmatpush.bf16.msrb.mxu0 %v6991_v45  ;;  %v6959_v14 = vor.u32 %v8316_v9, %v6956_v10  ;;  %v7140_v19 = vld [vmem:[#allocation10 + $0x78] sm:$0xf0]  ;;  %v7139_v22 = vor.u32 %v8299_v15, %v7138_v11  ;;  %v8290_v9 = vld [vmem:[#allocation10 + $0x34] sm:$0xf]  ;;  %v7154_v15 = vld [vmem:[#allocation10 + $0x90] sm:$0xf] }
 0x404   : > { %v7143_v45 = vor.u32 %v8298_v16, %v7140_v19  ;;  %v7108_v11 = vld [vmem:[#allocation10 + $0x38] sm:$0xf0]  ;;  %v8303_v16 = vld [vmem:[#allocation10 + $0x94] sm:$0xf0]  ;;  %v8302_v19 = vld [vmem:[#allocation10 + $0x94] sm:$0xf] }
 0x406   : > { %3566 = vmatpush.bf16.msra.mxu3 %v7035_v3  ;;  %3594 = vmatpush.bf16.msrb.mxu1 %v7039_v29  ;;  %v7187_v3 = vor.u32 %v8311_v26, %v7186_v23  ;;  %v7191_v29 = vor.u32 %v8310_v44, %v7188_v28  ;;  %v7156_v23 = vld [vmem:[#allocation10 + $0x98] sm:$0xf0]  ;;  %v7098_v44 = vld [vmem:[#allocation10 + $0x20] sm:$0xf]  ;;  %v8288_v28 = vld [vmem:[#allocation10 + $0x24] sm:$0xf] }
 0x407   : > { %3551 = vmatpush.bf16.msra.mxu2 %v6979_v33  ;;  %3579 = vmatpush.bf16.msrb.mxu0 %v6983_v35  ;;  %v7131_v35 = vor.u32 %v8297_v31, %v7130_v30  ;;  %v7159_v26 = vor.u32 %v8302_v19, %v7156_v23 }
 0x40a   : > { %3567 = vmatpush.bf16.msra.mxu3 %v7027_v41  ;;  %3595 = vmatpush.bf16.msrb.mxu1 %v7031_v43  ;;  %v8309_v41 = vld [vmem:[#allocation10 + $0xc4] sm:$0xf0] }
 0x40b   : > { %3552 = vmatpush.bf16.msra.mxu2 %v6971_v51  ;;  %3580 = vmatpush.bf16.msrb.mxu0 %v6975_v53  ;;  %v7179_v46 = vor.u32 %v8309_v41, %v7178_v40  ;;  %v7122_v51 = vld [vmem:[#allocation10 + $0x50] sm:$0xf]  ;;  %v8300_v40 = vld [vmem:[#allocation10 + $0x84] sm:$0xf] }
 0x40c   : > { %v7123_v53 = vor.u32 %v8295_v52, %v7122_v51  ;;  %v8287_v51 = vld [vmem:[#allocation10 + $0x14] sm:$0xf0]  ;;  %v8286_v52 = vld [vmem:[#allocation10 + $0x14] sm:$0xf] }
 0x40d   : > { %v7091_v54 = vor.u32 %v8287_v51, %v7090_v47  ;;  %v8377_v47 = vld [vmem:[#allocation10 + $0x2e4] sm:$0xf0]  ;;  %v7324_v51 = vld [vmem:[#allocation10 + $0x2e8] sm:$0xf0] }
 0x40e   : > { %3568 = vmatpush.bf16.msra.mxu3 %v7019_v57  ;;  %3596 = vmatpush.bf16.msrb.mxu1 %v7023_v61  ;;  %v7170_v57 = vld [vmem:[#allocation10 + $0xb0] sm:$0xf] }
 0x40f   : > { %3553 = vmatpush.bf16.msra.mxu2 %v6963_v18  ;;  %3581 = vmatpush.bf16.msrb.mxu0 %v6967_v21  ;;  %v7171_v61 = vor.u32 %v8307_v58, %v7170_v57  ;;  %v7116_v18 = vld [vmem:[#allocation10 + $0x48] sm:$0xf0]  ;;  %v7082_v57 = vld [vmem:[#allocation10] sm:$0xf]  ;;  %v8285_v58 = vld [vmem:[#allocation10 + $0x4] sm:$0xf0] }
 0x412   : > { %3777 = vmatpush.bf16.msrb.mxu3 %v7203_v62  ;;  %3805 = vmatpush.bf16.msra.mxu1 %v7207_v2  ;;  %v7172_v62 = vld [vmem:[#allocation10 + $0xb8] sm:$0xf0]  ;;  %v8292_v2 = vld [vmem:[#allocation10 + $0x44] sm:$0xf] }
 0x413   : > { %3554 = vmatpush.bf16.msra.mxu2 %v6955_v8  ;;  %3582 = vmatpush.bf16.msrb.mxu0 %v6959_v14  ;;  %v7175_v63 = vor.u32 %v8306_v59, %v7172_v62  ;;  %v7119_v21 = vor.u32 %v8292_v2, %v7116_v18  ;;  %v8291_v8 = vld [vmem:[#allocation10 + $0x34] sm:$0xf0]  ;;  %v7111_v14 = vor.u32 %v8290_v9, %v7108_v11  ;;  %v8284_v62 = vld [vmem:[#allocation10 + $0x4] sm:$0xf] }
 0x416   : > { %3778 = vmatpush.bf16.msrb.mxu3 %v7195_v24  ;;  %3806 = vmatpush.bf16.msra.mxu1 %v7199_v25  ;;  %v7163_v24 = vor.u32 %v8305_v49, %v7162_v6  ;;  %v7106_v25 = vld [vmem:[#allocation10 + $0x30] sm:$0xf] }
 0x417   : > { %3763 = vmatpush.bf16.msrb.mxu2 %v7139_v22  ;;  %3791 = vmatpush.bf16.msra.mxu0 %v7143_v45  ;;  %v7107_v10 = vor.u32 %v8291_v8, %v7106_v25  ;;  %v7155_v45 = vor.u32 %v8303_v16, %v7154_v15 }
 0x41a   : > { %3779 = vmatpush.bf16.msrb.mxu3 %v7187_v3  ;;  %3807 = vmatpush.bf16.msra.mxu1 %v7191_v29  ;;  %v8289_v3 = vld [vmem:[#allocation10 + $0x24] sm:$0xf0] }
 0x41b   : > { %3764 = vmatpush.bf16.msrb.mxu2 %v7131_v35  ;;  %3792 = vmatpush.bf16.msra.mxu0 %v7135_v37  ;;  %v7099_v31 = vor.u32 %v8289_v3, %v7098_v44  ;;  %v7103_v35 = vor.u32 %v8288_v28, %v7100_v32  ;;  %v8301_v37 = vld [vmem:[#allocation10 + $0x84] sm:$0xf0]  ;;  %v8379_v3 = vld [vmem:[#allocation10 + $0x2f4] sm:$0xf0]  ;;  %v8378_v28 = vld [vmem:[#allocation10 + $0x2f4] sm:$0xf] }
 0x41c   : > { %v7147_v41 = vor.u32 %v8301_v37, %v7146_v36 }
 0x41e   : > { %3780 = vmatpush.bf16.msrb.mxu3 %v7179_v46  ;;  %3808 = vmatpush.bf16.msra.mxu1 %v7183_v48  ;;  %v7151_v46 = vor.u32 %v8300_v40, %v7148_v42  ;;  %v7322_v40 = vld [vmem:[#allocation10 + $0x2e0] sm:$0xf] }
 0x41f   : > { %3765 = vmatpush.bf16.msrb.mxu2 %v7123_v53  ;;  %3793 = vmatpush.bf16.msra.mxu0 %v7127_v56  ;;  %v7092_v53 = vld [vmem:[#allocation10 + $0x18] sm:$0xf0] }
 0x420   : > { %v7095_v55 = vor.u32 %v8286_v52, %v7092_v53  ;;  %v7266_v52 = vld [vmem:[#allocation10 + $0x270] sm:$0xf] }
 0x422   : > { %3781 = vmatpush.bf16.msrb.mxu3 %v7171_v61  ;;  %3809 = vmatpush.bf16.msra.mxu1 %v7175_v63  ;;  %v7083_v61 = vor.u32 %v8285_v58, %v7082_v57  ;;  %v7084_v63 = vld [vmem:[#allocation10 + $0x8] sm:$0xf0]  ;;  %v7323_v57 = vor.u32 %v8377_v47, %v7322_v40  ;;  %v8369_v47 = vld [vmem:[#allocation10 + $0x2a4] sm:$0xf0] }
 0x423   : > { %3766 = vmatpush.bf16.msrb.mxu2 %v7115_v27  ;;  %3794 = vmatpush.bf16.msra.mxu0 %v7119_v21  ;;  %v7087_v0 = vor.u32 %v8284_v62, %v7084_v63 }
 0x426   : > { %3782 = vmatpush.bf16.msrb.mxu3 %v7163_v24  ;;  %3810 = vmatpush.bf16.msra.mxu1 %v7167_v39 }
 0x427   : > { %3767 = vmatpush.bf16.msrb.mxu2 %v7107_v10  ;;  %3795 = vmatpush.bf16.msra.mxu0 %v7111_v14 }
 0x42a   : > { %3783 = vmatpush.bf16.msrb.mxu3 %v7155_v45  ;;  %3811 = vmatpush.bf16.msra.mxu1 %v7159_v26 }
 0x42b   : > { %3768 = vmatpush.bf16.msrb.mxu2 %v7099_v31  ;;  %3796 = vmatpush.bf16.msra.mxu0 %v7103_v35 }
 0x42e   : > { %3784 = vmatpush.bf16.msrb.mxu3 %v7147_v41  ;;  %3812 = vmatpush.bf16.msra.mxu1 %v7151_v46 }
 0x42f   : > { %3769 = vmatpush.bf16.msrb.mxu2 %v7091_v54  ;;  %3797 = vmatpush.bf16.msra.mxu0 %v7095_v55  ;;  %v8363_v54 = vld [vmem:[#allocation10 + $0x274] sm:$0xf0]  ;;  %v8362_v55 = vld [vmem:[#allocation10 + $0x274] sm:$0xf] }
 0x433   : > { %3770 = vmatpush.bf16.msrb.mxu2 %v7083_v61  ;;  %3798 = vmatpush.bf16.msra.mxu0 %v7087_v0  ;;  %v8375_v61 = vld [vmem:[#allocation10 + $0x2d4] sm:$0xf0]  ;;  %v8374_v0 = vld [vmem:[#allocation10 + $0x2d4] sm:$0xf] }
 0x44d   : > { %v9441_v7 = vpop.f32.mrf.mxu1 }
 0x450   : > { %v9445_v34 = vpop.f32.mrf.mxu0 }
 0x451   : > { %v2805_v18 = vadd.f32 %v9441_v7, %v9445_v34  ;;  %v3283_v34 = vperm.slane %v3280_v38, 1 }
 0x453   : > { %v9443_v33 = vpop.f32.mrf.mxu3 }
 0x455   : > { %v9447_v43 = vpop.f32.mrf.mxu1 }
 0x456   : > { %v9449_v60 = vpop.f32.mrf.mxu2 }
 0x457   : > { %v2777_v39 = vadd.f32 %v9443_v33, %v9449_v60  ;;  %v3282_v33 = vperm.slane %v3280_v38, 0  ;;  %v7330_v60 = vld [vmem:[#allocation10 + $0x2f0] sm:$0xf] }
 0x458   : > { %v9453_v17 = vpop.f32.mrf.mxu0  ;;  %v7331_v37 = vor.u32 %v8379_v3, %v7330_v60 }
 0x459   : > { %v2807_v49 = vadd.f32 %v9447_v43, %v9453_v17 }
 0x45b   : > { %v9451_v5 = vpop.f32.mrf.mxu3 }
 0x45d   : > { %v9455_v50 = vpop.f32.mrf.mxu1 }
 0x45e   : > { %v9457_v22 = vpop.f32.mrf.mxu2 }
 0x45f   : > { %v2779_v43 = vadd.f32 %v9451_v5, %v9457_v22 }
 0x460   : > { %v3006_v30 = vpop.f32.mrf.mxu0 }
 0x461   : > { %v3007_v6 = vadd.f32 %v3006_v30, %v2805_v18  ;;  %v7332_v30 = vld [vmem:[#allocation10 + $0x2f8] sm:$0xf0] }
 0x463   : > { %v2992_v29 = vpop.f32.mrf.mxu3  ;;  %v3021_v25 = vadd.f32 %v9455_v50, %v3007_v6 }
 0x465   : > { %v3022_v48 = vpop.f32.mrf.mxu1 }
 0x466   : > { %v2978_v56 = vpop.f32.mrf.mxu2 }
 0x467   : > { %v2979_v10 = vadd.f32 %v2978_v56, %v2777_v39  ;;  %v7268_v56 = vld [vmem:[#allocation10 + $0x278] sm:$0xf0] }
 0x468   : > { %v3008_v59 = vpop.f32.mrf.mxu0  ;;  %v7271_v18 = vor.u32 %v8362_v55, %v7268_v56  ;;  %v8355_v56 = vld [vmem:[#allocation10 + $0x234] sm:$0xf0] }
 0x469   : > { %v3009_v8 = vadd.f32 %v3008_v59, %v2807_v49  ;;  %v2993_v19 = vadd.f32 %v2992_v29, %v2979_v10  ;;  %v7335_v29 = vor.u32 %v8378_v28, %v7332_v30  ;;  %v7314_v59 = vld [vmem:[#allocation10 + $0x2d0] sm:$0xf]  ;;  %v8361_v49 = vld [vmem:[#allocation10 + $0x264] sm:$0xf0]  ;;  %v8372_v10 = vld [vmem:[#allocation10 + $0x2c4] sm:$0xf] }
 0x46a   : > { %v7315_v39 = vor.u32 %v8375_v61, %v7314_v59 }
 0x46b   : > { %v2994_v1 = vpop.f32.mrf.mxu3  ;;  %v3023_v17 = vadd.f32 %v3022_v48, %v3009_v8  ;;  %v8376_v48 = vld [vmem:[#allocation10 + $0x2e4] sm:$0xf]  ;;  %v7306_v8 = vld [vmem:[#allocation10 + $0x2c0] sm:$0xf] }
 0x46c   : > { %v7327_v58 = vor.u32 %v8376_v48, %v7324_v51  ;;  %v8368_v48 = vld [vmem:[#allocation10 + $0x2a4] sm:$0xf]  ;;  %v7292_v51 = vld [vmem:[#allocation10 + $0x2a8] sm:$0xf0] }
 0x46d   : > { %v3271_v2 = vpop.f32.mrf.mxu1  ;;  %v7295_v61 = vor.u32 %v8368_v48, %v7292_v51  ;;  %v7460_v48 = vld [vmem:[#allocation12 + $0x1f8] sm:$0xf0] }
 0x46e   : > { %v2980_v27 = vpop.f32.mrf.mxu2 }
 0x46f   : > { %v2981_v45 = vadd.f32 %v2980_v27, %v2779_v43  ;;  %v7267_v27 = vor.u32 %v8363_v54, %v7266_v52  ;;  %v7234_v54 = vld [vmem:[#allocation10 + $0x230] sm:$0xf] }
 0x471   : > { %v2995_v35 = vadd.f32 %v2994_v1, %v2981_v45  ;;  %v7316_v1 = vld [vmem:[#allocation10 + $0x2d8] sm:$0xf0] }
 0x472   : > { %v3257_v21 = vpop.f32.mrf.mxu0 }
 0x473   : > { %v3272_v24 = vadd.f32 %v3271_v2, %v3257_v21  ;;  %v3243_v20 = vpop.f32.mrf.mxu3  ;;  %v7258_v21 = vld [vmem:[#allocation10 + $0x260] sm:$0xf] }
 0x475   : > { %v3277_v7 = vadd.f32 %v3272_v24, %v3021_v25  ;;  %v3273_v11 = vpop.f32.mrf.mxu1  ;;  %v8360_v24 = vld [vmem:[#allocation10 + $0x264] sm:$0xf]  ;;  %v7319_v25 = vor.u32 %v8374_v0, %v7316_v1  ;;  %v7282_v0 = vld [vmem:[#allocation10 + $0x290] sm:$0xf]  ;;  %v8367_v1 = vld [vmem:[#allocation10 + $0x294] sm:$0xf0] }
 0x477   : > { %v3287_v23 = vadd.f32 %v3283_v34, %v3277_v7  ;;  %v7308_v7 = vld [vmem:[#allocation10 + $0x2c8] sm:$0xf0] }
 0x478   : > { %v3229_v9 = vpop.f32.mrf.mxu2 }
 0x479   : > { %v3244_v15 = vadd.f32 %v3243_v20, %v3229_v9  ;;  %v9471_v36 = vmax.f32 %v3287_v23, 0.0  ;;  %v7260_v20 = vld [vmem:[#allocation10 + $0x268] sm:$0xf0]  ;;  %v8373_v9 = vld [vmem:[#allocation10 + $0x2c4] sm:$0xf0]  ;;  %v7311_v23 = vor.u32 %v8372_v10, %v7308_v7 }
 0x47a   : > { %v3259_v14 = vpop.f32.mrf.mxu0  ;;  %v7307_v45 = vor.u32 %v8373_v9, %v7306_v8  ;;  %v7283_v9 = vor.u32 %v8367_v1, %v7282_v0  ;;  %v7274_v7 = vld [vmem:[#allocation10 + $0x280] sm:$0xf]  ;;  %v7396_v1 = vld [vmem:[#allocation12 + $0x178] sm:$0xf0] }
 0x47b   : > { %v3274_v16 = vadd.f32 %v3273_v11, %v3259_v14  ;;  %v3276_v50 = vadd.f32 %v3244_v15, %v2993_v19  ;;  %v3245_v31 = vpop.f32.mrf.mxu3  ;;  %v3295_v38 = vrot.slane %v9471_v36, 7  ;;  %v7263_v11 = vor.u32 %v8360_v24, %v7260_v20  ;;  %v7250_v14 = vld [vmem:[#allocation10 + $0x250] sm:$0xf]  ;;  %v8358_v15 = vld [vmem:[#allocation10 + $0x254] sm:$0xf] }
 0x47c   : > { %v7226_v24 = vld [vmem:[#allocation10 + $0x220] sm:$0xf]  ;;  %v3307_v8 = vrot.slane %v9471_v36, 1 }
 0x47d   : > { %v3279_v26 = vadd.f32 %v3274_v16, %v3023_v17  ;;  %v3286_v41 = vadd.f32 %v3282_v33, %v3276_v50  ;;  %v8359_v17 = vld [vmem:[#allocation10 + $0x254] sm:$0xf0]  ;;  %v7252_v16 = vld [vmem:[#allocation10 + $0x258] sm:$0xf0]  ;;  %v8370_v50 = vld [vmem:[#allocation10 + $0x2b4] sm:$0xf] }
 0x47e   : > { %v7251_v28 = vor.u32 %v8359_v17, %v7250_v14  ;;  %v7255_v30 = vor.u32 %v8358_v15, %v7252_v16  ;;  %v7218_v17 = vld [vmem:[#allocation10 + $0x210] sm:$0xf]  ;;  %v8351_v16 = vld [vmem:[#allocation10 + $0x214] sm:$0xf0] }
 0x47f   : > { %v3289_v44 = vadd.f32 %v3283_v34, %v3279_v26  ;;  %v9477_v62 = vmax.f32 %v3286_v41, 0.0  ;;  %v7259_v34 = vor.u32 %v8361_v49, %v7258_v21  ;;  %v7298_v26 = vld [vmem:[#allocation10 + $0x2b0] sm:$0xf]  ;;  %v7290_v41 = vld [vmem:[#allocation10 + $0x2a0] sm:$0xf] }
 0x480   : > { %v3231_v32 = vpop.f32.mrf.mxu2  ;;  %v7291_v59 = vor.u32 %v8369_v47, %v7290_v41  ;;  %v7458_v41 = vld [vmem:[#allocation12 + $0x1f0] sm:$0xf] }
 0x481   : > { %v9473_v5 = vmax.f32 %v3289_v44, 0.0  ;;  %v3246_v22 = vadd.f32 %v3245_v31, %v3231_v32  ;;  %v7300_v44 = vld [vmem:[#allocation10 + $0x2b8] sm:$0xf0]  ;;  %v3294_v3 = vrot.slane %v9477_v62, 7  ;;  %v7242_v31 = vld [vmem:[#allocation10 + $0x240] sm:$0xf] }
 0x482   : > { %v7303_v40 = vor.u32 %v8370_v50, %v7300_v44  ;;  %v7219_v50 = vor.u32 %v8351_v16, %v7218_v17  ;;  %v8423_v17 = vld [vmem:[#allocation12 + $0x154] sm:$0xf0] }
 0x483   : > { %v3278_v42 = vadd.f32 %v3246_v22, %v2995_v35  ;;  %v3353_v46 = vpack.c.bf16 %v9473_v5, %v9471_v36  ;;  %v3297_v2 = vrot.slane %v9473_v5, 7  ;;  %v8357_v35 = vld [vmem:[#allocation10 + $0x244] sm:$0xf0]  ;;  %v8356_v22 = vld [vmem:[#allocation10 + $0x244] sm:$0xf] }
 0x484   : > { %v7243_v52 = vor.u32 %v8357_v35, %v7242_v31  ;;  %v8350_v36 = vld [vmem:[#allocation10 + $0x214] sm:$0xf]  ;;  %v7212_v31 = vld [vmem:[#allocation10 + $0x208] sm:$0xf0] }
 0x485   : > { %v3288_v53 = vadd.f32 %v3282_v33, %v3278_v42  ;;  %3569 = vmatmul.bf16.vlgmr.msra.gmra.mxu3 %v3353_v46  ;;  %3597 = vmatmul.bf16.vlgmr.msrb.gmra.mxu1 %v3353_v46  ;;  %v3301_v43 = vsel %vm895_vm2, %v3297_v2, %v3295_v38  ;;  %v8371_v33 = vld [vmem:[#allocation10 + $0x2b4] sm:$0xf0] }
 0x486   : > { %4028 = vmatpush.bf16.msra.mxu3 %v7331_v37  ;;  %4056 = vmatpush.bf16.msrb.mxu1 %v7335_v29  ;;  %v3303_v60 = vmul.f32 %v9266_v12, %v3301_v43  ;;  %v7299_v32 = vor.u32 %v8371_v33, %v7298_v26  ;;  %v7244_v37 = vld [vmem:[#allocation10 + $0x248] sm:$0xf0]  ;;  %v3299_v29 = vsel %vm895_vm2, %v3295_v38, %v3297_v2  ;;  %v8366_v2 = vld [vmem:[#allocation10 + $0x294] sm:$0xf]  ;;  %v8353_v38 = vld [vmem:[#allocation10 + $0x224] sm:$0xf0] }
 0x487   : > { %v9479_v63 = vmax.f32 %v3288_v53, 0.0  ;;  %v7247_v53 = vor.u32 %v8356_v22, %v7244_v37  ;;  %v7227_v14 = vor.u32 %v8353_v38, %v7226_v24  ;;  %v8425_v38 = vld [vmem:[#allocation12 + $0x164] sm:$0xf0] }
 0x488   : > { %v3319_v46 = vpack.c.bf16 %v3299_v29, %v3303_v60  ;;  %v3306_v60 = vrot.slane %v9477_v62, 1 }
 0x489   : > { %v3352_v6 = vpack.c.bf16 %v9479_v63, %v9477_v62  ;;  %v3296_v19 = vrot.slane %v9479_v63, 7 }
 0x48a   : > { %4029 = vmatpush.bf16.msra.mxu3 %v7323_v57  ;;  %4057 = vmatpush.bf16.msrb.mxu1 %v7327_v58  ;;  %v8354_v57 = vld [vmem:[#allocation10 + $0x234] sm:$0xf]  ;;  %v7236_v58 = vld [vmem:[#allocation10 + $0x238] sm:$0xf0] }
 0x48b   : > { %3555 = vmatmul.bf16.vlgmr.msra.gmra.mxu2 %v3352_v6  ;;  %3583 = vmatmul.bf16.vlgmr.msrb.gmra.mxu0 %v3352_v6  ;;  %v3300_v42 = vsel %vm895_vm2, %v3296_v19, %v3294_v3  ;;  %v3298_v21 = vsel %vm895_vm2, %v3294_v3, %v3296_v19  ;;  %v7235_v6 = vor.u32 %v8355_v56, %v7234_v54  ;;  %v7220_v19 = vld [vmem:[#allocation10 + $0x218] sm:$0xf0]  ;;  %v7210_v3 = vld [vmem:[#allocation10 + $0x200] sm:$0xf]  ;;  %v8440_v54 = vld [vmem:[#allocation12 + $0x1e4] sm:$0xf] }
 0x48c   : > { %4014 = vmatpush.bf16.msra.mxu2 %v7267_v27  ;;  %4042 = vmatpush.bf16.msrb.mxu0 %v7271_v18  ;;  %v3302_v55 = vmul.f32 %v9266_v12, %v3300_v42  ;;  %v7284_v27 = vld [vmem:[#allocation10 + $0x298] sm:$0xf0]  ;;  %v3309_v18 = vrot.slane %v9473_v5, 1  ;;  %v7239_v49 = vor.u32 %v8354_v57, %v7236_v58  ;;  %v8365_v5 = vld [vmem:[#allocation10 + $0x284] sm:$0xf0]  ;;  %v7223_v44 = vor.u32 %v8350_v36, %v7220_v19 }
 0x48d   : > { %v7287_v10 = vor.u32 %v8366_v2, %v7284_v27  ;;  %v8443_v42 = vld [vmem:[#allocation12 + $0x1f4] sm:$0xf0]  ;;  %v7452_v56 = vld [vmem:[#allocation12 + $0x1e8] sm:$0xf0]  ;;  %v7394_v58 = vld [vmem:[#allocation12 + $0x170] sm:$0xf] }
 0x48e   : > { %4030 = vmatpush.bf16.msra.mxu3 %v7315_v39  ;;  %4058 = vmatpush.bf16.msrb.mxu1 %v7319_v25  ;;  %v3318_v20 = vpack.c.bf16 %v3298_v21, %v3302_v55  ;;  %v8352_v39 = vld [vmem:[#allocation10 + $0x224] sm:$0xf]  ;;  %v7228_v25 = vld [vmem:[#allocation10 + $0x228] sm:$0xf0]  ;;  %v3313_v15 = vsel %vm902_vm3, %v3309_v18, %v3307_v8  ;;  %v7459_v47 = vor.u32 %v8443_v42, %v7458_v41  ;;  %v7442_v27 = vld [vmem:[#allocation12 + $0x1d0] sm:$0xf] }
 0x48f   : > { %v7231_v43 = vor.u32 %v8352_v39, %v7228_v25  ;;  %v3317_v33 = vmul.f32 %v9268_v13, %v3313_v15  ;;  %v7455_v57 = vor.u32 %v8440_v54, %v7452_v56  ;;  %v8438_v21 = vld [vmem:[#allocation12 + $0x1d4] sm:$0xf]  ;;  %v8424_v39 = vld [vmem:[#allocation12 + $0x164] sm:$0xf]  ;;  %v7380_v36 = vld [vmem:[#allocation12 + $0x158] sm:$0xf0] }
 0x490   : > { %4015 = vmatpush.bf16.msra.mxu2 %v7259_v34  ;;  %4043 = vmatpush.bf16.msrb.mxu0 %v7263_v11  ;;  %v8364_v34 = vld [vmem:[#allocation10 + $0x284] sm:$0xf]  ;;  %v7276_v11 = vld [vmem:[#allocation10 + $0x288] sm:$0xf0]  ;;  %v8422_v15 = vld [vmem:[#allocation12 + $0x154] sm:$0xf] }
 0x491   : > { %v7279_v26 = vor.u32 %v8364_v34, %v7276_v11  ;;  %v7436_v11 = vld [vmem:[#allocation12 + $0x1c8] sm:$0xf0]  ;;  %v7383_v19 = vor.u32 %v8422_v15, %v7380_v36  ;;  %v8419_v41 = vld [vmem:[#allocation12 + $0x134] sm:$0xf0]  ;;  %v8418_v42 = vld [vmem:[#allocation12 + $0x134] sm:$0xf] }
 0x492   : > { %4031 = vmatpush.bf16.msra.mxu3 %v7307_v45  ;;  %4059 = vmatpush.bf16.msrb.mxu1 %v7311_v23  ;;  %v3308_v45 = vrot.slane %v9479_v63, 1  ;;  %v7275_v23 = vor.u32 %v8365_v5, %v7274_v7  ;;  %v3311_v63 = vsel %vm902_vm3, %v3307_v8, %v3309_v18  ;;  %v8439_v18 = vld [vmem:[#allocation12 + $0x1d4] sm:$0xf0]  ;;  %v7388_v8 = vld [vmem:[#allocation12 + $0x168] sm:$0xf0] }
 0x493   : > { %v3820_v35 = vpack.c.bf16 %v3317_v33, %v3311_v63  ;;  %v8437_v7 = vld [vmem:[#allocation12 + $0x1c4] sm:$0xf0]  ;;  %v8436_v5 = vld [vmem:[#allocation12 + $0x1c4] sm:$0xf]  ;;  %v7580_v36 = vld [vmem:[#allocation12 + $0xe8] sm:$0xf0] }
 0x494   : > { %4016 = vmatpush.bf16.msra.mxu2 %v7251_v28  ;;  %4044 = vmatpush.bf16.msrb.mxu0 %v7255_v30  ;;  %v8349_v28 = vld [vmem:[#allocation10 + $0x204] sm:$0xf0]  ;;  %v8348_v30 = vld [vmem:[#allocation10 + $0x204] sm:$0xf]  ;;  %v3310_v29 = vsel %vm902_vm3, %v3306_v60, %v3308_v45 }
 0x495   : > { %3785 = vmatmul.bf16.vlgmr.msrb.gmra.mxu3 %v3319_v46  ;;  %3813 = vmatmul.bf16.vlgmr.msra.gmra.mxu1 %v3319_v46  ;;  %v7211_v62 = vor.u32 %v8349_v28, %v7210_v3  ;;  %v7215_v22 = vor.u32 %v8348_v30, %v7212_v31  ;;  %v8442_v46 = vld [vmem:[#allocation12 + $0x1f4] sm:$0xf]  ;;  %v8421_v3 = vld [vmem:[#allocation12 + $0x144] sm:$0xf0]  ;;  %v8420_v28 = vld [vmem:[#allocation12 + $0x144] sm:$0xf] }
 0x496   : > { %4032 = vmatpush.bf16.msra.mxu3 %v7299_v32  ;;  %4060 = vmatpush.bf16.msrb.mxu1 %v7303_v40  ;;  %v3312_v32 = vsel %vm902_vm3, %v3308_v45, %v3306_v60  ;;  %v7463_v51 = vor.u32 %v8442_v46, %v7460_v48  ;;  %v7426_v45 = vld [vmem:[#allocation12 + $0x1b0] sm:$0xf]  ;;  %v7428_v60 = vld [vmem:[#allocation12 + $0x1b8] sm:$0xf0]  ;;  %v7372_v31 = vld [vmem:[#allocation12 + $0x148] sm:$0xf0] }
 0x497   : > { %v3316_v37 = vmul.f32 %v9268_v13, %v3312_v32  ;;  %v7375_v63 = vor.u32 %v8420_v28, %v7372_v31  ;;  %v7418_v32 = vld [vmem:[#allocation12 + $0x1a0] sm:$0xf]  ;;  %v8394_v28 = vld [vmem:[#allocation12 + $0x74] sm:$0xf] }
 0x498   : > { %4017 = vmatpush.bf16.msra.mxu2 %v7243_v52  ;;  %4045 = vmatpush.bf16.msrb.mxu0 %v7247_v53  ;;  %v7450_v52 = vld [vmem:[#allocation12 + $0x1e0] sm:$0xf]  ;;  %v8441_v53 = vld [vmem:[#allocation12 + $0x1e4] sm:$0xf0] }
 0x499   : > { %v3819_v40 = vpack.c.bf16 %v3316_v37, %v3310_v29  ;;  %v7451_v55 = vor.u32 %v8441_v53, %v7450_v52  ;;  %v7420_v37 = vld [vmem:[#allocation12 + $0x1a8] sm:$0xf0]  ;;  %v8431_v52 = vld [vmem:[#allocation12 + $0x194] sm:$0xf0]  ;;  %v8430_v53 = vld [vmem:[#allocation12 + $0x194] sm:$0xf] }
 0x49a   : > { %4033 = vmatpush.bf16.msra.mxu3 %v7291_v59  ;;  %4061 = vmatpush.bf16.msrb.mxu1 %v7295_v61  ;;  %v8427_v59 = vld [vmem:[#allocation12 + $0x174] sm:$0xf0]  ;;  %v8426_v61 = vld [vmem:[#allocation12 + $0x174] sm:$0xf] }
 0x49b   : > { %3771 = vmatmul.bf16.vlgmr.msrb.gmra.mxu2 %v3318_v20  ;;  %3799 = vmatmul.bf16.vlgmr.msra.gmra.mxu0 %v3318_v20  ;;  %v7395_v0 = vor.u32 %v8427_v59, %v7394_v58  ;;  %v7399_v2 = vor.u32 %v8426_v61, %v7396_v1  ;;  %v7386_v20 = vld [vmem:[#allocation12 + $0x160] sm:$0xf]  ;;  %v8417_v58 = vld [vmem:[#allocation12 + $0x124] sm:$0xf0]  ;;  %v8416_v59 = vld [vmem:[#allocation12 + $0x124] sm:$0xf] }
 0x49c   : > { %4018 = vmatpush.bf16.msra.mxu2 %v7235_v6  ;;  %4046 = vmatpush.bf16.msrb.mxu0 %v7239_v49  ;;  %v7443_v6 = vor.u32 %v8439_v18, %v7442_v27  ;;  %v7444_v49 = vld [vmem:[#allocation12 + $0x1d8] sm:$0xf0]  ;;  %v7387_v25 = vor.u32 %v8425_v38, %v7386_v20  ;;  %v8429_v27 = vld [vmem:[#allocation12 + $0x184] sm:$0xf0]  ;;  %v8428_v18 = vld [vmem:[#allocation12 + $0x184] sm:$0xf] }
 0x49d   : > { %v7447_v24 = vor.u32 %v8438_v21, %v7444_v49  ;;  %v7586_v49 = vld [vmem:[#allocation12 + $0xf0] sm:$0xf] }
 0x49e   : > { %4034 = vmatpush.bf16.msra.mxu3 %v7283_v9  ;;  %4062 = vmatpush.bf16.msrb.mxu1 %v7287_v10  ;;  %v7391_v9 = vor.u32 %v8424_v39, %v7388_v8  ;;  %v7434_v10 = vld [vmem:[#allocation12 + $0x1c0] sm:$0xf]  ;;  %v8410_v39 = vld [vmem:[#allocation12 + $0xf4] sm:$0xf]  ;;  %v7346_v8 = vld [vmem:[#allocation12 + $0x110] sm:$0xf] }
 0x49f   : > { %v7435_v34 = vor.u32 %v8437_v7, %v7434_v10  ;;  %v8415_v10 = vld [vmem:[#allocation12 + $0x114] sm:$0xf0]  ;;  %v8414_v7 = vld [vmem:[#allocation12 + $0x114] sm:$0xf] }
 0x4a0   : > { %4019 = vmatpush.bf16.msra.mxu2 %v7227_v14  ;;  %4047 = vmatpush.bf16.msrb.mxu0 %v7231_v43  ;;  %v7439_v14 = vor.u32 %v8436_v5, %v7436_v11  ;;  %v7378_v43 = vld [vmem:[#allocation12 + $0x150] sm:$0xf]  ;;  %v7348_v5 = vld [vmem:[#allocation12 + $0x118] sm:$0xf0] }
 0x4a1   : > { %v7379_v16 = vor.u32 %v8423_v17, %v7378_v43  ;;  %v7351_v11 = vor.u32 %v8414_v7, %v7348_v5  ;;  %v8409_v43 = vld [vmem:[#allocation12 + $0xe4] sm:$0xf0]  ;;  %v8408_v17 = vld [vmem:[#allocation12 + $0xe4] sm:$0xf] }
 0x4a2   : > { %4035 = vmatpush.bf16.msra.mxu3 %v7275_v23  ;;  %4063 = vmatpush.bf16.msrb.mxu1 %v7279_v26  ;;  %v8435_v23 = vld [vmem:[#allocation12 + $0x1b4] sm:$0xf0]  ;;  %v8434_v26 = vld [vmem:[#allocation12 + $0x1b4] sm:$0xf] }
 0x4a3   : > { %v7427_v33 = vor.u32 %v8435_v23, %v7426_v45  ;;  %v8413_v45 = vld [vmem:[#allocation12 + $0x104] sm:$0xf0]  ;;  %v7583_v23 = vor.u32 %v8408_v17, %v7580_v36  ;;  %v8400_v36 = vld [vmem:[#allocation12 + $0xa4] sm:$0xf] }
 0x4a4   : > { %4020 = vmatpush.bf16.msra.mxu2 %v7219_v50  ;;  %4048 = vmatpush.bf16.msrb.mxu0 %v7223_v44  ;;  %v7431_v50 = vor.u32 %v8434_v26, %v7428_v60  ;;  %v7370_v44 = vld [vmem:[#allocation12 + $0x140] sm:$0xf]  ;;  %v7340_v60 = vld [vmem:[#allocation12 + $0x108] sm:$0xf0] }
 0x4a5   : > { %4036 = vmatmul.bf16.vlgmr.msra.gmra.mxu3 %v3820_v35  ;;  %4064 = vmatmul.bf16.vlgmr.msrb.gmra.mxu1 %v3820_v35  ;;  %v7371_v30 = vor.u32 %v8421_v3, %v7370_v44  ;;  %v8433_v35 = vld [vmem:[#allocation12 + $0x1a4] sm:$0xf0]  ;;  %v8395_v3 = vld [vmem:[#allocation12 + $0x74] sm:$0xf0] }
 0x4a6   : > { %4355 = vmatpush.bf16.msrb.mxu3 %v7459_v47  ;;  %4383 = vmatpush.bf16.msra.mxu1 %v7463_v51  ;;  %v7364_v47 = vld [vmem:[#allocation12 + $0x138] sm:$0xf0]  ;;  %v7410_v51 = vld [vmem:[#allocation12 + $0x190] sm:$0xf] }
 0x4a7   : > { %v7367_v48 = vor.u32 %v8418_v42, %v7364_v47  ;;  %v7411_v54 = vor.u32 %v8431_v52, %v7410_v51  ;;  %v8392_v42 = vld [vmem:[#allocation12 + $0x64] sm:$0xf]  ;;  %v7516_v51 = vld [vmem:[#allocation12 + $0x68] sm:$0xf0] }
 0x4a8   : > { %4021 = vmatpush.bf16.msra.mxu2 %v7211_v62  ;;  %4049 = vmatpush.bf16.msrb.mxu0 %v7215_v22  ;;  %v8432_v62 = vld [vmem:[#allocation12 + $0x1a4] sm:$0xf]  ;;  %v7419_v22 = vor.u32 %v8433_v35, %v7418_v32  ;;  %v7570_v32 = vld [vmem:[#allocation12 + $0xd0] sm:$0xf]  ;;  %v8407_v35 = vld [vmem:[#allocation12 + $0xd4] sm:$0xf0]  ;;  %v7519_v52 = vor.u32 %v8392_v42, %v7516_v51 }
 0x4a9   : > { %v7423_v29 = vor.u32 %v8432_v62, %v7420_v37  ;;  %v8406_v62 = vld [vmem:[#allocation12 + $0xd4] sm:$0xf]  ;;  %v7572_v37 = vld [vmem:[#allocation12 + $0xd8] sm:$0xf0]  ;;  %v7484_v42 = vld [vmem:[#allocation12 + $0x28] sm:$0xf0] }
 0x4aa   : > { %4356 = vmatpush.bf16.msrb.mxu3 %v7451_v55  ;;  %4384 = vmatpush.bf16.msra.mxu1 %v7455_v57  ;;  %v7412_v55 = vld [vmem:[#allocation12 + $0x198] sm:$0xf0]  ;;  %v7354_v57 = vld [vmem:[#allocation12 + $0x120] sm:$0xf] }
 0x4ab   : > { %4022 = vmatmul.bf16.vlgmr.msra.gmra.mxu2 %v3819_v40  ;;  %4050 = vmatmul.bf16.vlgmr.msrb.gmra.mxu0 %v3819_v40  ;;  %v7362_v40 = vld [vmem:[#allocation12 + $0x130] sm:$0xf]  ;;  %v7415_v56 = vor.u32 %v8430_v53, %v7412_v55  ;;  %v7355_v61 = vor.u32 %v8417_v58, %v7354_v57  ;;  %v7562_v53 = vld [vmem:[#allocation12 + $0xc0] sm:$0xf]  ;;  %v8404_v55 = vld [vmem:[#allocation12 + $0xc4] sm:$0xf] }
 0x4ac   : > { %4341 = vmatpush.bf16.msrb.mxu2 %v7395_v0  ;;  %4369 = vmatpush.bf16.msra.mxu0 %v7399_v2  ;;  %v7363_v46 = vor.u32 %v8419_v41, %v7362_v40  ;;  %v7356_v0 = vld [vmem:[#allocation12 + $0x128] sm:$0xf0]  ;;  %v7402_v2 = vld [vmem:[#allocation12 + $0x180] sm:$0xf]  ;;  %v8393_v41 = vld [vmem:[#allocation12 + $0x64] sm:$0xf0] }
 0x4ad   : > { %v7359_v1 = vor.u32 %v8416_v59, %v7356_v0  ;;  %v7403_v21 = vor.u32 %v8429_v27, %v7402_v2  ;;  %v7514_v40 = vld [vmem:[#allocation12 + $0x60] sm:$0xf]  ;;  %v7564_v58 = vld [vmem:[#allocation12 + $0xc8] sm:$0xf0]  ;;  %v8391_v0 = vld [vmem:[#allocation12 + $0x54] sm:$0xf0] }
 0x4ae   : > { %4357 = vmatpush.bf16.msrb.mxu3 %v7443_v6  ;;  %4385 = vmatpush.bf16.msra.mxu1 %v7447_v24  ;;  %v7404_v6 = vld [vmem:[#allocation12 + $0x188] sm:$0xf0]  ;;  %v8411_v24 = vld [vmem:[#allocation12 + $0xf4] sm:$0xf0]  ;;  %v7567_v59 = vor.u32 %v8404_v55, %v7564_v58  ;;  %v8390_v2 = vld [vmem:[#allocation12 + $0x54] sm:$0xf] }
 0x4af   : > { %v7407_v20 = vor.u32 %v8428_v18, %v7404_v6  ;;  %v7587_v38 = vor.u32 %v8411_v24, %v7586_v49  ;;  %v7508_v27 = vld [vmem:[#allocation12 + $0x58] sm:$0xf0]  ;;  %v8403_v6 = vld [vmem:[#allocation12 + $0xb4] sm:$0xf0]  ;;  %v8402_v49 = vld [vmem:[#allocation12 + $0xb4] sm:$0xf] }
 0x4b0   : > { %4342 = vmatpush.bf16.msrb.mxu2 %v7387_v25  ;;  %4370 = vmatpush.bf16.msra.mxu0 %v7391_v9  ;;  %v7588_v25 = vld [vmem:[#allocation12 + $0xf8] sm:$0xf0]  ;;  %v7511_v18 = vor.u32 %v8390_v2, %v7508_v27  ;;  %v7530_v51 = vld [vmem:[#allocation12 + $0x80] sm:$0xf]  ;;  %v7532_v55 = vld [vmem:[#allocation12 + $0x88] sm:$0xf0] }
 0x4b1   : > { %v7591_v9 = vor.u32 %v8410_v39, %v7588_v25  ;;  %v7498_v25 = vld [vmem:[#allocation12 + $0x40] sm:$0xf]  ;;  %v7474_v58 = vld [vmem:[#allocation12 + $0x10] sm:$0xf] }
 0x4b2   : > { %4358 = vmatpush.bf16.msrb.mxu3 %v7435_v34  ;;  %4386 = vmatpush.bf16.msra.mxu1 %v7439_v14  ;;  %v7347_v34 = vor.u32 %v8415_v10, %v7346_v8  ;;  %v7578_v14 = vld [vmem:[#allocation12 + $0xe0] sm:$0xf]  ;;  %v8389_v8 = vld [vmem:[#allocation12 + $0x44] sm:$0xf0] }
 0x4b3   : > { %v7499_v5 = vor.u32 %v8389_v8, %v7498_v25 }
 0x4b4   : > { %4343 = vmatpush.bf16.msrb.mxu2 %v7379_v16  ;;  %4371 = vmatpush.bf16.msra.mxu0 %v7383_v19  ;;  %v7579_v16 = vor.u32 %v8409_v43, %v7578_v14  ;;  %v7338_v19 = vld [vmem:[#allocation12 + $0x100] sm:$0xf]  ;;  %v8401_v43 = vld [vmem:[#allocation12 + $0xa4] sm:$0xf0] }
 0x4b5   : > { %v7339_v26 = vor.u32 %v8413_v45, %v7338_v19  ;;  %v7546_v14 = vld [vmem:[#allocation12 + $0xa0] sm:$0xf]  ;;  %v7548_v19 = vld [vmem:[#allocation12 + $0xa8] sm:$0xf0] }
 0x4b6   : > { %4359 = vmatpush.bf16.msrb.mxu3 %v7427_v33  ;;  %4387 = vmatpush.bf16.msra.mxu1 %v7431_v50  ;;  %v8412_v33 = vld [vmem:[#allocation12 + $0x104] sm:$0xf]  ;;  %v7522_v50 = vld [vmem:[#allocation12 + $0x70] sm:$0xf]  ;;  %v7551_v45 = vor.u32 %v8400_v36, %v7548_v19  ;;  %v4074_v19 = vld [vmem:[%s9709_s0] sm:$0x3] }
 0x4b7   : > { %v7343_v44 = vor.u32 %v8412_v33, %v7340_v60  ;;  %v7523_v31 = vor.u32 %v8395_v3, %v7522_v50  ;;  %v8386_v33 = vld [vmem:[#allocation12 + $0x34] sm:$0xf]  ;;  %v7492_v50 = vld [vmem:[#allocation12 + $0x38] sm:$0xf0]  ;;  %v7538_v3 = vld [vmem:[#allocation12 + $0x90] sm:$0xf] }
 0x4b8   : > { %4344 = vmatpush.bf16.msrb.mxu2 %v7371_v30  ;;  %4372 = vmatpush.bf16.msra.mxu0 %v7375_v63  ;;  %v7524_v30 = vld [vmem:[#allocation12 + $0x78] sm:$0xf0] }
 0x4b9   : > { %v7527_v63 = vor.u32 %v8394_v28, %v7524_v30  ;;  %v8399_v28 = vld [vmem:[#allocation12 + $0x94] sm:$0xf0]  ;;  %v8398_v30 = vld [vmem:[#allocation12 + $0x94] sm:$0xf] }
 0x4ba   : > { %4360 = vmatpush.bf16.msrb.mxu3 %v7419_v22  ;;  %4388 = vmatpush.bf16.msra.mxu1 %v7423_v29  ;;  %v7571_v22 = vor.u32 %v8407_v35, %v7570_v32  ;;  %v7575_v29 = vor.u32 %v8406_v62, %v7572_v37  ;;  %v7540_v32 = vld [vmem:[#allocation12 + $0x98] sm:$0xf0]  ;;  %v7482_v62 = vld [vmem:[#allocation12 + $0x20] sm:$0xf]  ;;  %v8384_v37 = vld [vmem:[#allocation12 + $0x24] sm:$0xf] }
 0x4bb   : > { %v7543_v35 = vor.u32 %v8398_v30, %v7540_v32 }
 0x4bc   : > { %4345 = vmatpush.bf16.msrb.mxu2 %v7363_v46  ;;  %4373 = vmatpush.bf16.msra.mxu0 %v7367_v48  ;;  %v7515_v48 = vor.u32 %v8393_v41, %v7514_v40 }
 0x4be   : > { %4361 = vmatpush.bf16.msrb.mxu3 %v7411_v54  ;;  %4389 = vmatpush.bf16.msra.mxu1 %v7415_v56  ;;  %v8405_v54 = vld [vmem:[#allocation12 + $0xc4] sm:$0xf0] }
 0x4bf   : > { %v7563_v57 = vor.u32 %v8405_v54, %v7562_v53  ;;  %v8396_v53 = vld [vmem:[#allocation12 + $0x84] sm:$0xf] }
 0x4c0   : > { %4346 = vmatpush.bf16.msrb.mxu2 %v7355_v61  ;;  %4374 = vmatpush.bf16.msra.mxu0 %v7359_v1  ;;  %v7506_v61 = vld [vmem:[#allocation12 + $0x50] sm:$0xf] }
 0x4c1   : > { %v7507_v1 = vor.u32 %v8391_v0, %v7506_v61  ;;  %v8383_v61 = vld [vmem:[#allocation12 + $0x14] sm:$0xf0]  ;;  %v8382_v0 = vld [vmem:[#allocation12 + $0x14] sm:$0xf] }
 0x4c2   : > { %4362 = vmatpush.bf16.msrb.mxu3 %v7403_v21  ;;  %4390 = vmatpush.bf16.msra.mxu1 %v7407_v20  ;;  %v7554_v21 = vld [vmem:[#allocation12 + $0xb0] sm:$0xf]  ;;  %v7475_v2 = vor.u32 %v8383_v61, %v7474_v58  ;;  %v8473_v58 = vld [vmem:[#allocation12 + $0x2e4] sm:$0xf0]  ;;  %v7708_v61 = vld [vmem:[#allocation12 + $0x2e8] sm:$0xf0] }
 0x4c3   : > { %v7555_v20 = vor.u32 %v8403_v6, %v7554_v21  ;;  %v7466_v21 = vld [vmem:[#allocation12] sm:$0xf]  ;;  %v8381_v6 = vld [vmem:[#allocation12 + $0x4] sm:$0xf0] }
 0x4c4   : > { %4347 = vmatpush.bf16.msrb.mxu2 %v7347_v34  ;;  %4375 = vmatpush.bf16.msra.mxu0 %v7351_v11  ;;  %v7500_v34 = vld [vmem:[#allocation12 + $0x48] sm:$0xf0] }
 0x4c6   : > { %4571 = vmatpush.bf16.msra.mxu3 %v7587_v38  ;;  %4599 = vmatpush.bf16.msrb.mxu1 %v7591_v9  ;;  %v7556_v38 = vld [vmem:[#allocation12 + $0xb8] sm:$0xf0]  ;;  %v8388_v9 = vld [vmem:[#allocation12 + $0x44] sm:$0xf] }
 0x4c7   : > { %v7559_v39 = vor.u32 %v8402_v49, %v7556_v38  ;;  %v7503_v11 = vor.u32 %v8388_v9, %v7500_v34  ;;  %v8380_v38 = vld [vmem:[#allocation12 + $0x4] sm:$0xf] }
 0x4c8   : > { %4348 = vmatpush.bf16.msrb.mxu2 %v7339_v26  ;;  %4376 = vmatpush.bf16.msra.mxu0 %v7343_v44  ;;  %v8387_v26 = vld [vmem:[#allocation12 + $0x34] sm:$0xf0]  ;;  %v7495_v44 = vor.u32 %v8386_v33, %v7492_v50 }
 0x4ca   : > { %4572 = vmatpush.bf16.msra.mxu3 %v7579_v16  ;;  %4600 = vmatpush.bf16.msrb.mxu1 %v7583_v23  ;;  %v7547_v16 = vor.u32 %v8401_v43, %v7546_v14  ;;  %v7490_v23 = vld [vmem:[#allocation12 + $0x30] sm:$0xf] }
 0x4cb   : > { %v7491_v60 = vor.u32 %v8387_v26, %v7490_v23 }
 0x4cc   : > { %4557 = vmatpush.bf16.msra.mxu2 %v7523_v31  ;;  %4585 = vmatpush.bf16.msrb.mxu0 %v7527_v63  ;;  %v7539_v63 = vor.u32 %v8399_v28, %v7538_v3 }
 0x4ce   : > { %4573 = vmatpush.bf16.msra.mxu3 %v7571_v22  ;;  %4601 = vmatpush.bf16.msrb.mxu1 %v7575_v29  ;;  %v8385_v22 = vld [vmem:[#allocation12 + $0x24] sm:$0xf0] }
 0x4cf   : > { %v7483_v41 = vor.u32 %v8385_v22, %v7482_v62  ;;  %v8475_v22 = vld [vmem:[#allocation12 + $0x2f4] sm:$0xf0] }
 0x4d0   : > { %4558 = vmatpush.bf16.msra.mxu2 %v7515_v48  ;;  %4586 = vmatpush.bf16.msrb.mxu0 %v7519_v52  ;;  %v7487_v48 = vor.u32 %v8384_v37, %v7484_v42  ;;  %v8397_v52 = vld [vmem:[#allocation12 + $0x84] sm:$0xf0]  ;;  %v8474_v37 = vld [vmem:[#allocation12 + $0x2f4] sm:$0xf] }
 0x4d1   : > { %v7531_v54 = vor.u32 %v8397_v52, %v7530_v51 }
 0x4d2   : > { %4574 = vmatpush.bf16.msra.mxu3 %v7563_v57  ;;  %4602 = vmatpush.bf16.msrb.mxu1 %v7567_v59  ;;  %v7535_v57 = vor.u32 %v8396_v53, %v7532_v55  ;;  %v7706_v53 = vld [vmem:[#allocation12 + $0x2e0] sm:$0xf] }
 0x4d4   : > { %4559 = vmatpush.bf16.msra.mxu2 %v7507_v1  ;;  %4587 = vmatpush.bf16.msrb.mxu0 %v7511_v18  ;;  %v7476_v1 = vld [vmem:[#allocation12 + $0x18] sm:$0xf0] }
 0x4d5   : > { %v7479_v27 = vor.u32 %v8382_v0, %v7476_v1  ;;  %v7650_v0 = vld [vmem:[#allocation12 + $0x270] sm:$0xf] }
 0x4d6   : > { %4575 = vmatpush.bf16.msra.mxu3 %v7555_v20  ;;  %4603 = vmatpush.bf16.msrb.mxu1 %v7559_v39  ;;  %v7467_v20 = vor.u32 %v8381_v6, %v7466_v21  ;;  %v7468_v39 = vld [vmem:[#allocation12 + $0x8] sm:$0xf0]  ;;  %v7707_v21 = vor.u32 %v8473_v58, %v7706_v53  ;;  %v8465_v58 = vld [vmem:[#allocation12 + $0x2a4] sm:$0xf0] }
 0x4d7   : > { %v7471_v25 = vor.u32 %v8380_v38, %v7468_v39 }
 0x4d8   : > { %4560 = vmatpush.bf16.msra.mxu2 %v7499_v5  ;;  %4588 = vmatpush.bf16.msrb.mxu0 %v7503_v11 }
 0x4da   : > { %4576 = vmatpush.bf16.msra.mxu3 %v7547_v16  ;;  %4604 = vmatpush.bf16.msrb.mxu1 %v7551_v45 }
 0x4dc   : > { %4561 = vmatpush.bf16.msra.mxu2 %v7491_v60  ;;  %4589 = vmatpush.bf16.msrb.mxu0 %v7495_v44 }
 0x4de   : > { %4577 = vmatpush.bf16.msra.mxu3 %v7539_v63  ;;  %4605 = vmatpush.bf16.msrb.mxu1 %v7543_v35 }
 0x4e0   : > { %4562 = vmatpush.bf16.msra.mxu2 %v7483_v41  ;;  %4590 = vmatpush.bf16.msrb.mxu0 %v7487_v48 }
 0x4e2   : > { %4578 = vmatpush.bf16.msra.mxu3 %v7531_v54  ;;  %4606 = vmatpush.bf16.msrb.mxu1 %v7535_v57 }
 0x4e4   : > { %4563 = vmatpush.bf16.msra.mxu2 %v7475_v2  ;;  %4591 = vmatpush.bf16.msrb.mxu0 %v7479_v27  ;;  %v8459_v2 = vld [vmem:[#allocation12 + $0x274] sm:$0xf0]  ;;  %v8458_v27 = vld [vmem:[#allocation12 + $0x274] sm:$0xf] }
 0x4e8   : > { %4564 = vmatpush.bf16.msra.mxu2 %v7467_v20  ;;  %4592 = vmatpush.bf16.msrb.mxu0 %v7471_v25  ;;  %v8471_v20 = vld [vmem:[#allocation12 + $0x2d4] sm:$0xf0]  ;;  %v8470_v25 = vld [vmem:[#allocation12 + $0x2d4] sm:$0xf] }
 0x502   : > { %v9511_v15 = vpop.f32.mrf.mxu1 }
 0x508   : > { %v9513_v46 = vpop.f32.mrf.mxu3  ;;  %v9515_v47 = vpop.f32.mrf.mxu0 }
 0x509   : > { %v3599_v34 = vadd.f32 %v9511_v15, %v9515_v47  ;;  %v4077_v47 = vperm.slane %v4074_v19, 1 }
 0x50a   : > { %v9517_v56 = vpop.f32.mrf.mxu1 }
 0x50e   : > { %v9519_v24 = vpop.f32.mrf.mxu2 }
 0x50f   : > { %v3571_v45 = vadd.f32 %v9513_v46, %v9519_v24  ;;  %v4076_v46 = vperm.slane %v4074_v19, 0  ;;  %v7714_v24 = vld [vmem:[#allocation12 + $0x2f0] sm:$0xf] }
 0x510   : > { %v9521_v10 = vpop.f32.mrf.mxu3  ;;  %v9523_v7 = vpop.f32.mrf.mxu0  ;;  %v7715_v52 = vor.u32 %v8475_v22, %v7714_v24 }
 0x511   : > { %v3601_v43 = vadd.f32 %v9517_v56, %v9523_v7 }
 0x512   : > { %v9525_v17 = vpop.f32.mrf.mxu1 }
 0x516   : > { %v9527_v31 = vpop.f32.mrf.mxu2 }
 0x517   : > { %v3573_v56 = vadd.f32 %v9521_v10, %v9527_v31 }
 0x518   : > { %v3786_v29 = vpop.f32.mrf.mxu3  ;;  %v3800_v40 = vpop.f32.mrf.mxu0 }
 0x519   : > { %v3801_v14 = vadd.f32 %v3800_v40, %v3599_v34  ;;  %v7716_v40 = vld [vmem:[#allocation12 + $0x2f8] sm:$0xf0] }
 0x51a   : > { %v3816_v59 = vpop.f32.mrf.mxu1 }
 0x51b   : > { %v3815_v23 = vadd.f32 %v9525_v17, %v3801_v14 }
 0x51e   : > { %v3772_v18 = vpop.f32.mrf.mxu2 }
 0x51f   : > { %v3773_v60 = vadd.f32 %v3772_v18, %v3571_v45  ;;  %v7652_v18 = vld [vmem:[#allocation12 + $0x278] sm:$0xf0] }
 0x520   : > { %v3802_v49 = vpop.f32.mrf.mxu0  ;;  %v3788_v8 = vpop.f32.mrf.mxu3  ;;  %v7655_v34 = vor.u32 %v8458_v27, %v7652_v18  ;;  %v8451_v18 = vld [vmem:[#allocation12 + $0x234] sm:$0xf0] }
 0x521   : > { %v3803_v26 = vadd.f32 %v3802_v49, %v3601_v43  ;;  %v3787_v30 = vadd.f32 %v3786_v29, %v3773_v60  ;;  %v7719_v29 = vor.u32 %v8474_v37, %v7716_v40  ;;  %v7698_v49 = vld [vmem:[#allocation12 + $0x2d0] sm:$0xf]  ;;  %v8457_v43 = vld [vmem:[#allocation12 + $0x264] sm:$0xf0]  ;;  %v8468_v60 = vld [vmem:[#allocation12 + $0x2c4] sm:$0xf] }
 0x522   : > { %v4065_v9 = vpop.f32.mrf.mxu1  ;;  %v7699_v45 = vor.u32 %v8471_v20, %v7698_v49 }
 0x523   : > { %v3817_v7 = vadd.f32 %v3816_v59, %v3803_v26  ;;  %v8472_v59 = vld [vmem:[#allocation12 + $0x2e4] sm:$0xf]  ;;  %v7690_v26 = vld [vmem:[#allocation12 + $0x2c0] sm:$0xf] }
 0x524   : > { %v7711_v6 = vor.u32 %v8472_v59, %v7708_v61  ;;  %v8464_v59 = vld [vmem:[#allocation12 + $0x2a4] sm:$0xf]  ;;  %v7676_v61 = vld [vmem:[#allocation12 + $0x2a8] sm:$0xf0] }
 0x525   : > { %v7679_v20 = vor.u32 %v8464_v59, %v7676_v61  ;;  %v8498_v59 = vld [vmem:[#allocation13 + $0xb0] sm:$0xff]  ;;  %v8504_v61 = vld [vmem:[#allocation13 + $0xe0] sm:$0xff] }
 0x526   : > { %v3774_v5 = vpop.f32.mrf.mxu2 }
 0x527   : > { %v3775_v63 = vadd.f32 %v3774_v5, %v3573_v56  ;;  %v7651_v5 = vor.u32 %v8459_v2, %v7650_v0  ;;  %v7634_v56 = vld [vmem:[#allocation12 + $0x250] sm:$0xf] }
 0x528   : > { %v4051_v11 = vpop.f32.mrf.mxu0  ;;  %v4037_v36 = vpop.f32.mrf.mxu3  ;;  %v7618_v2 = vld [vmem:[#allocation12 + $0x230] sm:$0xf] }
 0x529   : > { %v4066_v16 = vadd.f32 %v4065_v9, %v4051_v11  ;;  %v3789_v48 = vadd.f32 %v3788_v8, %v3775_v63  ;;  %v7700_v8 = vld [vmem:[#allocation12 + $0x2d8] sm:$0xf0]  ;;  %v7642_v11 = vld [vmem:[#allocation12 + $0x260] sm:$0xf] }
 0x52a   : > { %v4067_v50 = vpop.f32.mrf.mxu1 }
 0x52b   : > { %v4071_v15 = vadd.f32 %v4066_v16, %v3815_v23  ;;  %v8456_v16 = vld [vmem:[#allocation12 + $0x264] sm:$0xf]  ;;  %v7703_v23 = vor.u32 %v8470_v25, %v7700_v8  ;;  %v7666_v25 = vld [vmem:[#allocation12 + $0x290] sm:$0xf]  ;;  %v8463_v8 = vld [vmem:[#allocation12 + $0x294] sm:$0xf0] }
 0x52d   : > { %v4081_v32 = vadd.f32 %v4077_v47, %v4071_v15  ;;  %v7692_v15 = vld [vmem:[#allocation12 + $0x2c8] sm:$0xf0] }
 0x52e   : > { %v4023_v33 = vpop.f32.mrf.mxu2 }
 0x52f   : > { %v4038_v3 = vadd.f32 %v4037_v36, %v4023_v33  ;;  %v9541_v51 = vmax.f32 %v4081_v32, 0.0  ;;  %v7644_v36 = vld [vmem:[#allocation12 + $0x268] sm:$0xf0]  ;;  %v8469_v33 = vld [vmem:[#allocation12 + $0x2c4] sm:$0xf0]  ;;  %v7695_v32 = vor.u32 %v8468_v60, %v7692_v15 }
 0x530   : > { %v4053_v44 = vpop.f32.mrf.mxu0  ;;  %v4039_v41 = vpop.f32.mrf.mxu3  ;;  %v7691_v63 = vor.u32 %v8469_v33, %v7690_v26  ;;  %v7667_v33 = vor.u32 %v8463_v8, %v7666_v25  ;;  %v7658_v15 = vld [vmem:[#allocation12 + $0x280] sm:$0xf]  ;;  %v8483_v25 = vld [vmem:[#allocation13 + $0x38] sm:$0xff] }
 0x531   : > { %v4068_v28 = vadd.f32 %v4067_v50, %v4053_v44  ;;  %v4070_v17 = vadd.f32 %v4038_v3, %v3787_v30  ;;  %v4089_v19 = vrot.slane %v9541_v51, 7  ;;  %v7643_v50 = vor.u32 %v8457_v43, %v7642_v11  ;;  %v8454_v3 = vld [vmem:[#allocation12 + $0x254] sm:$0xf] }
 0x532   : > { %v7647_v44 = vor.u32 %v8456_v16, %v7644_v36  ;;  %v7610_v16 = vld [vmem:[#allocation12 + $0x220] sm:$0xf]  ;;  %v4101_v26 = vrot.slane %v9541_v51, 1 }
 0x533   : > { %v4073_v35 = vadd.f32 %v4068_v28, %v3817_v7  ;;  %v4080_v54 = vadd.f32 %v4076_v46, %v4070_v17  ;;  %v8455_v7 = vld [vmem:[#allocation12 + $0x254] sm:$0xf0]  ;;  %v7636_v28 = vld [vmem:[#allocation12 + $0x258] sm:$0xf0]  ;;  %v8466_v17 = vld [vmem:[#allocation12 + $0x2b4] sm:$0xf] }
 0x534   : > { %v7635_v37 = vor.u32 %v8455_v7, %v7634_v56  ;;  %v7639_v40 = vor.u32 %v8454_v3, %v7636_v28  ;;  %v7602_v3 = vld [vmem:[#allocation12 + $0x210] sm:$0xf]  ;;  %v8447_v28 = vld [vmem:[#allocation12 + $0x214] sm:$0xf0] }
 0x535   : > { %v4083_v62 = vadd.f32 %v4077_v47, %v4073_v35  ;;  %v9547_v38 = vmax.f32 %v4080_v54, 0.0  ;;  %v7682_v35 = vld [vmem:[#allocation12 + $0x2b0] sm:$0xf] }
 0x536   : > { %v4025_v42 = vpop.f32.mrf.mxu2 }
 0x537   : > { %v9543_v10 = vmax.f32 %v4083_v62, 0.0  ;;  %v4040_v31 = vadd.f32 %v4039_v41, %v4025_v42  ;;  %v7684_v62 = vld [vmem:[#allocation12 + $0x2b8] sm:$0xf0]  ;;  %v4088_v22 = vrot.slane %v9547_v38, 7  ;;  %v7626_v41 = vld [vmem:[#allocation12 + $0x240] sm:$0xf] }
 0x538   : > { %v7687_v54 = vor.u32 %v8466_v17, %v7684_v62  ;;  %v7603_v17 = vor.u32 %v8447_v28, %v7602_v3  ;;  %v8514_v3 = vld [vmem:[#allocation13 + $0x130] sm:$0xff] }
 0x539   : > { %v4072_v55 = vadd.f32 %v4040_v31, %v3789_v48  ;;  %v4147_v57 = vpack.c.bf16 %v9543_v10, %v9541_v51  ;;  %v4091_v9 = vrot.slane %v9543_v10, 7  ;;  %v8453_v48 = vld [vmem:[#allocation12 + $0x244] sm:$0xf0]  ;;  %v8452_v31 = vld [vmem:[#allocation12 + $0x244] sm:$0xf] }
 0x53a   : > { %v7627_v0 = vor.u32 %v8453_v48, %v7626_v41  ;;  %v8446_v51 = vld [vmem:[#allocation12 + $0x214] sm:$0xf]  ;;  %v7596_v41 = vld [vmem:[#allocation12 + $0x208] sm:$0xf0] }
 0x53b   : > { %v4082_v1 = vadd.f32 %v4076_v46, %v4072_v55  ;;  %4363 = vmatmul.bf16.vlgmr.msrb.gmra.mxu3 %v4147_v57  ;;  %4391 = vmatmul.bf16.vlgmr.msra.gmra.mxu1 %v4147_v57  ;;  %v4095_v47 = vsel %vm895_vm2, %v4091_v9, %v4089_v19  ;;  %v8467_v46 = vld [vmem:[#allocation12 + $0x2b4] sm:$0xf0]  ;;  %v4093_v53 = vsel %vm895_vm2, %v4089_v19, %v4091_v9  ;;  %v7674_v55 = vld [vmem:[#allocation12 + $0x2a0] sm:$0xf]  ;;  %v8462_v9 = vld [vmem:[#allocation12 + $0x294] sm:$0xf] }
 0x53c   : > { %4822 = vmatpush.bf16.msrb.mxu3 %v7715_v52  ;;  %4850 = vmatpush.bf16.msra.mxu1 %v7719_v29  ;;  %v4097_v24 = vmul.f32 %v9266_v12, %v4095_v47  ;;  %v7683_v42 = vor.u32 %v8467_v46, %v7682_v35  ;;  %v7628_v52 = vld [vmem:[#allocation12 + $0x248] sm:$0xf0]  ;;  %v7675_v49 = vor.u32 %v8465_v58, %v7674_v55  ;;  %v8449_v19 = vld [vmem:[#allocation12 + $0x224] sm:$0xf0]  ;;  %v8460_v47 = vld [vmem:[#allocation12 + $0x284] sm:$0xf] }
 0x53d   : > { %v9549_v39 = vmax.f32 %v4082_v1, 0.0  ;;  %v7631_v1 = vor.u32 %v8452_v31, %v7628_v52  ;;  %v7611_v56 = vor.u32 %v8449_v19, %v7610_v16  ;;  %v8506_v55 = vld [vmem:[#allocation13 + $0xf0] sm:$0xff]  ;;  %v8505_v58 = vld [vmem:[#allocation13 + $0xe8] sm:$0xff]  ;;  %v8523_v16 = vld [vmem:[#allocation13 + $0x178] sm:$0xff] }
 0x53e   : > { %v4113_v57 = vpack.c.bf16 %v4093_v53, %v4097_v24  ;;  %v4100_v24 = vrot.slane %v9547_v38, 1  ;;  %v8488_v19 = vld [vmem:[#allocation13 + $0x60] sm:$0xff] }
 0x53f   : > { %v4146_v14 = vpack.c.bf16 %v9549_v39, %v9547_v38  ;;  %v4090_v30 = vrot.slane %v9549_v39, 7 }
 0x540   : > { %4823 = vmatpush.bf16.msrb.mxu3 %v7707_v21  ;;  %4851 = vmatpush.bf16.msra.mxu1 %v7711_v6  ;;  %v8450_v21 = vld [vmem:[#allocation12 + $0x234] sm:$0xf]  ;;  %v7620_v6 = vld [vmem:[#allocation12 + $0x238] sm:$0xf0] }
 0x541   : > { %4349 = vmatmul.bf16.vlgmr.msrb.gmra.mxu2 %v4146_v14  ;;  %4377 = vmatmul.bf16.vlgmr.msra.gmra.mxu0 %v4146_v14  ;;  %v4094_v29 = vsel %vm895_vm2, %v4090_v30, %v4088_v22  ;;  %v4092_v11 = vsel %vm895_vm2, %v4088_v22, %v4090_v30  ;;  %v7619_v14 = vor.u32 %v8451_v18, %v7618_v2  ;;  %v7604_v30 = vld [vmem:[#allocation12 + $0x218] sm:$0xf0]  ;;  %v7594_v22 = vld [vmem:[#allocation12 + $0x200] sm:$0xf] }
 0x542   : > { %4808 = vmatpush.bf16.msrb.mxu2 %v7651_v5  ;;  %4836 = vmatpush.bf16.msra.mxu0 %v7655_v34  ;;  %v4096_v27 = vmul.f32 %v9266_v12, %v4094_v29  ;;  %v7668_v5 = vld [vmem:[#allocation12 + $0x298] sm:$0xf0]  ;;  %v4103_v34 = vrot.slane %v9543_v10, 1  ;;  %v7623_v43 = vor.u32 %v8450_v21, %v7620_v6  ;;  %v8461_v10 = vld [vmem:[#allocation12 + $0x284] sm:$0xf0]  ;;  %v7607_v62 = vor.u32 %v8446_v51, %v7604_v30  ;;  %v8496_v2 = vld [vmem:[#allocation13 + $0xa0] sm:$0xff] }
 0x543   : > { %v7671_v60 = vor.u32 %v8462_v9, %v7668_v5  ;;  %v8502_v21 = vld [vmem:[#allocation13 + $0xd0] sm:$0xff]  ;;  %v8495_v6 = vld [vmem:[#allocation13 + $0x98] sm:$0xff]  ;;  %v8520_v30 = vld [vmem:[#allocation13 + $0x160] sm:$0xff] }
 0x544   : > { %4824 = vmatpush.bf16.msrb.mxu3 %v7699_v45  ;;  %4852 = vmatpush.bf16.msra.mxu1 %v7703_v23  ;;  %v4112_v36 = vpack.c.bf16 %v4092_v11, %v4096_v27  ;;  %v8448_v45 = vld [vmem:[#allocation12 + $0x224] sm:$0xf]  ;;  %v7612_v23 = vld [vmem:[#allocation12 + $0x228] sm:$0xf0]  ;;  %v8491_v27 = vld [vmem:[#allocation13 + $0x78] sm:$0xff] }
 0x545   : > { %v7615_v7 = vor.u32 %v8448_v45, %v7612_v23  ;;  %v8494_v5 = vld [vmem:[#allocation13 + $0x90] sm:$0xff]  ;;  %v8481_v23 = vld [vmem:[#allocation13 + $0x28] sm:$0xff]  ;;  %v8479_v51 = vld [vmem:[#allocation13 + $0x18] sm:$0xff] }
 0x546   : > { %4809 = vmatpush.bf16.msrb.mxu2 %v7643_v50  ;;  %4837 = vmatpush.bf16.msra.mxu0 %v7647_v44  ;;  %v7660_v50 = vld [vmem:[#allocation12 + $0x288] sm:$0xf0]  ;;  %v4107_v44 = vsel %vm902_vm3, %v4103_v34, %v4101_v26 }
 0x547   : > { %v7663_v35 = vor.u32 %v8460_v47, %v7660_v50  ;;  %v4111_v46 = vmul.f32 %v9268_v13, %v4107_v44  ;;  %v8515_v47 = vld [vmem:[#allocation13 + $0x138] sm:$0xff]  ;;  %v8480_v44 = vld [vmem:[#allocation13 + $0x20] sm:$0xff] }
 0x548   : > { %4825 = vmatpush.bf16.msrb.mxu3 %v7691_v63  ;;  %4853 = vmatpush.bf16.msra.mxu1 %v7695_v32  ;;  %v4102_v63 = vrot.slane %v9549_v39, 1  ;;  %v7659_v32 = vor.u32 %v8461_v10, %v7658_v15  ;;  %v4105_v39 = vsel %vm902_vm3, %v4101_v26, %v4103_v34  ;;  %v8489_v34 = vld [vmem:[#allocation13 + $0x68] sm:$0xff]  ;;  %v8522_v26 = vld [vmem:[#allocation13 + $0x170] sm:$0xff]  ;;  %v8492_v15 = vld [vmem:[#allocation13 + $0x80] sm:$0xff] }
 0x549   : > { %v4614_v48 = vpack.c.bf16 %v4111_v46, %v4105_v39  ;;  %v8487_v10 = vld [vmem:[#allocation13 + $0x58] sm:$0xff]  ;;  %v8513_v46 = vld [vmem:[#allocation13 + $0x128] sm:$0xff] }
 0x54a   : > { %4810 = vmatpush.bf16.msrb.mxu2 %v7635_v37  ;;  %4838 = vmatpush.bf16.msra.mxu0 %v7639_v40  ;;  %v8445_v37 = vld [vmem:[#allocation12 + $0x204] sm:$0xf0]  ;;  %v8444_v40 = vld [vmem:[#allocation12 + $0x204] sm:$0xf]  ;;  %v4104_v29 = vsel %vm902_vm3, %v4100_v24, %v4102_v63 }
 0x54b   : > { %4579 = vmatmul.bf16.vlgmr.msra.gmra.mxu3 %v4113_v57  ;;  %4607 = vmatmul.bf16.vlgmr.msrb.gmra.mxu1 %v4113_v57  ;;  %v7595_v38 = vor.u32 %v8445_v37, %v7594_v22  ;;  %v7599_v31 = vor.u32 %v8444_v40, %v7596_v41  ;;  %v8499_v57 = vld [vmem:[#allocation13 + $0xb8] sm:$0xff]  ;;  %v8484_v22 = vld [vmem:[#allocation13 + $0x40] sm:$0xff]  ;;  %v8477_v41 = vld [vmem:[#allocation13 + $0x8] sm:$0xff] }
 0x54c   : > { %4826 = vmatpush.bf16.msrb.mxu3 %v7683_v42  ;;  %4854 = vmatpush.bf16.msra.mxu1 %v7687_v54  ;;  %v4106_v42 = vsel %vm902_vm3, %v4102_v63, %v4100_v24  ;;  %v8507_v54 = vld [vmem:[#allocation13 + $0xf8] sm:$0xff]  ;;  %v8478_v24 = vld [vmem:[#allocation13 + $0x10] sm:$0xff]  ;;  %v8512_v37 = vld [vmem:[#allocation13 + $0x120] sm:$0xff] }
 0x54d   : > { %v4110_v52 = vmul.f32 %v9268_v13, %v4106_v42  ;;  %v8518_v42 = vld [vmem:[#allocation13 + $0x150] sm:$0xff] }
 0x54e   : > { %4811 = vmatpush.bf16.msrb.mxu2 %v7627_v0  ;;  %4839 = vmatpush.bf16.msra.mxu0 %v7631_v1  ;;  %v8497_v0 = vld [vmem:[#allocation13 + $0xa8] sm:$0xff]  ;;  %v8503_v1 = vld [vmem:[#allocation13 + $0xd8] sm:$0xff] }
 0x54f   : > { %v4613_v53 = vpack.c.bf16 %v4110_v52, %v4104_v29 }
 0x550   : > { %4827 = vmatpush.bf16.msrb.mxu3 %v7675_v49  ;;  %4855 = vmatpush.bf16.msra.mxu1 %v7679_v20  ;;  %v8490_v49 = vld [vmem:[#allocation13 + $0x70] sm:$0xff]  ;;  %v8501_v20 = vld [vmem:[#allocation13 + $0xc8] sm:$0xff] }
 0x551   : > { %4565 = vmatmul.bf16.vlgmr.msra.gmra.mxu2 %v4112_v36  ;;  %4593 = vmatmul.bf16.vlgmr.msrb.gmra.mxu0 %v4112_v36  ;;  %v8493_v36 = vld [vmem:[#allocation13 + $0x88] sm:$0xff] }
 0x552   : > { %4812 = vmatpush.bf16.msrb.mxu2 %v7619_v14  ;;  %4840 = vmatpush.bf16.msra.mxu0 %v7623_v43  ;;  %v8500_v14 = vld [vmem:[#allocation13 + $0xc0] sm:$0xff]  ;;  %v8482_v43 = vld [vmem:[#allocation13 + $0x30] sm:$0xff] }
 0x554   : > { %4828 = vmatpush.bf16.msrb.mxu3 %v7667_v33  ;;  %4856 = vmatpush.bf16.msra.mxu1 %v7671_v60 }
 0x556   : > { %4813 = vmatpush.bf16.msrb.mxu2 %v7611_v56  ;;  %4841 = vmatpush.bf16.msra.mxu0 %v7615_v7  ;;  %v8521_v56 = vld [vmem:[#allocation13 + $0x168] sm:$0xff]  ;;  %v8486_v7 = vld [vmem:[#allocation13 + $0x50] sm:$0xff] }
 0x558   : > { %4829 = vmatpush.bf16.msrb.mxu3 %v7659_v32  ;;  %4857 = vmatpush.bf16.msra.mxu1 %v7663_v35  ;;  %v8485_v35 = vld [vmem:[#allocation13 + $0x48] sm:$0xff] }
 0x55a   : > { %4814 = vmatpush.bf16.msrb.mxu2 %v7603_v17  ;;  %4842 = vmatpush.bf16.msra.mxu0 %v7607_v62  ;;  %v8519_v17 = vld [vmem:[#allocation13 + $0x158] sm:$0xff] }
 0x55b   : > { %4830 = vmatmul.bf16.vlgmr.msrb.gmra.mxu3 %v4614_v48  ;;  %4858 = vmatmul.bf16.vlgmr.msra.gmra.mxu1 %v4614_v48  ;;  %v8511_v48 = vld [vmem:[#allocation13 + $0x118] sm:$0xff] }
 0x55c   : > { %5085 = vmatpush.bf16.msra.mxu3 %v8507_v54  ;;  %5209 = vmatpush.bf16.msrb.mxu1 %v8491_v27 }
 0x55e   : > { %4815 = vmatpush.bf16.msrb.mxu2 %v7595_v38  ;;  %4843 = vmatpush.bf16.msra.mxu0 %v7599_v31  ;;  %v8476_v38 = vld [vmem:[#allocation13] sm:$0xff]  ;;  %v8517_v31 = vld [vmem:[#allocation13 + $0x148] sm:$0xff] }
 0x560   : > { %5086 = vmatpush.bf16.msra.mxu3 %v8506_v55  ;;  %5210 = vmatpush.bf16.msrb.mxu1 %v8490_v49 }
 0x561   : > { %4816 = vmatmul.bf16.vlgmr.msrb.gmra.mxu2 %v4613_v53  ;;  %4844 = vmatmul.bf16.vlgmr.msra.gmra.mxu0 %v4613_v53  ;;  %v8510_v53 = vld [vmem:[#allocation13 + $0x110] sm:$0xff] }
 0x562   : > { %5071 = vmatpush.bf16.msra.mxu2 %v8499_v57  ;;  %5195 = vmatpush.bf16.msrb.mxu0 %v8483_v25  ;;  %v8516_v57 = vld [vmem:[#allocation13 + $0x140] sm:$0xff] }
 0x564   : > { %5087 = vmatpush.bf16.msra.mxu3 %v8505_v58  ;;  %5211 = vmatpush.bf16.msrb.mxu1 %v8489_v34 }
 0x566   : > { %5072 = vmatpush.bf16.msra.mxu2 %v8498_v59  ;;  %5196 = vmatpush.bf16.msrb.mxu0 %v8482_v43  ;;  %v8509_v59 = vld [vmem:[#allocation13 + $0x108] sm:$0xff] }
 0x568   : > { %5088 = vmatpush.bf16.msra.mxu3 %v8504_v61  ;;  %5212 = vmatpush.bf16.msrb.mxu1 %v8488_v19 }
 0x56a   : > { %5073 = vmatpush.bf16.msra.mxu2 %v8497_v0  ;;  %5197 = vmatpush.bf16.msrb.mxu0 %v8481_v23 }
 0x56c   : > { %5089 = vmatpush.bf16.msra.mxu3 %v8503_v1  ;;  %5213 = vmatpush.bf16.msrb.mxu1 %v8487_v10  ;;  %v4868_v1 = vld [vmem:[%s9710_s24] sm:$0x3] }
 0x56e   : > { %5074 = vmatpush.bf16.msra.mxu2 %v8496_v2  ;;  %5198 = vmatpush.bf16.msrb.mxu0 %v8480_v44 }
 0x570   : > { %5090 = vmatpush.bf16.msra.mxu3 %v8502_v21  ;;  %5214 = vmatpush.bf16.msrb.mxu1 %v8486_v7  ;;  %v8508_v21 = vld [vmem:[#allocation13 + $0x100] sm:$0xff] }
 0x572   : > { %5075 = vmatpush.bf16.msra.mxu2 %v8495_v6  ;;  %5199 = vmatpush.bf16.msrb.mxu0 %v8479_v51 }
 0x574   : > { %5091 = vmatpush.bf16.msra.mxu3 %v8501_v20  ;;  %5215 = vmatpush.bf16.msrb.mxu1 %v8485_v35 }
 0x576   : > { %5076 = vmatpush.bf16.msra.mxu2 %v8494_v5  ;;  %5200 = vmatpush.bf16.msrb.mxu0 %v8478_v24 }
 0x578   : > { %5092 = vmatpush.bf16.msra.mxu3 %v8500_v14  ;;  %5216 = vmatpush.bf16.msrb.mxu1 %v8484_v22 }
 0x57a   : > { %5077 = vmatpush.bf16.msra.mxu2 %v8493_v36  ;;  %5201 = vmatpush.bf16.msrb.mxu0 %v8477_v41 }
 0x57c   : > { %5368 = vmatpush.bf16.msrb.mxu3 %v8523_v16 }
 0x57e   : > { %5078 = vmatpush.bf16.msra.mxu2 %v8492_v15  ;;  %5202 = vmatpush.bf16.msrb.mxu0 %v8476_v38 }
 0x580   : > { %5369 = vmatpush.bf16.msrb.mxu3 %v8522_v26  ;;  %v4870_v26 = vperm.slane %v4868_v1, 0 }
 0x582   : > { %5354 = vmatpush.bf16.msrb.mxu2 %v8515_v47 }
 0x584   : > { %5370 = vmatpush.bf16.msrb.mxu3 %v8521_v56 }
 0x586   : > { %5355 = vmatpush.bf16.msrb.mxu2 %v8514_v3 }
 0x588   : > { %5371 = vmatpush.bf16.msrb.mxu3 %v8520_v30 }
 0x58a   : > { %5356 = vmatpush.bf16.msrb.mxu2 %v8513_v46 }
 0x58c   : > { %5372 = vmatpush.bf16.msrb.mxu3 %v8519_v17 }
 0x58e   : > { %5357 = vmatpush.bf16.msrb.mxu2 %v8512_v37 }
 0x590   : > { %5373 = vmatpush.bf16.msrb.mxu3 %v8518_v42 }
 0x592   : > { %5358 = vmatpush.bf16.msrb.mxu2 %v8511_v48 }
 0x594   : > { %5374 = vmatpush.bf16.msrb.mxu3 %v8517_v31 }
 0x596   : > { %5359 = vmatpush.bf16.msrb.mxu2 %v8510_v53 }
 0x598   : > { %5375 = vmatpush.bf16.msrb.mxu3 %v8516_v57 }
 0x59a   : > { %5360 = vmatpush.bf16.msrb.mxu2 %v8509_v59 }
 0x59e   : > { %5361 = vmatpush.bf16.msrb.mxu2 %v8508_v21  ;;  %v8537_v21 = vld [vmem:[#allocation15 + $0x68] sm:$0xff] }
 0x5b8   : > { %v9581_v18 = vpop.f32.mrf.mxu1 }
 0x5be   : > { %v9583_v8 = vpop.f32.mrf.mxu3  ;;  %v9585_v9 = vpop.f32.mrf.mxu0 }
 0x5bf   : > { %v4393_v29 = vadd.f32 %v9581_v18, %v9585_v9  ;;  %v4871_v9 = vperm.slane %v4868_v1, 1  ;;  %v8539_v1 = vld [vmem:[#allocation15 + $0x78] sm:$0xff] }
 0x5c0   : > { %v9587_v11 = vpop.f32.mrf.mxu1  ;;  %5487 = vmatpush.bf16.msra.mxu0 %v8539_v1 }
 0x5c4   : > { %v9589_v45 = vpop.f32.mrf.mxu2 }
 0x5c5   : > { %v4365_v2 = vadd.f32 %v9583_v8, %v9589_v45 }
 0x5c6   : > { %v9591_v33 = vpop.f32.mrf.mxu3  ;;  %v9593_v60 = vpop.f32.mrf.mxu0 }
 0x5c7   : > { %v4395_v27 = vadd.f32 %v9587_v11, %v9593_v60 }
 0x5c8   : > { %v4608_v50 = vpop.f32.mrf.mxu1 }
 0x5cc   : > { %v4352_v28 = vpop.f32.mrf.mxu2 }
 0x5cd   : > { %v4367_v14 = vadd.f32 %v9591_v33, %v4352_v28 }
 0x5ce   : > { %v4580_v63 = vpop.f32.mrf.mxu3  ;;  %v4594_v32 = vpop.f32.mrf.mxu0 }
 0x5cf   : > { %v4595_v58 = vadd.f32 %v4594_v32, %v4393_v29 }
 0x5d0   : > { %v4610_v62 = vpop.f32.mrf.mxu1 }
 0x5d1   : > { %v4609_v18 = vadd.f32 %v4608_v50, %v4595_v58 }
 0x5d4   : > { %v4566_v40 = vpop.f32.mrf.mxu2 }
 0x5d5   : > { %v4567_v49 = vadd.f32 %v4566_v40, %v4365_v2  ;;  %v8538_v2 = vld [vmem:[#allocation15 + $0x70] sm:$0xff] }
 0x5d6   : > { %v4596_v39 = vpop.f32.mrf.mxu0  ;;  %v4582_v52 = vpop.f32.mrf.mxu3  ;;  %5488 = vmatpush.bf16.msra.mxu0 %v8538_v2 }
 0x5d7   : > { %v4597_v20 = vadd.f32 %v4596_v39, %v4395_v27  ;;  %v4581_v36 = vadd.f32 %v4580_v63, %v4567_v49  ;;  %v8531_v27 = vld [vmem:[#allocation15 + $0x38] sm:$0xff]  ;;  %v8546_v49 = vld [vmem:[#allocation15 + $0xb0] sm:$0xff] }
 0x5d8   : > { %v4859_v54 = vpop.f32.mrf.mxu1  ;;  %5549 = vmatpush.bf16.msra.mxu1 %v8531_v27 }
 0x5d9   : > { %v4611_v8 = vadd.f32 %v4610_v62, %v4597_v20  ;;  %v8536_v20 = vld [vmem:[#allocation15 + $0x60] sm:$0xff] }
 0x5da   : > { %5489 = vmatpush.bf16.msra.mxu0 %v8537_v21 }
 0x5dc   : > { %v4568_v55 = vpop.f32.mrf.mxu2 }
 0x5dd   : > { %v4569_v11 = vadd.f32 %v4568_v55, %v4367_v14  ;;  %v8544_v14 = vld [vmem:[#allocation15 + $0xa0] sm:$0xff] }
 0x5de   : > { %v4845_v61 = vpop.f32.mrf.mxu0  ;;  %v4831_v6 = vpop.f32.mrf.mxu3  ;;  %5490 = vmatpush.bf16.msra.mxu0 %v8536_v20 }
 0x5df   : > { %v4860_v0 = vadd.f32 %v4859_v54, %v4845_v61  ;;  %v4583_v44 = vadd.f32 %v4582_v52, %v4569_v11  ;;  %v8542_v11 = vld [vmem:[#allocation15 + $0x90] sm:$0xff] }
 0x5e0   : > { %v4861_v43 = vpop.f32.mrf.mxu1 }
 0x5e1   : > { %v4865_v25 = vadd.f32 %v4860_v0, %v4609_v18  ;;  %v8547_v18 = vld [vmem:[#allocation15 + $0xb8] sm:$0xff] }
 0x5e3   : > { %v4875_v19 = vadd.f32 %v4871_v9, %v4865_v25  ;;  %v8529_v25 = vld [vmem:[#allocation15 + $0x28] sm:$0xff] }
 0x5e4   : > { %v4817_v5 = vpop.f32.mrf.mxu2 }
 0x5e5   : > { %v4832_v34 = vadd.f32 %v4831_v6, %v4817_v5  ;;  %v4879_v15 = vmax.f32 %v4875_v19, 0.0  ;;  %v8530_v6 = vld [vmem:[#allocation15 + $0x30] sm:$0xff]  ;;  %v8535_v5 = vld [vmem:[#allocation15 + $0x58] sm:$0xff]  ;;  %v8533_v19 = vld [vmem:[#allocation15 + $0x48] sm:$0xff] }
 0x5e6   : > { %v4847_v16 = vpop.f32.mrf.mxu0  ;;  %v4833_v47 = vpop.f32.mrf.mxu3  ;;  %5550 = vmatpush.bf16.msra.mxu1 %v8530_v6  ;;  %5491 = vmatpush.bf16.msra.mxu0 %v8535_v5 }
 0x5e7   : > { %v4862_v45 = vadd.f32 %v4861_v43, %v4847_v16  ;;  %v4864_v23 = vadd.f32 %v4832_v34, %v4581_v36  ;;  %v4883_v51 = vrot.slane %v4879_v15, 7  ;;  %v4895_v42 = vrot.slane %v4879_v15, 1  ;;  %v8528_v34 = vld [vmem:[#allocation15 + $0x20] sm:$0xff]  ;;  %v8534_v43 = vld [vmem:[#allocation15 + $0x50] sm:$0xff]  ;;  %v8527_v16 = vld [vmem:[#allocation15 + $0x18] sm:$0xff] }
 0x5e8   : > { %v8543_v36 = vld [vmem:[#allocation15 + $0x98] sm:$0xff] }
 0x5e9   : > { %v4867_v60 = vadd.f32 %v4862_v45, %v4611_v8  ;;  %v4874_v56 = vadd.f32 %v4870_v26, %v4864_v23  ;;  %v8526_v45 = vld [vmem:[#allocation15 + $0x10] sm:$0xff]  ;;  %v8532_v23 = vld [vmem:[#allocation15 + $0x40] sm:$0xff] }
 0x5ea   : > { %5551 = vmatpush.bf16.msra.mxu1 %v8529_v25  ;;  %5492 = vmatpush.bf16.msra.mxu0 %v8534_v43 }
 0x5eb   : > { %v4877_v10 = vadd.f32 %v4871_v9, %v4867_v60  ;;  %v4878_v63 = vmax.f32 %v4874_v56, 0.0  ;;  %v8545_v9 = vld [vmem:[#allocation15 + $0xa8] sm:$0xff] }
 0x5ec   : > { %v4819_v50 = vpop.f32.mrf.mxu2  ;;  %v8525_v60 = vld [vmem:[#allocation15 + $0x8] sm:$0xff] }
 0x5ed   : > { %v4881_v7 = vmax.f32 %v4877_v10, 0.0  ;;  %v4834_v3 = vadd.f32 %v4833_v47, %v4819_v50  ;;  %v4882_v37 = vrot.slane %v4878_v63, 7  ;;  %v4894_v54 = vrot.slane %v4878_v63, 1  ;;  %v8524_v10 = vld [vmem:[#allocation15] sm:$0xff] }
 0x5ee   : > { %5552 = vmatpush.bf16.msra.mxu1 %v8528_v34  ;;  %5493 = vmatpush.bf16.msra.mxu0 %v8533_v19  ;;  %v8540_v47 = vld [vmem:[#allocation15 + $0x80] sm:$0xff] }
 0x5ef   : > { %v4885_v33 = vrot.slane %v4881_v7, 7  ;;  %v4941_v28 = vpack.c.bf16 %v4881_v7, %v4879_v15  ;;  %v4866_v30 = vadd.f32 %v4834_v3, %v4583_v44  ;;  %v4897_v62 = vrot.slane %v4881_v7, 1  ;;  %v8541_v15 = vld [vmem:[#allocation15 + $0x88] sm:$0xff] }
 0x5f1   : > { %v4889_v32 = vsel %vm895_vm2, %v4885_v33, %v4883_v51  ;;  %v4876_v35 = vadd.f32 %v4870_v26, %v4866_v30  ;;  %5093 = vmatmul.bf16.vlgmr.msra.gmra.mxu3 %v4941_v28  ;;  %v4887_v17 = vsel %vm895_vm2, %v4883_v51, %v4885_v33  ;;  %v4901_v48 = vsel %vm902_vm3, %v4897_v62, %v4895_v42 }
 0x5f2   : > { %v4891_v46 = vmul.f32 %v9266_v12, %v4889_v32  ;;  %v4905_v53 = vmul.f32 %v9268_v13, %v4901_v48  ;;  %v4899_v57 = vsel %vm902_vm3, %v4895_v42, %v4897_v62  ;;  %5553 = vmatpush.bf16.msra.mxu1 %v8527_v16  ;;  %5494 = vmatpush.bf16.msra.mxu0 %v8532_v23 }
 0x5f3   : > { %v4880_v24 = vmax.f32 %v4876_v35, 0.0 }
 0x5f4   : > { %v4907_v22 = vpack.c.bf16 %v4887_v17, %v4891_v46  ;;  %v5224_v58 = vpack.c.bf16 %v4905_v53, %v4899_v57 }
 0x5f5   : > { %v4884_v40 = vrot.slane %v4880_v24, 7  ;;  %v4940_v41 = vpack.c.bf16 %v4880_v24, %v4878_v63  ;;  %v4896_v52 = vrot.slane %v4880_v24, 1  ;;  %v8675_v24 = vld [vmem:[%s9711_s19] ss:$0 sm:$0xff] }
 0x5f6   : > { %5217 = vmatmul.bf16.vlgmr.msrb.gmra.mxu1 %v4907_v22 }
 0x5f7   : > { %v4888_v39 = vsel %vm895_vm2, %v4884_v40, %v4882_v37  ;;  %5079 = vmatmul.bf16.vlgmr.msra.gmra.mxu2 %v4940_v41  ;;  %v4886_v31 = vsel %vm895_vm2, %v4882_v37, %v4884_v40  ;;  %v4900_v55 = vsel %vm902_vm3, %v4896_v52, %v4894_v54  ;;  %v4898_v61 = vsel %vm902_vm3, %v4894_v54, %v4896_v52 }
 0x5f8   : > { %v4890_v38 = vmul.f32 %v9266_v12, %v4888_v39  ;;  %v4904_v59 = vmul.f32 %v9268_v13, %v4900_v55  ;;  %5629 = vmatpush.bf16.msra.mxu2 %v8547_v18  ;;  %5554 = vmatpush.bf16.msra.mxu1 %v8526_v45 }
 0x5fa   : > { %v4906_v29 = vpack.c.bf16 %v4886_v31, %v4890_v38  ;;  %v5223_v0 = vpack.c.bf16 %v4904_v59, %v4898_v61 }
 0x5fc   : > { %5203 = vmatmul.bf16.vlgmr.msrb.gmra.mxu0 %v4906_v29  ;;  %5630 = vmatpush.bf16.msra.mxu2 %v8546_v49  ;;  %v8676_v49 = vld [vmem:[%s9712_s18] ss:$0 sm:$0xff] }
 0x5fd   : > { %5555 = vmatpush.bf16.msra.mxu1 %v8525_v60 }
 0x600   : > { %5631 = vmatpush.bf16.msra.mxu2 %v8545_v9 }
 0x601   : > { %5376 = vmatmul.bf16.vlgmr.msrb.gmra.mxu3 %v5224_v58  ;;  %5556 = vmatpush.bf16.msra.mxu1 %v8524_v10 }
 0x604   : > { %5632 = vmatpush.bf16.msra.mxu2 %v8544_v14 }
 0x607   : > { %5362 = vmatmul.bf16.vlgmr.msrb.gmra.mxu2 %v5223_v0 }
 0x608   : > { %5633 = vmatpush.bf16.msra.mxu2 %v8543_v36 }
 0x60c   : > { %5634 = vmatpush.bf16.msra.mxu2 %v8542_v11 }
 0x610   : > { %5635 = vmatpush.bf16.msra.mxu2 %v8541_v15 }
 0x614   : > { %5636 = vmatpush.bf16.msra.mxu2 %v8540_v47 }
 0x673   : > { %v5218_v3 = vpop.f32.mrf.mxu1 }
 0x674   : > { %v5094_v8 = vpop.f32.mrf.mxu3 }
 0x679   : > { %v5204_v56 = vpop.f32.mrf.mxu0 }
 0x67a   : > { %v5080_v26 = vpop.f32.mrf.mxu2 }
 0x67b   : > { %v5095_v7 = vadd.f32 %v5094_v8, %v5080_v26  ;;  %v5220_v62 = vpop.f32.mrf.mxu1 }
 0x67c   : > { %v5096_v50 = vpop.f32.mrf.mxu3 }
 0x67d   : > { %v5205_v51 = vadd.f32 %v5204_v56, %v5095_v7 }
 0x67f   : > { %v5219_v32 = vadd.f32 %v5218_v3, %v5205_v51 }
 0x681   : > { %v5206_v35 = vpop.f32.mrf.mxu0 }
 0x682   : > { %v5082_v44 = vpop.f32.mrf.mxu2 }
 0x683   : > { %v5097_v30 = vadd.f32 %v5096_v50, %v5082_v44 }
 0x684   : > { %v5377_v33 = vpop.f32.mrf.mxu3 }
 0x685   : > { %v5207_v17 = vadd.f32 %v5206_v35, %v5097_v30 }
 0x687   : > { %v5221_v41 = vadd.f32 %v5220_v62, %v5207_v17 }
 0x68a   : > { %v5363_v28 = vpop.f32.mrf.mxu2 }
 0x68b   : > { %v5378_v63 = vadd.f32 %v5377_v33, %v5363_v28 }
 0x68c   : > { %v5379_v37 = vpop.f32.mrf.mxu3 }
 0x68d   : > { %v5382_v46 = vadd.f32 %v5378_v63, %v5219_v32 }
 0x68f   : > { %v5388_v22 = vadd.f32 %v8675_v24, %v5382_v46 }
 0x691   : > { %v5390_v48 = vmax.f32 %v5388_v22, 0.0 }
 0x692   : > { %v5365_v40 = vpop.f32.mrf.mxu2 }
 0x693   : > { %v5380_v42 = vadd.f32 %v5379_v37, %v5365_v40  ;;  %v5392_v52 = vrot.slane %v5390_v48, 7  ;;  %v5398_v29 = vrot.slane %v5390_v48, 1 }
 0x695   : > { %v5383_v39 = vadd.f32 %v5380_v42, %v5221_v41 }
 0x697   : > { %v5389_v38 = vadd.f32 %v8675_v24, %v5383_v39 }
 0x699   : > { %v5391_v31 = vmax.f32 %v5389_v38, 0.0 }
 0x69b   : > { %v5393_v53 = vrot.slane %v5391_v31, 7  ;;  %v5399_v54 = vrot.slane %v5391_v31, 1  ;;  %v5421_v55 = vpack.c.bf16 %v5391_v31, %v5390_v48 }
 0x69d   : > { %v5395_v57 = vsel %vm895_vm2, %v5393_v53, %v5392_v52  ;;  %v5401_v58 = vsel %vm902_vm3, %v5399_v54, %v5398_v29  ;;  %5495 = vmatmul.bf16.vlgmr.msra.gmra.mxu0 %v5421_v55  ;;  %v5394_v0 = vsel %vm895_vm2, %v5392_v52, %v5393_v53  ;;  %v5400_v1 = vsel %vm902_vm3, %v5398_v29, %v5399_v54 }
 0x69e   : > { %v5396_v59 = vmul.f32 %v9266_v12, %v5395_v57  ;;  %v5403_v61 = vmul.f32 %v9268_v13, %v5401_v58 }
 0x6a0   : > { %v5404_v2 = vpack.c.bf16 %v5394_v0, %v5396_v59  ;;  %v5563_v27 = vpack.c.bf16 %v5403_v61, %v5400_v1 }
 0x6a2   : > { %5557 = vmatmul.bf16.vlgmr.msra.gmra.mxu1 %v5404_v2  ;;  %5637 = vmatmul.bf16.vlgmr.msra.gmra.mxu2 %v5563_v27 }
 0x71a   : > { %v5496_v21 = vpop.f32.mrf.mxu0 }
 0x71f   : > { %v5558_v18 = vpop.f32.mrf.mxu1 }
 0x720   : > { %v5559_v6 = vadd.f32 %v5558_v18, %v5496_v21 }
 0x722   : > { %v5498_v25 = vpop.f32.mrf.mxu0 }
 0x725   : > { %v5638_v12 = vpop.f32.mrf.mxu2 }
 0x726   : > { %v5643_v20 = vadd.f32 %v5638_v12, %v5559_v6 }
 0x727   : > { %v5560_v13 = vpop.f32.mrf.mxu1 }
 0x728   : > { %v5649_v4 = vadd.f32 %v8676_v49, %v5643_v20  ;;  %v5561_v9 = vadd.f32 %v5560_v13, %v5498_v25 }
 0x72a   : > { %5652 = vst.msk [vmem:[%s841_s26] sm:$0xff] %vm5651_vm4, %v5649_v4 }
 0x72d   : > { %v5640_v5 = vpop.f32.mrf.mxu2 }
 0x72e   : > { %v5644_v34 = vadd.f32 %v5640_v5, %v5561_v9 }
 0x730   : > { %v5650_v14 = vadd.f32 %v8676_v49, %v5644_v34 }
 0x732   : > { %5653 = vst.msk [vmem:[%s841_s26 + $0x8] sm:$0xff] %vm5651_vm4, %v5650_v14 }
 0x733 PF: > { %s9714_s30 = sld [smem:[#allocation21_spill]]  ;;  %s9715_s2 = smov %s8985_s25 }
 0x734   : > { %s9716_s25 = smov %s9718_s28 }
 0x739   : > { %s36_s26 = sadd.s32 1, %s9714_s30  }
 0x73a   : > { %p33_p8 = scmp.ge.s32.totalorder %s36_s26, 4  }
 0x73c   :  { %35 = sbr.rel (!%p33_p8) target bundleno = 20 (0x14), region = 187 }
 0x741   :  { %5683 = vsyncpa [#allocation3], 1 }
 0x742   :  { %5685 = vsyncpa [#allocation3 + $0x1], 1 }
 0x743   :  { %5686 = vsyncpa [#allocation5], 1 }
 0x744   :  { %5687 = vsyncpa [#allocation8], 1 }
 0x745   :  { %5688 = vsyncpa [#allocation11], 1 }
 0x746   :  { %5689 = vsyncpa [#allocation14], 1 }

</bundles_post_ra>
